<compile_context>
chip_gen: v7x
topology: tpu7x:2x2x1
jax: 0.10.0
libtpu: 0.0.40
codegen_flags: <defaults>
</compile_context>

<pallas_src>
import math
import functools

import jax
import jax.numpy as jnp
from jax.experimental import pallas as pl
from jax.experimental.pallas import tpu as pltpu


def _round_up(a, b):
    return (a + b - 1) // b * b


def _arcmargin_kernel(xn_ref, wnt_ref, label_ref, o_ref, *,
                      s, cos_m, sin_m, th, mm, ls_eps, easy_margin,
                      tn, out_features):
    # grid = (class tiles [outer, parallel], batch tiles [inner, arbitrary])
    # xn_ref    : (tb, D)  bf16  pre-normalized input rows
    # wnt_ref   : (D, tn)  bf16  pre-normalized, pre-transposed weight columns
    #                            (block index constant across the inner batch
    #                             sweep -> resident in VMEM, fetched once)
    # label_ref : (tb, 1)  i32   class index per row
    # o_ref     : (tb, tn) f32
    j = pl.program_id(0)                      # class-tile index

    # cosine = normalize(x) @ normalize(W)^T  -> bf16 MXU, f32 accumulate
    cosine = jnp.dot(xn_ref[...], wnt_ref[...],
                     preferred_element_type=jnp.float32)

    # Margin math (VPU).  Clamp guards NaN when |cosine| > 1 by a ULP.
    sine = jnp.sqrt(jnp.maximum(1.0 - cosine * cosine, 0.0))
    phi = cosine * cos_m - sine * sin_m
    if easy_margin:
        phi = jnp.where(cosine > 0.0, phi, cosine)
    else:
        phi = jnp.where(cosine > th, phi, cosine - mm)

    # one_hot.scatter_(1, label, 1): fold the tile offset onto the (tb, 1)
    # label vector (1 vreg op) instead of adding j*tn to the full iota tile.
    col_ids = jax.lax.broadcasted_iota(jnp.int32, cosine.shape, 1)
    local_label = label_ref[...] - j * tn
    one_hot = (col_ids == local_label).astype(jnp.float32)
    if ls_eps > 0.0:
        one_hot = (1.0 - ls_eps) * one_hot + ls_eps / out_features

    # one_hot*phi + (1-one_hot)*cosine  ==  cosine + one_hot*(phi - cosine)
    o_ref[...] = ((cosine + one_hot * (phi - cosine)) * s).astype(o_ref.dtype)


def arc_margin_product(x, weight, label, *, s=30.0, m=0.5,
                       easy_margin=False, ls_eps=0.0,
                       tb=256, tn=512):
    """ArcFace margin head forward. x: [B, D] f32, weight: [C, D] f32, label: [B] int."""
    B, D = x.shape
    C, D2 = weight.shape
    assert D == D2

    # Shrink tiles for tiny problems while keeping (8, 128) alignment.
    tb = max(8, min(tb, _round_up(B, 8)))
    tn = max(128, min(tn, _round_up(C, 128)))
    B_pad = _round_up(B, tb)
    C_pad = _round_up(C, tn)

    cos_m = math.cos(m)
    sin_m = math.sin(m)
    th = math.cos(math.pi - m)
    mm = math.sin(math.pi - m) * m

    # ---- hoisted one-shot normalization + bf16 cast (single mem-bound pass) ----
    xn = (x / jnp.maximum(jnp.linalg.norm(x, axis=-1, keepdims=True), 1e-12)
          ).astype(jnp.bfloat16)
    wn = (weight / jnp.maximum(jnp.linalg.norm(weight, axis=-1, keepdims=True),
                               1e-12)).astype(jnp.bfloat16)
    # TODO(synk): for inference-style call patterns, cache the padded [D, C_pad]
    # bf16 W^T across calls (it only changes when `weight` does).
    if C_pad != C:
        wn = jnp.pad(wn, ((0, C_pad - C), (0, 0)))
    wnt = wn.T                                      # [D, C_pad]  MXU-native (K, N)

    if B_pad != B:
        xn = jnp.pad(xn, ((0, B_pad - B), (0, 0)))
        label = jnp.pad(label, (0, B_pad - B))
    label2d = label.astype(jnp.int32).reshape(B_pad, 1)

    kernel = functools.partial(
        _arcmargin_kernel,
        s=s, cos_m=cos_m, sin_m=sin_m, th=th, mm=mm,
        ls_eps=ls_eps, easy_margin=easy_margin,
        tn=tn, out_features=C,
    )

    n_class_tiles = C_pad // tn
    n_batch_tiles = B_pad // tb

    # Double-buffered per-step working set (bf16 inputs, f32 output tile);
    # request ~4x that (floor 16 MiB) instead of the whole v7x 64 MiB.
    est_vmem = 2 * (2 * tb * D + 2 * D * tn + 4 * tb * tn + 4 * tb)
    vmem_limit = int(min(max(4 * est_vmem, 16 * 1024 * 1024),
                         48 * 1024 * 1024))

    out = pl.pallas_call(
        kernel,
        out_shape=jax.ShapeDtypeStruct((B_pad, C_pad), jnp.float32),
        grid_spec=pltpu.PrefetchScalarGridSpec(
            num_scalar_prefetch=0,
            # Classes OUTER (parallel -> can shard across v7x TensorCores),
            # batch INNER so W^T stays resident in VMEM across the inner sweep
            # and is read from HBM exactly once per class tile.
            grid=(n_class_tiles, n_batch_tiles),
            in_specs=[
                pl.BlockSpec((tb, D), lambda j, i: (i, 0)),   # normalized x rows
                pl.BlockSpec((D, tn), lambda j, i: (0, j)),   # normalized W^T cols
                pl.BlockSpec((tb, 1), lambda j, i: (i, 0)),   # labels for row tile
            ],
            out_specs=pl.BlockSpec((tb, tn), lambda j, i: (i, j)),
        ),
        compiler_params=pltpu.CompilerParams(
            dimension_semantics=("parallel", "arbitrary"),
            vmem_limit_bytes=vmem_limit),
        cost_estimate=pl.CostEstimate(
            flops=2 * B_pad * C_pad * D,
            transcendentals=0,
            bytes_accessed=(2 * C_pad * D                     # W^T streamed once
                            + 2 * B_pad * D * n_class_tiles   # x per class tile
                            + 4 * B_pad * n_class_tiles       # labels
                            + 4 * B_pad * C_pad)),            # output
    )(xn, wnt, label2d)

    if B_pad != B or C_pad != C:
        out = out[:B, :C]
    return out


def arc_margin_product_ref(x, weight, label, *, s=30.0, m=0.5,
                           easy_margin=False, ls_eps=0.0, bf16_operands=False):
    """Pure-JAX reference (mirrors the PyTorch forward).

    bf16_operands=True rounds the normalized operands to bf16 exactly like the
    kernel does, so the comparison isolates kernel logic from dtype choice.
    """
    cos_m, sin_m = math.cos(m), math.sin(m)
    th = math.cos(math.pi - m)
    mm = math.sin(math.pi - m) * m
    xn = x / jnp.maximum(jnp.linalg.norm(x, axis=-1, keepdims=True), 1e-12)
    wn = weight / jnp.maximum(jnp.linalg.norm(weight, axis=-1, keepdims=True),
                              1e-12)
    if bf16_operands:
        xn = xn.astype(jnp.bfloat16)
        wn = wn.astype(jnp.bfloat16)
        cosine = jnp.dot(xn, wn.T, preferred_element_type=jnp.float32)
    else:
        cosine = jnp.dot(xn, wn.T, precision=jax.lax.Precision.HIGHEST)
    cosine = cosine.astype(jnp.float32)
    sine = jnp.sqrt(jnp.maximum(1.0 - cosine ** 2, 0.0))
    phi = cosine * cos_m - sine * sin_m
    if easy_margin:
        phi = jnp.where(cosine > 0, phi, cosine)
    else:
        phi = jnp.where(cosine > th, phi, cosine - mm)
    one_hot = jax.nn.one_hot(label, weight.shape[0], dtype=jnp.float32)
    if ls_eps > 0:
        one_hot = (1 - ls_eps) * one_hot + ls_eps / weight.shape[0]
    return (one_hot * phi + (1.0 - one_hot) * cosine) * s


if __name__ == "__main__":
    # Small shapes consistent with the module: embedding_size=512 (as in CONFIG),
    # modest batch and class count; B and C deliberately NOT tile-multiples to
    # exercise the padding/slicing path.
    B, D, C = 96, 512, 1000
    s_cfg, m_cfg, ls_eps_cfg, easy_cfg = 30.0, 0.5, 0.0, False

    key = jax.random.PRNGKey(0)
    kx, kw, kl = jax.random.split(key, 3)

    x = jax.random.normal(kx, (B, D), dtype=jnp.float32)

    # nn.init.xavier_uniform_ on weight [out_features, in_features]
    bound = math.sqrt(6.0 / (D + C))
    weight = jax.random.uniform(kw, (C, D), dtype=jnp.float32,
                                minval=-bound, maxval=bound)

    label = jax.random.randint(kl, (B,), 0, C, dtype=jnp.int32)

    # Default (large-tile) path, jitted so the wrapper-side normalize/pad/
    # transpose fuses into a single pre-pass.
    fwd = jax.jit(functools.partial(arc_margin_product, s=s_cfg, m=m_cfg,
                                    easy_margin=easy_cfg, ls_eps=ls_eps_cfg))
    out = jax.block_until_ready(fwd(x, weight, label))
    assert out.shape == (B, C)

    # Small-tile path: exercises multiple tiles along BOTH grid axes
    # (4 class tiles x 2 batch tiles) and the W-resident inner sweep.
    out_small = jax.block_until_ready(
        arc_margin_product(x, weight, label, s=s_cfg, m=m_cfg,
                           easy_margin=easy_cfg, ls_eps=ls_eps_cfg,
                           tb=64, tn=256))

    ref_bf16 = arc_margin_product_ref(x, weight, label, s=s_cfg, m=m_cfg,
                                      easy_margin=easy_cfg, ls_eps=ls_eps_cfg,
                                      bf16_operands=True)
    ref_f32 = arc_margin_product_ref(x, weight, label, s=s_cfg, m=m_cfg,
                                     easy_margin=easy_cfg, ls_eps=ls_eps_cfg)

    # Tight check vs a reference using the same bf16-rounded operands.
    assert jnp.allclose(out, ref_bf16, atol=1e-2, rtol=1e-3), (
        f"max abs err vs bf16 ref: {jnp.max(jnp.abs(out - ref_bf16))}")
    assert jnp.allclose(out_small, ref_bf16, atol=1e-2, rtol=1e-3), (
        f"max abs err (small tiles) vs bf16 ref: "
        f"{jnp.max(jnp.abs(out_small - ref_bf16))}")
    # Loose sanity check vs the full-f32 reference (bf16 cosine perturbation
    # is ~4e-3, times s=30).
    assert jnp.allclose(out, ref_f32, atol=0.3, rtol=0.0), (
        f"max abs err vs f32 ref: {jnp.max(jnp.abs(out - ref_f32))}")

    print("KERNEL_OK")
</pallas_src>

<mosaic_0001>
module attributes {stable_mosaic.version = 11 : i64} {
  func.func @_arcmargin_kernel(%arg0: i32, %arg1: i32, %arg2: memref<96x512xbf16, #tpu.memory_space<vmem>>, %arg3: memref<512x512xbf16, #tpu.memory_space<vmem>>, %arg4: memref<96x1xi32, #tpu.memory_space<vmem>>, %arg5: memref<96x512xf32, #tpu.memory_space<vmem>>) attributes {dimension_semantics = [#tpu.dimension_semantics<parallel>, #tpu.dimension_semantics<arbitrary>], iteration_bounds = array<i64: 2, 1>, scalar_prefetch = 0 : i64, scratch_operands = 0 : i64, tpu.core_type = #tpu.core_type<tc>, window_params = [{transform_indices = @transform_0, window_bounds = array<i64: 96, 512>}, {transform_indices = @transform_1, window_bounds = array<i64: 512, 512>}, {transform_indices = @transform_2, window_bounds = array<i64: 96, 1>}, {transform_indices = @transform_3, window_bounds = array<i64: 96, 512>}]} {
    %c0 = arith.constant 0 : index
    %c0_0 = arith.constant 0 : index
    %0 = vector.load %arg2[%c0, %c0_0] : memref<96x512xbf16, #tpu.memory_space<vmem>>, vector<96x512xbf16>
    %c0_1 = arith.constant 0 : index
    %c0_2 = arith.constant 0 : index
    %1 = vector.load %arg3[%c0_1, %c0_2] : memref<512x512xbf16, #tpu.memory_space<vmem>>, vector<512x512xbf16>
    %cst = arith.constant dense<0.000000e+00> : vector<96x512xf32>
    %2 = tpu.matmul %0, %1, %cst {dimension_numbers = #tpu.dot_dimension_numbers<[1], [0], [0], [1], [0, 0, 1, 1], [], []>} : vector<96x512xbf16>, vector<512x512xbf16>, vector<96x512xf32> -> vector<96x512xf32>
    %3 = arith.mulf %2, %2 : vector<96x512xf32>
    %cst_3 = arith.constant 1.000000e+00 : f32
    %4 = vector.broadcast %cst_3 : f32 to vector<96x512xf32>
    %5 = arith.subf %4, %3 : vector<96x512xf32>
    %cst_4 = arith.constant 0.000000e+00 : f32
    %6 = vector.broadcast %cst_4 : f32 to vector<96x512xf32>
    %7 = arith.maximumf %5, %6 : vector<96x512xf32>
    %8 = math.sqrt %7 : vector<96x512xf32>
    %cst_5 = arith.constant 0.87758255 : f32
    %9 = vector.broadcast %cst_5 : f32 to vector<96x512xf32>
    %10 = arith.mulf %2, %9 : vector<96x512xf32>
    %cst_6 = arith.constant 0.47942555 : f32
    %11 = vector.broadcast %cst_6 : f32 to vector<96x512xf32>
    %12 = arith.mulf %8, %11 : vector<96x512xf32>
    %13 = arith.subf %10, %12 : vector<96x512xf32>
    %cst_7 = arith.constant -0.87758255 : f32
    %14 = vector.broadcast %cst_7 : f32 to vector<96x512xf32>
    %15 = arith.cmpf ogt, %2, %14 : vector<96x512xf32>
    %cst_8 = arith.constant 0.239712775 : f32
    %16 = vector.broadcast %cst_8 : f32 to vector<96x512xf32>
    %17 = arith.subf %2, %16 : vector<96x512xf32>
    %18 = arith.select %15, %13, %17 : vector<96x512xi1>, vector<96x512xf32>
    %19 = tpu.iota {dimensions = array<i32: 1>} : vector<96x512xi32>
    %c0_9 = arith.constant 0 : index
    %c0_10 = arith.constant 0 : index
    %20 = vector.load %arg4[%c0_9, %c0_10] : memref<96x1xi32, #tpu.memory_space<vmem>>, vector<96x1xi32>
    %c512_i32 = arith.constant 512 : i32
    %21 = arith.muli %arg0, %c512_i32 : i32
    %22 = vector.broadcast %21 : i32 to vector<96x1xi32>
    %23 = arith.subi %20, %22 : vector<96x1xi32>
    %24 = vector.broadcast %23 : vector<96x1xi32> to vector<96x512xi32>
    %25 = arith.cmpi eq, %19, %24 : vector<96x512xi32>
    %26 = arith.extui %25 : vector<96x512xi1> to vector<96x512xi32>
    %27 = arith.sitofp %26 : vector<96x512xi32> to vector<96x512xf32>
    %28 = arith.subf %18, %2 : vector<96x512xf32>
    %29 = arith.mulf %27, %28 : vector<96x512xf32>
    %30 = arith.addf %2, %29 : vector<96x512xf32>
    %cst_11 = arith.constant 3.000000e+01 : f32
    %31 = vector.broadcast %cst_11 : f32 to vector<96x512xf32>
    %32 = arith.mulf %30, %31 : vector<96x512xf32>
    %c0_12 = arith.constant 0 : index
    %c0_13 = arith.constant 0 : index
    %33 = vector.load %arg5[%c0_12, %c0_13] : memref<96x512xf32, #tpu.memory_space<vmem>>, vector<96x512xf32>
    tpu.vector_store %arg5[%c0_12, %c0_13], %32 {strides = array<i32>} : memref<96x512xf32, #tpu.memory_space<vmem>>, vector<96x512xf32>,
    return
  }
  func.func @transform_0(%arg0: i32, %arg1: i32) -> (i32, i32) {
    %c0_i32 = arith.constant 0 : i32
    %c0_i32_0 = arith.constant 0 : i32
    return %arg1, %c0_i32 : i32, i32
  }
  func.func @transform_1(%arg0: i32, %arg1: i32) -> (i32, i32) {
    %c0_i32 = arith.constant 0 : i32
    %c0_i32_0 = arith.constant 0 : i32
    return %c0_i32, %arg0 : i32, i32
  }
  func.func @transform_2(%arg0: i32, %arg1: i32) -> (i32, i32) {
    %c0_i32 = arith.constant 0 : i32
    %c0_i32_0 = arith.constant 0 : i32
    return %arg1, %c0_i32 : i32, i32
  }
  func.func @transform_3(%arg0: i32, %arg1: i32) -> (i32, i32) {
    %c0_i32 = arith.constant 0 : i32
    return %arg1, %arg0 : i32, i32
  }
}

</mosaic_0001>

<bundles_post_ra>
// kernel: arc_margin_product.1
= control target key start
LH: loop header
LB: loop body
LE: loop exit
PB: predicated region body
PF: predicated region fallthrough
CT: control target
= control target key end

     0   :  { %8 = vsyncpa [#allocation4], 0  ;;  %s6406_s0 = inlined_call_operand.vmem [shape: bf16[96,512], index: 0, kind: input, shape index: {}]   ;;  %s6407_s1 = inlined_call_operand.vmem [shape: bf16[512,1024], index: 1, kind: input, shape index: {}]   ;;  %s6408_s2 = inlined_call_operand.vmem [shape: s32[96,1], index: 2, kind: input, shape index: {}]   ;;  %s6409_s3 = inlined_call_operand.hbm [shape: f32[96,1024], index: 3, kind: output, shape index: {}]  }
   0x1   :  { %10 = vsyncpa [#allocation4 + $0x1], 0  ;;  %s3943_s12 = smov 0   ;;  %s3945_s13 = smov 0  }
   0x2   :  { %s3947_s14 = smov 0   ;;  %s3949_s15 = smov 0  }
   0x3   :  { %s3951_s16 = smov 0   ;;  %s3953_s17 = smov 0  }
   0x4 LB: > { %s3136_s18 = sadd.s32 4294967295, %s3915_s17   ;;  %s3137_s19 = sadd.s32 4294967294, %s3915_s17   ;;  %s3915_s17 = sphi %s3953_s17, %s16_s17   ;;  %s3911_s16 = sphi %s3951_s16, %s6832_s16   ;;  %s3907_s15 = sphi %s3949_s15, %s6831_s15   ;;  %s3903_s14 = sphi %s3947_s14, %s6830_s14   ;;  %s3899_s13 = sphi %s3945_s13, %s6829_s13   ;;  %s3895_s12 = sphi %s3943_s12, %s6828_s12  }
   0x5   : > { %s28_s20 = sadd.s32 1, %s3911_s16  ;;  %s61_s21 = sadd.s32 1, %s3903_s14 }
   0x6   : > { %p30_p0 = scmp.ge.s32.totalorder %s28_s20, 2  ;;  %p68_p1 = scmp.ne.s32.totalorder %s3903_s14, %s3899_s13 }
   0x7   : > { %p69_p2 = scmp.eq.s32.totalorder %s3915_s17, 0  ;;  %p126_p3 = scmp.eq.s32.totalorder %s3136_s18, 1 }
   0x8   : > { %s6834_s20 = smov (%p30_p0, %s28_s20), 0  ;;  %p131_p6 = scmp.ne.s32.totalorder %s3899_s13, %s3895_s12 }
   0x9   : > { %p70_p4 = por %p69_p2, %p68_p1  ;;  %p3982_p5 = por %p126_p3, %p68_p1 }
   0xa   : > { %s58_s23 = ssub.s32 %s3911_s16, %s6834_s20  ;;  %p132_p8 = scmp.eq.s32.totalorder %s3137_s19, 1 }
   0xb   : > { %p59_p7 = scmp.eq.s32.totalorder %s58_s23, 0  ;;  %p3141_p10 = scmp.ge.s32.totalorder %s3915_s17, 2 }
   0xc   : > { %p3993_p9 = por %p132_p8, %p131_p6 }
   0xd   : > { %s3991_s24 = scalar_select %p59_p7, %s3903_s14, %s61_s21  }
   0xe   : > { %167 = sbr.rel (%p3141_p10) target bundleno = 89 (0x59), region = 24 }
  0x15   : > { %170 = sbr.rel (!%p70_p4) target bundleno = 89 (0x59), region = 28  ;;  %s172_s26 = sand.u32 (%p70_p4), 1, %s3903_s14  }
  0x16   : > { %s3400_s27 = sshll.u32 (%p70_p4), %s3911_s16, 4  ;;  %s3142_s28 = sshll.u32 (%p70_p4), %s172_s26, 10 }
  0x17   : > { %s4005_s4 = scalar_lea.vmem (%p70_p4), %s6407_s1, %s3400_s27  ;;  %s4010_s5 = scalar_lea.vmem (%p70_p4), [#allocation2], %s3142_s28 }
  0x18   : > { %v190_v0 = vld [vmem:[%s4005_s4] sm:$0xff] (%p70_p4)  ;;  %v192_v1 = vld [vmem:[%s4005_s4 + $0x8] sm:$0xff] (%p70_p4) }
  0x19   : > { %v194_v2 = vld [vmem:[%s4005_s4 + $0x20] sm:$0xff] (%p70_p4)  ;;  %191 = vst [vmem:[%s4010_s5] sm:$0xff] (%p70_p4), %v190_v0  ;;  %193 = vst [vmem:[%s4010_s5 + $0x8] sm:$0xff] (%p70_p4), %v192_v1  ;;  %v196_v3 = vld [vmem:[%s4005_s4 + $0x28] sm:$0xff] (%p70_p4) }
  0x1a   : > { %195 = vst [vmem:[%s4010_s5 + $0x10] sm:$0xff] (%p70_p4), %v194_v2  ;;  %v198_v4 = vld [vmem:[%s4005_s4 + $0x40] sm:$0xff] (%p70_p4)  ;;  %v200_v5 = vld [vmem:[%s4005_s4 + $0x48] sm:$0xff] (%p70_p4)  ;;  %197 = vst [vmem:[%s4010_s5 + $0x18] sm:$0xff] (%p70_p4), %v196_v3 }
  0x1b   : > { %199 = vst [vmem:[%s4010_s5 + $0x20] sm:$0xff] (%p70_p4), %v198_v4  ;;  %201 = vst [vmem:[%s4010_s5 + $0x28] sm:$0xff] (%p70_p4), %v200_v5  ;;  %v202_v6 = vld [vmem:[%s4005_s4 + $0x60] sm:$0xff] (%p70_p4)  ;;  %v204_v7 = vld [vmem:[%s4005_s4 + $0x68] sm:$0xff] (%p70_p4) }
  0x1c   : > { %v206_v8 = vld [vmem:[%s4005_s4 + $0x80] sm:$0xff]  ;;  %203 = vst [vmem:[%s4010_s5 + $0x30] sm:$0xff] %v202_v6  ;;  %205 = vst [vmem:[%s4010_s5 + $0x38] sm:$0xff] %v204_v7  ;;  %v208_v9 = vld [vmem:[%s4005_s4 + $0x88] sm:$0xff] }
  0x1d   : > { %207 = vst [vmem:[%s4010_s5 + $0x40] sm:$0xff] %v206_v8  ;;  %v210_v10 = vld [vmem:[%s4005_s4 + $0xa0] sm:$0xff]  ;;  %v212_v11 = vld [vmem:[%s4005_s4 + $0xa8] sm:$0xff]  ;;  %209 = vst [vmem:[%s4010_s5 + $0x48] sm:$0xff] %v208_v9 }
  0x1e   : > { %211 = vst [vmem:[%s4010_s5 + $0x50] sm:$0xff] %v210_v10  ;;  %213 = vst [vmem:[%s4010_s5 + $0x58] sm:$0xff] %v212_v11  ;;  %v214_v12 = vld [vmem:[%s4005_s4 + $0xc0] sm:$0xff]  ;;  %v216_v13 = vld [vmem:[%s4005_s4 + $0xc8] sm:$0xff] }
  0x1f   : > { %v218_v14 = vld [vmem:[%s4005_s4 + $0xe0] sm:$0xff]  ;;  %215 = vst [vmem:[%s4010_s5 + $0x60] sm:$0xff] %v214_v12  ;;  %217 = vst [vmem:[%s4010_s5 + $0x68] sm:$0xff] %v216_v13  ;;  %v220_v15 = vld [vmem:[%s4005_s4 + $0xe8] sm:$0xff] }
  0x20   : > { %219 = vst [vmem:[%s4010_s5 + $0x70] sm:$0xff] %v218_v14  ;;  %v222_v16 = vld [vmem:[%s4005_s4 + $0x100] sm:$0xff]  ;;  %v224_v17 = vld [vmem:[%s4005_s4 + $0x108] sm:$0xff]  ;;  %221 = vst [vmem:[%s4010_s5 + $0x78] sm:$0xff] %v220_v15 }
  0x21   : > { %223 = vst [vmem:[%s4010_s5 + $0x80] sm:$0xff] %v222_v16  ;;  %225 = vst [vmem:[%s4010_s5 + $0x88] sm:$0xff] %v224_v17  ;;  %v226_v18 = vld [vmem:[%s4005_s4 + $0x120] sm:$0xff]  ;;  %v228_v19 = vld [vmem:[%s4005_s4 + $0x128] sm:$0xff] }
  0x22   : > { %v230_v20 = vld [vmem:[%s4005_s4 + $0x140] sm:$0xff]  ;;  %227 = vst [vmem:[%s4010_s5 + $0x90] sm:$0xff] %v226_v18  ;;  %229 = vst [vmem:[%s4010_s5 + $0x98] sm:$0xff] %v228_v19  ;;  %v232_v21 = vld [vmem:[%s4005_s4 + $0x148] sm:$0xff] }
  0x23   : > { %231 = vst [vmem:[%s4010_s5 + $0xa0] sm:$0xff] %v230_v20  ;;  %v234_v22 = vld [vmem:[%s4005_s4 + $0x160] sm:$0xff]  ;;  %v236_v23 = vld [vmem:[%s4005_s4 + $0x168] sm:$0xff]  ;;  %233 = vst [vmem:[%s4010_s5 + $0xa8] sm:$0xff] %v232_v21 }
  0x24   : > { %235 = vst [vmem:[%s4010_s5 + $0xb0] sm:$0xff] %v234_v22  ;;  %237 = vst [vmem:[%s4010_s5 + $0xb8] sm:$0xff] %v236_v23  ;;  %v238_v24 = vld [vmem:[%s4005_s4 + $0x180] sm:$0xff]  ;;  %v240_v25 = vld [vmem:[%s4005_s4 + $0x188] sm:$0xff] }
  0x25   : > { %v242_v26 = vld [vmem:[%s4005_s4 + $0x1a0] sm:$0xff]  ;;  %239 = vst [vmem:[%s4010_s5 + $0xc0] sm:$0xff] %v238_v24  ;;  %241 = vst [vmem:[%s4010_s5 + $0xc8] sm:$0xff] %v240_v25  ;;  %v244_v27 = vld [vmem:[%s4005_s4 + $0x1a8] sm:$0xff] }
  0x26   : > { %243 = vst [vmem:[%s4010_s5 + $0xd0] sm:$0xff] %v242_v26  ;;  %v246_v28 = vld [vmem:[%s4005_s4 + $0x1c0] sm:$0xff]  ;;  %v248_v29 = vld [vmem:[%s4005_s4 + $0x1c8] sm:$0xff]  ;;  %245 = vst [vmem:[%s4010_s5 + $0xd8] sm:$0xff] %v244_v27 }
  0x27   : > { %247 = vst [vmem:[%s4010_s5 + $0xe0] sm:$0xff] %v246_v28  ;;  %249 = vst [vmem:[%s4010_s5 + $0xe8] sm:$0xff] %v248_v29  ;;  %v250_v30 = vld [vmem:[%s4005_s4 + $0x1e0] sm:$0xff]  ;;  %v252_v31 = vld [vmem:[%s4005_s4 + $0x1e8] sm:$0xff] }
  0x28   : > { %v254_v32 = vld [vmem:[%s4005_s4 + $0x200] sm:$0xff]  ;;  %251 = vst [vmem:[%s4010_s5 + $0xf0] sm:$0xff] %v250_v30  ;;  %253 = vst [vmem:[%s4010_s5 + $0xf8] sm:$0xff] %v252_v31  ;;  %v256_v33 = vld [vmem:[%s4005_s4 + $0x208] sm:$0xff] }
  0x29   : > { %255 = vst [vmem:[%s4010_s5 + $0x100] sm:$0xff] %v254_v32  ;;  %v258_v34 = vld [vmem:[%s4005_s4 + $0x220] sm:$0xff]  ;;  %v260_v35 = vld [vmem:[%s4005_s4 + $0x228] sm:$0xff]  ;;  %257 = vst [vmem:[%s4010_s5 + $0x108] sm:$0xff] %v256_v33 }
  0x2a   : > { %259 = vst [vmem:[%s4010_s5 + $0x110] sm:$0xff] %v258_v34  ;;  %261 = vst [vmem:[%s4010_s5 + $0x118] sm:$0xff] %v260_v35  ;;  %v262_v36 = vld [vmem:[%s4005_s4 + $0x240] sm:$0xff]  ;;  %v264_v37 = vld [vmem:[%s4005_s4 + $0x248] sm:$0xff] }
  0x2b   : > { %v266_v38 = vld [vmem:[%s4005_s4 + $0x260] sm:$0xff]  ;;  %263 = vst [vmem:[%s4010_s5 + $0x120] sm:$0xff] %v262_v36  ;;  %265 = vst [vmem:[%s4010_s5 + $0x128] sm:$0xff] %v264_v37  ;;  %v268_v39 = vld [vmem:[%s4005_s4 + $0x268] sm:$0xff] }
  0x2c   : > { %267 = vst [vmem:[%s4010_s5 + $0x130] sm:$0xff] %v266_v38  ;;  %v270_v40 = vld [vmem:[%s4005_s4 + $0x280] sm:$0xff]  ;;  %v272_v41 = vld [vmem:[%s4005_s4 + $0x288] sm:$0xff]  ;;  %269 = vst [vmem:[%s4010_s5 + $0x138] sm:$0xff] %v268_v39 }
  0x2d   : > { %271 = vst [vmem:[%s4010_s5 + $0x140] sm:$0xff] %v270_v40  ;;  %273 = vst [vmem:[%s4010_s5 + $0x148] sm:$0xff] %v272_v41  ;;  %v274_v42 = vld [vmem:[%s4005_s4 + $0x2a0] sm:$0xff]  ;;  %v276_v43 = vld [vmem:[%s4005_s4 + $0x2a8] sm:$0xff] }
  0x2e   : > { %v278_v44 = vld [vmem:[%s4005_s4 + $0x2c0] sm:$0xff]  ;;  %275 = vst [vmem:[%s4010_s5 + $0x150] sm:$0xff] %v274_v42  ;;  %277 = vst [vmem:[%s4010_s5 + $0x158] sm:$0xff] %v276_v43  ;;  %v280_v45 = vld [vmem:[%s4005_s4 + $0x2c8] sm:$0xff] }
  0x2f   : > { %279 = vst [vmem:[%s4010_s5 + $0x160] sm:$0xff] %v278_v44  ;;  %v282_v46 = vld [vmem:[%s4005_s4 + $0x2e0] sm:$0xff]  ;;  %v284_v47 = vld [vmem:[%s4005_s4 + $0x2e8] sm:$0xff]  ;;  %281 = vst [vmem:[%s4010_s5 + $0x168] sm:$0xff] %v280_v45 }
  0x30   : > { %283 = vst [vmem:[%s4010_s5 + $0x170] sm:$0xff] %v282_v46  ;;  %285 = vst [vmem:[%s4010_s5 + $0x178] sm:$0xff] %v284_v47  ;;  %v286_v48 = vld [vmem:[%s4005_s4 + $0x300] sm:$0xff]  ;;  %v288_v49 = vld [vmem:[%s4005_s4 + $0x308] sm:$0xff] }
  0x31   : > { %v290_v50 = vld [vmem:[%s4005_s4 + $0x320] sm:$0xff]  ;;  %287 = vst [vmem:[%s4010_s5 + $0x180] sm:$0xff] %v286_v48  ;;  %289 = vst [vmem:[%s4010_s5 + $0x188] sm:$0xff] %v288_v49  ;;  %v292_v51 = vld [vmem:[%s4005_s4 + $0x328] sm:$0xff] }
  0x32   : > { %291 = vst [vmem:[%s4010_s5 + $0x190] sm:$0xff] %v290_v50  ;;  %v294_v52 = vld [vmem:[%s4005_s4 + $0x340] sm:$0xff]  ;;  %v296_v53 = vld [vmem:[%s4005_s4 + $0x348] sm:$0xff]  ;;  %293 = vst [vmem:[%s4010_s5 + $0x198] sm:$0xff] %v292_v51 }
  0x33   : > { %295 = vst [vmem:[%s4010_s5 + $0x1a0] sm:$0xff] %v294_v52  ;;  %297 = vst [vmem:[%s4010_s5 + $0x1a8] sm:$0xff] %v296_v53  ;;  %v298_v54 = vld [vmem:[%s4005_s4 + $0x360] sm:$0xff]  ;;  %v300_v55 = vld [vmem:[%s4005_s4 + $0x368] sm:$0xff] }
  0x34   : > { %v302_v56 = vld [vmem:[%s4005_s4 + $0x380] sm:$0xff]  ;;  %299 = vst [vmem:[%s4010_s5 + $0x1b0] sm:$0xff] %v298_v54  ;;  %301 = vst [vmem:[%s4010_s5 + $0x1b8] sm:$0xff] %v300_v55  ;;  %v304_v57 = vld [vmem:[%s4005_s4 + $0x388] sm:$0xff] }
  0x35   : > { %303 = vst [vmem:[%s4010_s5 + $0x1c0] sm:$0xff] %v302_v56  ;;  %v306_v58 = vld [vmem:[%s4005_s4 + $0x3a0] sm:$0xff]  ;;  %v308_v59 = vld [vmem:[%s4005_s4 + $0x3a8] sm:$0xff]  ;;  %305 = vst [vmem:[%s4010_s5 + $0x1c8] sm:$0xff] %v304_v57 }
  0x36   : > { %307 = vst [vmem:[%s4010_s5 + $0x1d0] sm:$0xff] %v306_v58  ;;  %309 = vst [vmem:[%s4010_s5 + $0x1d8] sm:$0xff] %v308_v59  ;;  %v310_v60 = vld [vmem:[%s4005_s4 + $0x3c0] sm:$0xff]  ;;  %v312_v61 = vld [vmem:[%s4005_s4 + $0x3c8] sm:$0xff] }
  0x37   : > { %v314_v62 = vld [vmem:[%s4005_s4 + $0x3e0] sm:$0xff]  ;;  %311 = vst [vmem:[%s4010_s5 + $0x1e0] sm:$0xff] %v310_v60  ;;  %313 = vst [vmem:[%s4010_s5 + $0x1e8] sm:$0xff] %v312_v61  ;;  %v316_v63 = vld [vmem:[%s4005_s4 + $0x3e8] sm:$0xff] }
  0x38   : > { %315 = vst [vmem:[%s4010_s5 + $0x1f0] sm:$0xff] %v314_v62  ;;  %v318_v0 = vld [vmem:[%s4005_s4 + $0x400] sm:$0xff]  ;;  %v320_v1 = vld [vmem:[%s4005_s4 + $0x408] sm:$0xff]  ;;  %317 = vst [vmem:[%s4010_s5 + $0x1f8] sm:$0xff] %v316_v63 }
  0x39   : > { %319 = vst [vmem:[%s4010_s5 + $0x200] sm:$0xff] %v318_v0  ;;  %321 = vst [vmem:[%s4010_s5 + $0x208] sm:$0xff] %v320_v1  ;;  %v322_v2 = vld [vmem:[%s4005_s4 + $0x420] sm:$0xff]  ;;  %v324_v3 = vld [vmem:[%s4005_s4 + $0x428] sm:$0xff] }
  0x3a   : > { %v326_v4 = vld [vmem:[%s4005_s4 + $0x440] sm:$0xff]  ;;  %323 = vst [vmem:[%s4010_s5 + $0x210] sm:$0xff] %v322_v2  ;;  %325 = vst [vmem:[%s4010_s5 + $0x218] sm:$0xff] %v324_v3  ;;  %v328_v5 = vld [vmem:[%s4005_s4 + $0x448] sm:$0xff] }
  0x3b   : > { %327 = vst [vmem:[%s4010_s5 + $0x220] sm:$0xff] %v326_v4  ;;  %v330_v6 = vld [vmem:[%s4005_s4 + $0x460] sm:$0xff]  ;;  %v332_v7 = vld [vmem:[%s4005_s4 + $0x468] sm:$0xff]  ;;  %329 = vst [vmem:[%s4010_s5 + $0x228] sm:$0xff] %v328_v5 }
  0x3c   : > { %331 = vst [vmem:[%s4010_s5 + $0x230] sm:$0xff] %v330_v6  ;;  %333 = vst [vmem:[%s4010_s5 + $0x238] sm:$0xff] %v332_v7  ;;  %v334_v8 = vld [vmem:[%s4005_s4 + $0x480] sm:$0xff]  ;;  %v336_v9 = vld [vmem:[%s4005_s4 + $0x488] sm:$0xff] }
  0x3d   : > { %v338_v10 = vld [vmem:[%s4005_s4 + $0x4a0] sm:$0xff]  ;;  %335 = vst [vmem:[%s4010_s5 + $0x240] sm:$0xff] %v334_v8  ;;  %337 = vst [vmem:[%s4010_s5 + $0x248] sm:$0xff] %v336_v9  ;;  %v340_v11 = vld [vmem:[%s4005_s4 + $0x4a8] sm:$0xff] }
  0x3e   : > { %339 = vst [vmem:[%s4010_s5 + $0x250] sm:$0xff] %v338_v10  ;;  %v342_v12 = vld [vmem:[%s4005_s4 + $0x4c0] sm:$0xff]  ;;  %v344_v13 = vld [vmem:[%s4005_s4 + $0x4c8] sm:$0xff]  ;;  %341 = vst [vmem:[%s4010_s5 + $0x258] sm:$0xff] %v340_v11 }
  0x3f   : > { %343 = vst [vmem:[%s4010_s5 + $0x260] sm:$0xff] %v342_v12  ;;  %345 = vst [vmem:[%s4010_s5 + $0x268] sm:$0xff] %v344_v13  ;;  %v346_v14 = vld [vmem:[%s4005_s4 + $0x4e0] sm:$0xff]  ;;  %v348_v15 = vld [vmem:[%s4005_s4 + $0x4e8] sm:$0xff] }
  0x40   : > { %v350_v16 = vld [vmem:[%s4005_s4 + $0x500] sm:$0xff]  ;;  %347 = vst [vmem:[%s4010_s5 + $0x270] sm:$0xff] %v346_v14  ;;  %349 = vst [vmem:[%s4010_s5 + $0x278] sm:$0xff] %v348_v15  ;;  %v352_v17 = vld [vmem:[%s4005_s4 + $0x508] sm:$0xff] }
  0x41   : > { %351 = vst [vmem:[%s4010_s5 + $0x280] sm:$0xff] %v350_v16  ;;  %v354_v18 = vld [vmem:[%s4005_s4 + $0x520] sm:$0xff]  ;;  %v356_v19 = vld [vmem:[%s4005_s4 + $0x528] sm:$0xff]  ;;  %353 = vst [vmem:[%s4010_s5 + $0x288] sm:$0xff] %v352_v17 }
  0x42   : > { %355 = vst [vmem:[%s4010_s5 + $0x290] sm:$0xff] %v354_v18  ;;  %357 = vst [vmem:[%s4010_s5 + $0x298] sm:$0xff] %v356_v19  ;;  %v358_v20 = vld [vmem:[%s4005_s4 + $0x540] sm:$0xff]  ;;  %v360_v21 = vld [vmem:[%s4005_s4 + $0x548] sm:$0xff] }
  0x43   : > { %v362_v22 = vld [vmem:[%s4005_s4 + $0x560] sm:$0xff]  ;;  %359 = vst [vmem:[%s4010_s5 + $0x2a0] sm:$0xff] %v358_v20  ;;  %361 = vst [vmem:[%s4010_s5 + $0x2a8] sm:$0xff] %v360_v21  ;;  %v364_v23 = vld [vmem:[%s4005_s4 + $0x568] sm:$0xff] }
  0x44   : > { %363 = vst [vmem:[%s4010_s5 + $0x2b0] sm:$0xff] %v362_v22  ;;  %v366_v24 = vld [vmem:[%s4005_s4 + $0x580] sm:$0xff]  ;;  %v368_v25 = vld [vmem:[%s4005_s4 + $0x588] sm:$0xff]  ;;  %365 = vst [vmem:[%s4010_s5 + $0x2b8] sm:$0xff] %v364_v23 }
  0x45   : > { %367 = vst [vmem:[%s4010_s5 + $0x2c0] sm:$0xff] %v366_v24  ;;  %369 = vst [vmem:[%s4010_s5 + $0x2c8] sm:$0xff] %v368_v25  ;;  %v370_v26 = vld [vmem:[%s4005_s4 + $0x5a0] sm:$0xff]  ;;  %v372_v27 = vld [vmem:[%s4005_s4 + $0x5a8] sm:$0xff] }
  0x46   : > { %v374_v28 = vld [vmem:[%s4005_s4 + $0x5c0] sm:$0xff]  ;;  %371 = vst [vmem:[%s4010_s5 + $0x2d0] sm:$0xff] %v370_v26  ;;  %373 = vst [vmem:[%s4010_s5 + $0x2d8] sm:$0xff] %v372_v27  ;;  %v376_v29 = vld [vmem:[%s4005_s4 + $0x5c8] sm:$0xff] }
  0x47   : > { %375 = vst [vmem:[%s4010_s5 + $0x2e0] sm:$0xff] %v374_v28  ;;  %v378_v30 = vld [vmem:[%s4005_s4 + $0x5e0] sm:$0xff]  ;;  %v380_v31 = vld [vmem:[%s4005_s4 + $0x5e8] sm:$0xff]  ;;  %377 = vst [vmem:[%s4010_s5 + $0x2e8] sm:$0xff] %v376_v29 }
  0x48   : > { %379 = vst [vmem:[%s4010_s5 + $0x2f0] sm:$0xff] %v378_v30  ;;  %381 = vst [vmem:[%s4010_s5 + $0x2f8] sm:$0xff] %v380_v31  ;;  %v382_v32 = vld [vmem:[%s4005_s4 + $0x600] sm:$0xff]  ;;  %v384_v33 = vld [vmem:[%s4005_s4 + $0x608] sm:$0xff] }
  0x49   : > { %v386_v34 = vld [vmem:[%s4005_s4 + $0x620] sm:$0xff]  ;;  %383 = vst [vmem:[%s4010_s5 + $0x300] sm:$0xff] %v382_v32  ;;  %385 = vst [vmem:[%s4010_s5 + $0x308] sm:$0xff] %v384_v33  ;;  %v388_v35 = vld [vmem:[%s4005_s4 + $0x628] sm:$0xff] }
  0x4a   : > { %387 = vst [vmem:[%s4010_s5 + $0x310] sm:$0xff] %v386_v34  ;;  %v390_v36 = vld [vmem:[%s4005_s4 + $0x640] sm:$0xff]  ;;  %v392_v37 = vld [vmem:[%s4005_s4 + $0x648] sm:$0xff]  ;;  %389 = vst [vmem:[%s4010_s5 + $0x318] sm:$0xff] %v388_v35 }
  0x4b   : > { %391 = vst [vmem:[%s4010_s5 + $0x320] sm:$0xff] %v390_v36  ;;  %393 = vst [vmem:[%s4010_s5 + $0x328] sm:$0xff] %v392_v37  ;;  %v394_v38 = vld [vmem:[%s4005_s4 + $0x660] sm:$0xff]  ;;  %v396_v39 = vld [vmem:[%s4005_s4 + $0x668] sm:$0xff] }
  0x4c   : > { %v398_v40 = vld [vmem:[%s4005_s4 + $0x680] sm:$0xff]  ;;  %395 = vst [vmem:[%s4010_s5 + $0x330] sm:$0xff] %v394_v38  ;;  %397 = vst [vmem:[%s4010_s5 + $0x338] sm:$0xff] %v396_v39  ;;  %v400_v41 = vld [vmem:[%s4005_s4 + $0x688] sm:$0xff] }
  0x4d   : > { %399 = vst [vmem:[%s4010_s5 + $0x340] sm:$0xff] %v398_v40  ;;  %v402_v42 = vld [vmem:[%s4005_s4 + $0x6a0] sm:$0xff]  ;;  %v404_v43 = vld [vmem:[%s4005_s4 + $0x6a8] sm:$0xff]  ;;  %401 = vst [vmem:[%s4010_s5 + $0x348] sm:$0xff] %v400_v41 }
  0x4e   : > { %403 = vst [vmem:[%s4010_s5 + $0x350] sm:$0xff] %v402_v42  ;;  %405 = vst [vmem:[%s4010_s5 + $0x358] sm:$0xff] %v404_v43  ;;  %v406_v44 = vld [vmem:[%s4005_s4 + $0x6c0] sm:$0xff]  ;;  %v408_v45 = vld [vmem:[%s4005_s4 + $0x6c8] sm:$0xff] }
  0x4f   : > { %v410_v46 = vld [vmem:[%s4005_s4 + $0x6e0] sm:$0xff]  ;;  %407 = vst [vmem:[%s4010_s5 + $0x360] sm:$0xff] %v406_v44  ;;  %409 = vst [vmem:[%s4010_s5 + $0x368] sm:$0xff] %v408_v45  ;;  %v412_v47 = vld [vmem:[%s4005_s4 + $0x6e8] sm:$0xff] }
  0x50   : > { %411 = vst [vmem:[%s4010_s5 + $0x370] sm:$0xff] %v410_v46  ;;  %v414_v48 = vld [vmem:[%s4005_s4 + $0x700] sm:$0xff]  ;;  %v416_v49 = vld [vmem:[%s4005_s4 + $0x708] sm:$0xff]  ;;  %413 = vst [vmem:[%s4010_s5 + $0x378] sm:$0xff] %v412_v47 }
  0x51   : > { %415 = vst [vmem:[%s4010_s5 + $0x380] sm:$0xff] %v414_v48  ;;  %417 = vst [vmem:[%s4010_s5 + $0x388] sm:$0xff] %v416_v49  ;;  %v418_v50 = vld [vmem:[%s4005_s4 + $0x720] sm:$0xff]  ;;  %v420_v51 = vld [vmem:[%s4005_s4 + $0x728] sm:$0xff] }
  0x52   : > { %v422_v52 = vld [vmem:[%s4005_s4 + $0x740] sm:$0xff]  ;;  %419 = vst [vmem:[%s4010_s5 + $0x390] sm:$0xff] %v418_v50  ;;  %421 = vst [vmem:[%s4010_s5 + $0x398] sm:$0xff] %v420_v51  ;;  %v424_v53 = vld [vmem:[%s4005_s4 + $0x748] sm:$0xff] }
  0x53   : > { %423 = vst [vmem:[%s4010_s5 + $0x3a0] sm:$0xff] %v422_v52  ;;  %v426_v54 = vld [vmem:[%s4005_s4 + $0x760] sm:$0xff]  ;;  %v428_v55 = vld [vmem:[%s4005_s4 + $0x768] sm:$0xff]  ;;  %425 = vst [vmem:[%s4010_s5 + $0x3a8] sm:$0xff] %v424_v53 }
  0x54   : > { %427 = vst [vmem:[%s4010_s5 + $0x3b0] sm:$0xff] %v426_v54  ;;  %429 = vst [vmem:[%s4010_s5 + $0x3b8] sm:$0xff] %v428_v55  ;;  %v430_v56 = vld [vmem:[%s4005_s4 + $0x780] sm:$0xff]  ;;  %v432_v57 = vld [vmem:[%s4005_s4 + $0x788] sm:$0xff] }
  0x55   : > { %v434_v58 = vld [vmem:[%s4005_s4 + $0x7a0] sm:$0xff]  ;;  %431 = vst [vmem:[%s4010_s5 + $0x3c0] sm:$0xff] %v430_v56  ;;  %433 = vst [vmem:[%s4010_s5 + $0x3c8] sm:$0xff] %v432_v57  ;;  %v436_v59 = vld [vmem:[%s4005_s4 + $0x7a8] sm:$0xff] }
  0x56   : > { %435 = vst [vmem:[%s4010_s5 + $0x3d0] sm:$0xff] %v434_v58  ;;  %v438_v60 = vld [vmem:[%s4005_s4 + $0x7c0] sm:$0xff]  ;;  %v440_v61 = vld [vmem:[%s4005_s4 + $0x7c8] sm:$0xff]  ;;  %437 = vst [vmem:[%s4010_s5 + $0x3d8] sm:$0xff] %v436_v59 }
  0x57   : > { %439 = vst [vmem:[%s4010_s5 + $0x3e0] sm:$0xff] %v438_v60  ;;  %441 = vst [vmem:[%s4010_s5 + $0x3e8] sm:$0xff] %v440_v61  ;;  %v442_v62 = vld [vmem:[%s4005_s4 + $0x7e0] sm:$0xff]  ;;  %v444_v63 = vld [vmem:[%s4005_s4 + $0x7e8] sm:$0xff] }
  0x58   : > { %443 = vst [vmem:[%s4010_s5 + $0x3f0] sm:$0xff] %v442_v62  ;;  %445 = vst [vmem:[%s4010_s5 + $0x3f8] sm:$0xff] %v444_v63 }
  0x59 PF: > { %p3145_p11 = scmp.ge.s32.totalorder %s3915_s17, 1  ;;  %p450_p12 = scmp.lt.s32.totalorder %s3915_s17, 3 }
  0x5b   : > { %p451_p13 = pnand %p3145_p11, %p450_p12 }
  0x5d   : > { %454 = sbr.rel (%p451_p13) target bundleno = 739 (0x2e3), region = 51 }
  0x64   : > { %s4268_s6 = sand.u32 1, %s3899_s13   ;;  %v3611_v0 = vld [vmem:[%s6406_s0 + $0x4] ss:$16 sps:$4 sm:$0xff]   ;;  %v3917_v51 = vmov 0   ;;  %s3347_s18 = sshll.u32 %s3907_s15, 9 }
  0x65   : > { %s3146_s7 = sshll.u32 %s4268_s6, 10  ;;  %1451 = vmatprep.mubr.bf16.mxu0 %v3611_v0  ;;  %1637 = vmatprep.mubr.bf16.mxu1 %v3611_v0  ;;  %s6350_s21 = scalar_lea.hbm %s6409_s3, %s3347_s18 }
  0x66   : > { %s4274_s10 = scalar_lea.vmem [#allocation2], %s3146_s7  ;;  %3511 = vset.pattern.permute.xlu0 %v3917_v51  ;;  %3512 = vset.pattern.permute.xlu1 %v3917_v51  ;;  %v2564_v51 = vld [vmem:[%s6408_s2] sm:$0xff]  ;;  %s3450_s7 = smul.u32 384, %s4268_s6 }
  0x67   : > { %v3513_v1 = vld [vmem:[%s4274_s10 + $0x4] ss:$16 sps:$4 sm:$0xff]   ;;  %v3515_v2 = vld [vmem:[%s4274_s10 + $0xc] ss:$16 sps:$4 sm:$0xff]   ;;  %v3517_v3 = vld [vmem:[%s4274_s10] ss:$16 sps:$4 sm:$0xff]  }
  0x68   : > { %1419 = vmatprep.subr.bf16.mxu0 %v3513_v1  ;;  %v3518_v4 = vld [vmem:[%s4274_s10 + $0x8] ss:$16 sps:$4 sm:$0xff]   ;;  %1605 = vmatprep.subr.bf16.mxu1 %v3515_v2  ;;  %v3519_v5 = vld [vmem:[%s4274_s10 + $0x24] ss:$16 sps:$4 sm:$0xff]   ;;  %v3521_v6 = vld [vmem:[%s4274_s10 + $0x2c] ss:$16 sps:$4 sm:$0xff]  }
  0x69   : > { %1420 = vmatpush1.bf16.msra.mxu0 %v3517_v3  ;;  %1606 = vmatpush1.bf16.msra.mxu1 %v3518_v4  ;;  %v3523_v7 = vld [vmem:[%s4274_s10 + $0x20] ss:$16 sps:$4 sm:$0xff]   ;;  %v3524_v8 = vld [vmem:[%s4274_s10 + $0x28] ss:$16 sps:$4 sm:$0xff]   ;;  %v3525_v9 = vld [vmem:[%s4274_s10 + $0x44] ss:$16 sps:$4 sm:$0xff]  }
  0x6a   : > { %1421 = vmatprep.subr.bf16.mxu0 %v3519_v5  ;;  %1607 = vmatprep.subr.bf16.mxu1 %v3521_v6  ;;  %v3527_v10 = vld [vmem:[%s4274_s10 + $0x4c] ss:$16 sps:$4 sm:$0xff]   ;;  %v3529_v11 = vld [vmem:[%s4274_s10 + $0x40] ss:$16 sps:$4 sm:$0xff]   ;;  %v3530_v12 = vld [vmem:[%s4274_s10 + $0x48] ss:$16 sps:$4 sm:$0xff]  }
  0x6b   : > { %v3531_v13 = vld [vmem:[%s4274_s10 + $0x64] ss:$16 sps:$4 sm:$0xff]   ;;  %v3533_v14 = vld [vmem:[%s4274_s10 + $0x6c] ss:$16 sps:$4 sm:$0xff]   ;;  %v3535_v15 = vld [vmem:[%s4274_s10 + $0x60] ss:$16 sps:$4 sm:$0xff]  }
  0x6c   : > { %v3536_v16 = vld [vmem:[%s4274_s10 + $0x68] ss:$16 sps:$4 sm:$0xff]   ;;  %v3537_v17 = vld [vmem:[%s4274_s10 + $0x84] ss:$16 sps:$4 sm:$0xff]   ;;  %v3539_v18 = vld [vmem:[%s4274_s10 + $0x8c] ss:$16 sps:$4 sm:$0xff]  }
  0x6d   : > { %1422 = vmatpush1.bf16.msra.mxu0 %v3523_v7  ;;  %1608 = vmatpush1.bf16.msra.mxu1 %v3524_v8  ;;  %v3541_v19 = vld [vmem:[%s4274_s10 + $0x80] ss:$16 sps:$4 sm:$0xff]   ;;  %v3542_v20 = vld [vmem:[%s4274_s10 + $0x88] ss:$16 sps:$4 sm:$0xff]   ;;  %v3543_v21 = vld [vmem:[%s4274_s10 + $0xa4] ss:$16 sps:$4 sm:$0xff]  }
  0x6e   : > { %1423 = vmatprep.subr.bf16.mxu0 %v3525_v9  ;;  %1609 = vmatprep.subr.bf16.mxu1 %v3527_v10  ;;  %v3545_v22 = vld [vmem:[%s4274_s10 + $0xac] ss:$16 sps:$4 sm:$0xff]   ;;  %v3547_v23 = vld [vmem:[%s4274_s10 + $0xa0] ss:$16 sps:$4 sm:$0xff]   ;;  %v3548_v24 = vld [vmem:[%s4274_s10 + $0xa8] ss:$16 sps:$4 sm:$0xff]  }
  0x6f   : > { %v3549_v25 = vld [vmem:[%s4274_s10 + $0xc4] ss:$16 sps:$4 sm:$0xff]   ;;  %v3551_v26 = vld [vmem:[%s4274_s10 + $0xcc] ss:$16 sps:$4 sm:$0xff]   ;;  %v3553_v27 = vld [vmem:[%s4274_s10 + $0xc0] ss:$16 sps:$4 sm:$0xff]  }
  0x70   : > { %v3554_v28 = vld [vmem:[%s4274_s10 + $0xc8] ss:$16 sps:$4 sm:$0xff]   ;;  %v3555_v29 = vld [vmem:[%s4274_s10 + $0xe4] ss:$16 sps:$4 sm:$0xff]   ;;  %v3557_v30 = vld [vmem:[%s4274_s10 + $0xec] ss:$16 sps:$4 sm:$0xff]  }
  0x71   : > { %1424 = vmatpush1.bf16.msra.mxu0 %v3529_v11  ;;  %1610 = vmatpush1.bf16.msra.mxu1 %v3530_v12  ;;  %v3559_v31 = vld [vmem:[%s4274_s10 + $0xe0] ss:$16 sps:$4 sm:$0xff]   ;;  %v3560_v32 = vld [vmem:[%s4274_s10 + $0xe8] ss:$16 sps:$4 sm:$0xff]   ;;  %v3561_v33 = vld [vmem:[%s4274_s10 + $0x104] ss:$16 sps:$4 sm:$0xff]  }
  0x72   : > { %1425 = vmatprep.subr.bf16.mxu0 %v3531_v13  ;;  %1611 = vmatprep.subr.bf16.mxu1 %v3533_v14  ;;  %v3563_v34 = vld [vmem:[%s4274_s10 + $0x10c] ss:$16 sps:$4 sm:$0xff]   ;;  %v3565_v35 = vld [vmem:[%s4274_s10 + $0x100] ss:$16 sps:$4 sm:$0xff]   ;;  %v3566_v36 = vld [vmem:[%s4274_s10 + $0x108] ss:$16 sps:$4 sm:$0xff]  }
  0x73   : > { %v3567_v37 = vld [vmem:[%s4274_s10 + $0x124] ss:$16 sps:$4 sm:$0xff]   ;;  %v3569_v38 = vld [vmem:[%s4274_s10 + $0x12c] ss:$16 sps:$4 sm:$0xff]   ;;  %v3571_v39 = vld [vmem:[%s4274_s10 + $0x120] ss:$16 sps:$4 sm:$0xff]  }
  0x74   : > { %v3572_v40 = vld [vmem:[%s4274_s10 + $0x128] ss:$16 sps:$4 sm:$0xff]   ;;  %v3573_v41 = vld [vmem:[%s4274_s10 + $0x144] ss:$16 sps:$4 sm:$0xff]   ;;  %v3575_v42 = vld [vmem:[%s4274_s10 + $0x14c] ss:$16 sps:$4 sm:$0xff]  }
  0x75   : > { %1426 = vmatpush1.bf16.msra.mxu0 %v3535_v15  ;;  %1612 = vmatpush1.bf16.msra.mxu1 %v3536_v16  ;;  %v3577_v43 = vld [vmem:[%s4274_s10 + $0x140] ss:$16 sps:$4 sm:$0xff]   ;;  %v3578_v44 = vld [vmem:[%s4274_s10 + $0x148] ss:$16 sps:$4 sm:$0xff]   ;;  %v3579_v45 = vld [vmem:[%s4274_s10 + $0x164] ss:$16 sps:$4 sm:$0xff]  }
  0x76   : > { %1427 = vmatprep.subr.bf16.mxu0 %v3537_v17  ;;  %1613 = vmatprep.subr.bf16.mxu1 %v3539_v18  ;;  %v3581_v46 = vld [vmem:[%s4274_s10 + $0x16c] ss:$16 sps:$4 sm:$0xff]   ;;  %v3583_v47 = vld [vmem:[%s4274_s10 + $0x160] ss:$16 sps:$4 sm:$0xff]   ;;  %v3584_v48 = vld [vmem:[%s4274_s10 + $0x168] ss:$16 sps:$4 sm:$0xff]  }
  0x77   : > { %v3585_v49 = vld [vmem:[%s4274_s10 + $0x184] ss:$16 sps:$4 sm:$0xff]   ;;  %v3587_v50 = vld [vmem:[%s4274_s10 + $0x18c] ss:$16 sps:$4 sm:$0xff]   ;;  %v3589_v52 = vld [vmem:[%s4274_s10 + $0x180] ss:$16 sps:$4 sm:$0xff]  }
  0x78   : > { %v3590_v53 = vld [vmem:[%s4274_s10 + $0x188] ss:$16 sps:$4 sm:$0xff]   ;;  %v3591_v54 = vld [vmem:[%s4274_s10 + $0x1a4] ss:$16 sps:$4 sm:$0xff]   ;;  %v3593_v55 = vld [vmem:[%s4274_s10 + $0x1ac] ss:$16 sps:$4 sm:$0xff]  }
  0x79   : > { %1428 = vmatpush1.bf16.msra.mxu0 %v3541_v19  ;;  %1614 = vmatpush1.bf16.msra.mxu1 %v3542_v20  ;;  %v3595_v56 = vld [vmem:[%s4274_s10 + $0x1a0] ss:$16 sps:$4 sm:$0xff]   ;;  %v3596_v57 = vld [vmem:[%s4274_s10 + $0x1a8] ss:$16 sps:$4 sm:$0xff]   ;;  %v3597_v58 = vld [vmem:[%s4274_s10 + $0x1c4] ss:$16 sps:$4 sm:$0xff]  }
  0x7a   : > { %1429 = vmatprep.subr.bf16.mxu0 %v3543_v21  ;;  %1615 = vmatprep.subr.bf16.mxu1 %v3545_v22  ;;  %v3599_v59 = vld [vmem:[%s4274_s10 + $0x1cc] ss:$16 sps:$4 sm:$0xff]   ;;  %v3601_v60 = vld [vmem:[%s4274_s10 + $0x1c0] ss:$16 sps:$4 sm:$0xff]   ;;  %v3602_v61 = vld [vmem:[%s4274_s10 + $0x1c8] ss:$16 sps:$4 sm:$0xff]  }
  0x7b   : > { %v3603_v62 = vld [vmem:[%s4274_s10 + $0x1e4] ss:$16 sps:$4 sm:$0xff]   ;;  %v3605_v63 = vld [vmem:[%s4274_s10 + $0x1ec] ss:$16 sps:$4 sm:$0xff]   ;;  %v3607_v0 = vld [vmem:[%s4274_s10 + $0x1e0] ss:$16 sps:$4 sm:$0xff]  }
  0x7c   : > { %v3608_v1 = vld [vmem:[%s4274_s10 + $0x1e8] ss:$16 sps:$4 sm:$0xff]   ;;  %v3614_v2 = vld [vmem:[%s4274_s10 + $0x204] ss:$16 sps:$4 sm:$0xff]   ;;  %v3617_v3 = vld [vmem:[%s4274_s10 + $0x20c] ss:$16 sps:$4 sm:$0xff]  }
  0x7d   : > { %1430 = vmatpush1.bf16.msra.mxu0 %v3547_v23  ;;  %1616 = vmatpush1.bf16.msra.mxu1 %v3548_v24  ;;  %v3609_v4 = vld [vmem:[%s6406_s0] ss:$16 sps:$4 sm:$0xff]   ;;  %v3615_v6 = vld [vmem:[%s4274_s10 + $0x208] ss:$16 sps:$4 sm:$0xff]   ;;  %v3620_v7 = vld [vmem:[%s4274_s10 + $0x224] ss:$16 sps:$4 sm:$0xff]  }
  0x7e   : > { %1431 = vmatprep.subr.bf16.mxu0 %v3549_v25  ;;  %1617 = vmatprep.subr.bf16.mxu1 %v3551_v26  ;;  %v3612_v5 = vld [vmem:[%s4274_s10 + $0x200] ss:$16 sps:$4 sm:$0xff]   ;;  %v3623_v8 = vld [vmem:[%s4274_s10 + $0x22c] ss:$16 sps:$4 sm:$0xff]   ;;  %v3648_v9 = vld [vmem:[%s6406_s0 + $0x24] ss:$16 sps:$4 sm:$0xff]  }
  0x7f   : > { %v3618_v10 = vld [vmem:[%s4274_s10 + $0x220] ss:$16 sps:$4 sm:$0xff]   ;;  %v3621_v11 = vld [vmem:[%s4274_s10 + $0x228] ss:$16 sps:$4 sm:$0xff]   ;;  %v3626_v12 = vld [vmem:[%s4274_s10 + $0x244] ss:$16 sps:$4 sm:$0xff]  }
  0x80   : > { %v3629_v13 = vld [vmem:[%s4274_s10 + $0x24c] ss:$16 sps:$4 sm:$0xff]   ;;  %v3624_v14 = vld [vmem:[%s4274_s10 + $0x240] ss:$16 sps:$4 sm:$0xff]   ;;  %v3627_v16 = vld [vmem:[%s4274_s10 + $0x248] ss:$16 sps:$4 sm:$0xff]  }
  0x81   : > { %1432 = vmatpush1.bf16.msra.mxu0 %v3553_v27  ;;  %1618 = vmatpush1.bf16.msra.mxu1 %v3554_v28  ;;  %v3650_v15 = vld [vmem:[%s6406_s0 + $0x20] ss:$16 sps:$4 sm:$0xff]   ;;  %v3632_v17 = vld [vmem:[%s4274_s10 + $0x264] ss:$16 sps:$4 sm:$0xff]   ;;  %v3635_v18 = vld [vmem:[%s4274_s10 + $0x26c] ss:$16 sps:$4 sm:$0xff]  }
  0x82   : > { %1433 = vmatprep.subr.bf16.mxu0 %v3555_v29  ;;  %1619 = vmatprep.subr.bf16.mxu1 %v3557_v30  ;;  %v3663_v19 = vld [vmem:[%s6406_s0 + $0x44] ss:$16 sps:$4 sm:$0xff]   ;;  %v3630_v20 = vld [vmem:[%s4274_s10 + $0x260] ss:$16 sps:$4 sm:$0xff]   ;;  %v3633_v21 = vld [vmem:[%s4274_s10 + $0x268] ss:$16 sps:$4 sm:$0xff]  }
  0x83   : > { %v3638_v22 = vld [vmem:[%s4274_s10 + $0x284] ss:$16 sps:$4 sm:$0xff]   ;;  %v3641_v23 = vld [vmem:[%s4274_s10 + $0x28c] ss:$16 sps:$4 sm:$0xff]   ;;  %v3636_v24 = vld [vmem:[%s4274_s10 + $0x280] ss:$16 sps:$4 sm:$0xff]  }
  0x84   : > { %v3665_v25 = vld [vmem:[%s6406_s0 + $0x40] ss:$16 sps:$4 sm:$0xff]   ;;  %v3639_v26 = vld [vmem:[%s4274_s10 + $0x288] ss:$16 sps:$4 sm:$0xff]   ;;  %v3644_v27 = vld [vmem:[%s4274_s10 + $0x2a4] ss:$16 sps:$4 sm:$0xff]  }
  0x85   : > { %1434 = vmatpush1.bf16.msra.mxu0 %v3559_v31  ;;  %1620 = vmatpush1.bf16.msra.mxu1 %v3560_v32  ;;  %v3647_v28 = vld [vmem:[%s4274_s10 + $0x2ac] ss:$16 sps:$4 sm:$0xff]   ;;  %v3678_v29 = vld [vmem:[%s6406_s0 + $0x64] ss:$16 sps:$4 sm:$0xff]   ;;  %v3642_v30 = vld [vmem:[%s4274_s10 + $0x2a0] ss:$16 sps:$4 sm:$0xff]  }
  0x86   : > { %1435 = vmatprep.subr.bf16.mxu0 %v3561_v33  ;;  %1621 = vmatprep.subr.bf16.mxu1 %v3563_v34  ;;  %v3645_v31 = vld [vmem:[%s4274_s10 + $0x2a8] ss:$16 sps:$4 sm:$0xff]   ;;  %v3653_v32 = vld [vmem:[%s4274_s10 + $0x2c4] ss:$16 sps:$4 sm:$0xff]   ;;  %v3656_v33 = vld [vmem:[%s4274_s10 + $0x2cc] ss:$16 sps:$4 sm:$0xff]  }
  0x87   : > { %v3651_v34 = vld [vmem:[%s4274_s10 + $0x2c0] ss:$16 sps:$4 sm:$0xff]   ;;  %s5210_s8 = scalar_lea.vmem [#allocation3], %s3450_s7  ;;  %s3011_s15 = scalar_lea.sflag [#allocation4], %s4268_s6 }
  0x88   : > { %s3027_s9 = sshll.u32 %s5210_s8, 4  ;;  %s6353_s9 = int_to_ptr.vmem [resolvable:$true] %s3027_s9 }
  0x89   : > { %1436 = vmatpush1.bf16.msra.mxu0 %v3565_v35  ;;  %1622 = vmatpush1.bf16.msra.mxu1 %v3566_v36  ;;  %v3680_v35 = vld [vmem:[%s6406_s0 + $0x60] ss:$16 sps:$4 sm:$0xff]   ;;  %v3654_v36 = vld [vmem:[%s4274_s10 + $0x2c8] ss:$16 sps:$4 sm:$0xff]   ;;  %s3837_s23 = scalar_lea.vmem %s6353_s9, 6144 }
  0x8a   : > { %1437 = vmatprep.subr.bf16.mxu0 %v3567_v37  ;;  %1623 = vmatprep.subr.bf16.mxu1 %v3569_v38  ;;  %v3659_v37 = vld [vmem:[%s4274_s10 + $0x2e4] ss:$16 sps:$4 sm:$0xff]   ;;  %v3662_v38 = vld [vmem:[%s4274_s10 + $0x2ec] ss:$16 sps:$4 sm:$0xff]   ;;  %p3838_p0 = scmp.ne.s32.totalorder %s6353_s9, %s3837_s23 }
  0x8c   : > { %p3839_p1 = pnand %p3838_p0, %p3982_p5 }
  0x8d   : > { %1438 = vmatpush1.bf16.msra.mxu0 %v3571_v39  ;;  %1624 = vmatpush1.bf16.msra.mxu1 %v3572_v40  ;;  %v3693_v39 = vld [vmem:[%s6406_s0 + $0x84] ss:$16 sps:$4 sm:$0xff]   ;;  %v3657_v40 = vld [vmem:[%s4274_s10 + $0x2e0] ss:$16 sps:$4 sm:$0xff]  }
  0x8e   : > { %1439 = vmatprep.subr.bf16.mxu0 %v3573_v41  ;;  %1625 = vmatprep.subr.bf16.mxu1 %v3575_v42  ;;  %v3660_v41 = vld [vmem:[%s4274_s10 + $0x2e8] ss:$16 sps:$4 sm:$0xff]   ;;  %v3668_v42 = vld [vmem:[%s4274_s10 + $0x304] ss:$16 sps:$4 sm:$0xff]   ;;  %p3840_p2 = pneg %p3839_p1 }
  0x91   : > { %1440 = vmatpush1.bf16.msra.mxu0 %v3577_v43  ;;  %1626 = vmatpush1.bf16.msra.mxu1 %v3578_v44  ;;  %v3671_v43 = vld [vmem:[%s4274_s10 + $0x30c] ss:$16 sps:$4 sm:$0xff]   ;;  %v3666_v44 = vld [vmem:[%s4274_s10 + $0x300] ss:$16 sps:$4 sm:$0xff]  }
  0x92   : > { %1441 = vmatprep.subr.bf16.mxu0 %v3579_v45  ;;  %1627 = vmatprep.subr.bf16.mxu1 %v3581_v46  ;;  %v3695_v45 = vld [vmem:[%s6406_s0 + $0x80] ss:$16 sps:$4 sm:$0xff]   ;;  %v3669_v46 = vld [vmem:[%s4274_s10 + $0x308] ss:$16 sps:$4 sm:$0xff]  }
  0x95   : > { %1442 = vmatpush1.bf16.msra.mxu0 %v3583_v47  ;;  %1628 = vmatpush1.bf16.msra.mxu1 %v3584_v48  ;;  %v3674_v47 = vld [vmem:[%s4274_s10 + $0x324] ss:$16 sps:$4 sm:$0xff]   ;;  %v4407_v48 = vstv %s3347_s18  ;;  %s3919_s18 = smov [#allocation3]  }
  0x96   : > { %1443 = vmatprep.subr.bf16.mxu0 %v3585_v49  ;;  %1629 = vmatprep.subr.bf16.mxu1 %v3587_v50  ;;  %v3677_v49 = vld [vmem:[%s4274_s10 + $0x32c] ss:$16 sps:$4 sm:$0xff]   ;;  %v3708_v50 = vld [vmem:[%s6406_s0 + $0xa4] ss:$16 sps:$4 sm:$0xff]   ;;  %s3841_s26 = sshll.u32 %s3919_s18, 4  ;;  %s3842_s26 = int_to_ptr.vmem [resolvable:$false] %s3841_s26 }
  0x97   : > { %s3843_s27 = scalar_lea.vmem %s3842_s26, 12288  ;;  %p3844_p3 = scmp.lt.s32.totalorder %s6353_s9, %s3842_s26 }
  0x98   : > { %p3845_p4 = scmp.lt.s32.totalorder %s3843_s27, %s3837_s23 }
  0x99   : > { %1444 = vmatpush1.bf16.msra.mxu0 %v3589_v52  ;;  %1630 = vmatpush1.bf16.msra.mxu1 %v3590_v53  ;;  %v2578_v52 = vsub.s32 %v2564_v51, %v4407_v48  ;;  %v2566_v53 = vld [vmem:[%s6408_s2 + $0x10] sm:$0xff] }
  0x9a   : > { %1445 = vmatprep.subr.bf16.mxu0 %v3591_v54  ;;  %1631 = vmatprep.subr.bf16.mxu1 %v3593_v55  ;;  %v3672_v54 = vld [vmem:[%s4274_s10 + $0x320] ss:$16 sps:$4 sm:$0xff]   ;;  %v3675_v55 = vld [vmem:[%s4274_s10 + $0x328] ss:$16 sps:$4 sm:$0xff]   ;;  %p3846_p6 = por %p3845_p4, %p3844_p3 }
  0x9b   : > { %2591 = vperm.xlu0 %3511, %v2578_v52  }
  0x9c   : > { %p3847_p7 = pnand %p3846_p6, %p3840_p2 }
  0x9d   : > { %1446 = vmatpush1.bf16.msra.mxu0 %v3595_v56  ;;  %1632 = vmatpush1.bf16.msra.mxu1 %v3596_v57  ;;  %v2580_v56 = vsub.s32 %v2566_v53, %v4407_v48  ;;  %v3683_v57 = vld [vmem:[%s4274_s10 + $0x344] ss:$16 sps:$4 sm:$0xff]  }
  0x9e   : > { %1447 = vmatprep.subr.bf16.mxu0 %v3597_v58  ;;  %1633 = vmatprep.subr.bf16.mxu1 %v3599_v59  ;;  %v3686_v58 = vld [vmem:[%s4274_s10 + $0x34c] ss:$16 sps:$4 sm:$0xff]   ;;  %v3681_v59 = vld [vmem:[%s4274_s10 + $0x340] ss:$16 sps:$4 sm:$0xff]  }
  0x9f   : > { %2597 = vperm.xlu1 %3512, %v2580_v56  }
  0xa1   : > { %1448 = vmatpush1.bf16.msra.mxu0 %v3601_v60  ;;  %1634 = vmatpush1.bf16.msra.mxu1 %v3602_v61  ;;  %v3710_v60 = vld [vmem:[%s6406_s0 + $0xa0] ss:$16 sps:$4 sm:$0xff]   ;;  %v3684_v61 = vld [vmem:[%s4274_s10 + $0x348] ss:$16 sps:$4 sm:$0xff]  }
  0xa2   : > { %1449 = vmatprep.subr.bf16.mxu0 %v3603_v62  ;;  %1635 = vmatprep.subr.bf16.mxu1 %v3605_v63  ;;  %v2565_v62 = vld [vmem:[%s6408_s2 + $0x8] sm:$0xff]  ;;  %v2567_v63 = vld [vmem:[%s6408_s2 + $0x18] sm:$0xff] }
  0xa5   : > { %1450 = vmatpush1.bf16.msra.mxu0 %v3607_v0  ;;  %1636 = vmatpush1.bf16.msra.mxu1 %v3608_v1  ;;  %v3689_v0 = vld [vmem:[%s4274_s10 + $0x364] ss:$16 sps:$4 sm:$0xff]   ;;  %v3692_v1 = vld [vmem:[%s4274_s10 + $0x36c] ss:$16 sps:$4 sm:$0xff]  }
  0xa6   : > { %1512 = vmatprep.subr.bf16.mxu0 %v3614_v2  ;;  %1698 = vmatprep.subr.bf16.mxu1 %v3617_v3  ;;  %v3725_v2 = vld [vmem:[%s6406_s0 + $0xc] ss:$16 sps:$4 sm:$0xff]   ;;  %v3687_v3 = vld [vmem:[%s4274_s10 + $0x360] ss:$16 sps:$4 sm:$0xff]  }
  0xa8   : > { %1452 = vmatmul.mubr.bf16.vlgmr.msra.gmra.mrb[0].mxu0 %v3609_v4  ;;  %1638 = vmatmul.mubr.bf16.vlgmr.msra.gmra.mrb[0].mxu1 %v3609_v4  ;;  %v2579_v4 = vsub.s32 %v2565_v62, %v4407_v48 }
  0xa9   : > { %1513 = vmatpush1.bf16.msra.mxu0 %v3612_v5  ;;  %1699 = vmatpush1.bf16.msra.mxu1 %v3615_v6  ;;  %v2581_v5 = vsub.s32 %v2567_v63, %v4407_v48  ;;  %v3690_v6 = vld [vmem:[%s4274_s10 + $0x368] ss:$16 sps:$4 sm:$0xff]  }
  0xaa   : > { %1514 = vmatprep.subr.bf16.mxu0 %v3620_v7  ;;  %1700 = vmatprep.subr.bf16.mxu1 %v3623_v8  ;;  %v2569_v7 = vld [vmem:[%s6408_s2 + $0x28] sm:$0xff]  ;;  %v2568_v8 = vld [vmem:[%s6408_s2 + $0x20] sm:$0xff] }
  0xab   : > { %1461 = vmatprep.mubr.bf16.mxu0 %v3648_v9  ;;  %1647 = vmatprep.mubr.bf16.mxu1 %v3648_v9  ;;  %v3698_v9 = vld [vmem:[%s4274_s10 + $0x384] ss:$16 sps:$4 sm:$0xff]  }
  0xac   : > { %2594 = vperm.xlu0 %3511, %v2579_v4   ;;  %2600 = vperm.xlu1 %3512, %v2581_v5  }
  0xad   : > { %1515 = vmatpush1.bf16.msra.mxu0 %v3618_v10  ;;  %1701 = vmatpush1.bf16.msra.mxu1 %v3621_v11  ;;  %v3701_v10 = vld [vmem:[%s4274_s10 + $0x38c] ss:$16 sps:$4 sm:$0xff]   ;;  %v3696_v11 = vld [vmem:[%s4274_s10 + $0x380] ss:$16 sps:$4 sm:$0xff]  }
  0xae   : > { %1516 = vmatprep.subr.bf16.mxu0 %v3626_v12  ;;  %1702 = vmatprep.subr.bf16.mxu1 %v3629_v13  ;;  %v2583_v12 = vsub.s32 %v2569_v7, %v4407_v48  ;;  %v2582_v13 = vsub.s32 %v2568_v8, %v4407_v48 }
  0xb0   : > { %1462 = vmatmul.mubr.bf16.gmra.mrb[4].mxu0 %v3650_v15  ;;  %1648 = vmatmul.mubr.bf16.gmra.mrb[4].mxu1 %v3650_v15  ;;  %v2571_v15 = vld [vmem:[%s6408_s2 + $0x38] sm:$0xff] }
  0xb1   : > { %1517 = vmatpush1.bf16.msra.mxu0 %v3624_v14  ;;  %1703 = vmatpush1.bf16.msra.mxu1 %v3627_v16  ;;  %v3699_v14 = vld [vmem:[%s4274_s10 + $0x388] ss:$16 sps:$4 sm:$0xff]   ;;  %v2570_v16 = vld [vmem:[%s6408_s2 + $0x30] sm:$0xff] }
  0xb2   : > { %1518 = vmatprep.subr.bf16.mxu0 %v3632_v17  ;;  %1704 = vmatprep.subr.bf16.mxu1 %v3635_v18  ;;  %v3704_v17 = vld [vmem:[%s4274_s10 + $0x3a4] ss:$16 sps:$4 sm:$0xff]   ;;  %v3707_v18 = vld [vmem:[%s4274_s10 + $0x3ac] ss:$16 sps:$4 sm:$0xff]  }
  0xb3   : > { %1471 = vmatprep.mubr.bf16.mxu0 %v3663_v19  ;;  %1657 = vmatprep.mubr.bf16.mxu1 %v3663_v19  ;;  %v3702_v19 = vld [vmem:[%s4274_s10 + $0x3a0] ss:$16 sps:$4 sm:$0xff]  }
  0xb4   : > { %2606 = vperm.xlu1 %3512, %v2583_v12   ;;  %2603 = vperm.xlu0 %3511, %v2582_v13  }
  0xb5   : > { %1519 = vmatpush1.bf16.msra.mxu0 %v3630_v20  ;;  %1705 = vmatpush1.bf16.msra.mxu1 %v3633_v21  ;;  %v2585_v20 = vsub.s32 %v2571_v15, %v4407_v48  ;;  %v2584_v21 = vsub.s32 %v2570_v16, %v4407_v48 }
  0xb6   : > { %1520 = vmatprep.subr.bf16.mxu0 %v3638_v22  ;;  %1706 = vmatprep.subr.bf16.mxu1 %v3641_v23  ;;  %v3705_v22 = vld [vmem:[%s4274_s10 + $0x3a8] ss:$16 sps:$4 sm:$0xff]  }
  0xb7   : > { %v2573_v23 = vld [vmem:[%s6408_s2 + $0x48] sm:$0xff] }
  0xb8   : > { %1472 = vmatmul.mubr.bf16.gmra.mrb[8].mxu0 %v3665_v25  ;;  %1658 = vmatmul.mubr.bf16.gmra.mrb[8].mxu1 %v3665_v25  ;;  %v3713_v25 = vld [vmem:[%s4274_s10 + $0x3c4] ss:$16 sps:$4 sm:$0xff]  }
  0xb9   : > { %1521 = vmatpush1.bf16.msra.mxu0 %v3636_v24  ;;  %1707 = vmatpush1.bf16.msra.mxu1 %v3639_v26  ;;  %v2572_v24 = vld [vmem:[%s6408_s2 + $0x40] sm:$0xff]  ;;  %v3716_v26 = vld [vmem:[%s4274_s10 + $0x3cc] ss:$16 sps:$4 sm:$0xff]  }
  0xba   : > { %1522 = vmatprep.subr.bf16.mxu0 %v3644_v27  ;;  %1708 = vmatprep.subr.bf16.mxu1 %v3647_v28  ;;  %v3711_v27 = vld [vmem:[%s4274_s10 + $0x3c0] ss:$16 sps:$4 sm:$0xff]   ;;  %v2587_v28 = vsub.s32 %v2573_v23, %v4407_v48 }
  0xbb   : > { %1481 = vmatprep.mubr.bf16.mxu0 %v3678_v29  ;;  %1667 = vmatprep.mubr.bf16.mxu1 %v3678_v29  ;;  %v2586_v29 = vsub.s32 %v2572_v24, %v4407_v48 }
  0xbc   : > { %2612 = vperm.xlu1 %3512, %v2585_v20   ;;  %2609 = vperm.xlu0 %3511, %v2584_v21  }
  0xbd   : > { %1523 = vmatpush1.bf16.msra.mxu0 %v3642_v30  ;;  %1709 = vmatpush1.bf16.msra.mxu1 %v3645_v31  ;;  %v3714_v30 = vld [vmem:[%s4274_s10 + $0x3c8] ss:$16 sps:$4 sm:$0xff]  }
  0xbe   : > { %1524 = vmatprep.subr.bf16.mxu0 %v3653_v32  ;;  %1710 = vmatprep.subr.bf16.mxu1 %v3656_v33  ;;  %v2575_v31 = vld [vmem:[%s6408_s2 + $0x58] sm:$0xff]  ;;  %v2574_v32 = vld [vmem:[%s6408_s2 + $0x50] sm:$0xff] }
  0xbf   : > { %v3719_v33 = vld [vmem:[%s4274_s10 + $0x3e4] ss:$16 sps:$4 sm:$0xff]  }
  0xc0   : > { %1482 = vmatmul.mubr.bf16.gmra.mrb[12].mxu0 %v3680_v35  ;;  %1668 = vmatmul.mubr.bf16.gmra.mrb[12].mxu1 %v3680_v35  ;;  %v2589_v35 = vsub.s32 %v2575_v31, %v4407_v48 }
  0xc1   : > { %1525 = vmatpush1.bf16.msra.mxu0 %v3651_v34  ;;  %1711 = vmatpush1.bf16.msra.mxu1 %v3654_v36  ;;  %v3722_v34 = vld [vmem:[%s4274_s10 + $0x3ec] ss:$16 sps:$4 sm:$0xff]   ;;  %v2588_v36 = vsub.s32 %v2574_v32, %v4407_v48  ;;  %v6410_v32 = vmov 0.0  }
  0xc2   : > { %1526 = vmatprep.subr.bf16.mxu0 %v3659_v37  ;;  %1712 = vmatprep.subr.bf16.mxu1 %v3662_v38  ;;  %v3717_v37 = vld [vmem:[%s4274_s10 + $0x3e0] ss:$16 sps:$4 sm:$0xff]   ;;  %v3720_v38 = vld [vmem:[%s4274_s10 + $0x3e8] ss:$16 sps:$4 sm:$0xff]   ;;  %v3738_v48 = vld [vmem:[%s6406_s0 + $0xac] ss:$16 sps:$4 sm:$0xff]  }
  0xc3   : > { %1491 = vmatprep.mubr.bf16.mxu0 %v3693_v39  ;;  %1677 = vmatprep.mubr.bf16.mxu1 %v3693_v39  ;;  %v3723_v39 = vld [vmem:[%s6406_s0 + $0x8] ss:$16 sps:$4 sm:$0xff]  }
  0xc4   : > { %2618 = vperm.xlu1 %3512, %v2587_v28   ;;  %2615 = vperm.xlu0 %3511, %v2586_v29  }
  0xc5   : > { %1527 = vmatpush1.bf16.msra.mxu0 %v3657_v40  ;;  %1713 = vmatpush1.bf16.msra.mxu1 %v3660_v41  ;;  %v3726_v40 = vld [vmem:[%s6406_s0 + $0x2c] ss:$16 sps:$4 sm:$0xff]   ;;  %v3728_v41 = vld [vmem:[%s6406_s0 + $0x28] ss:$16 sps:$4 sm:$0xff]  }
  0xc6   : > { %1528 = vmatprep.subr.bf16.mxu0 %v3668_v42  ;;  %1714 = vmatprep.subr.bf16.mxu1 %v3671_v43  ;;  %v3729_v42 = vld [vmem:[%s6406_s0 + $0x4c] ss:$16 sps:$4 sm:$0xff]   ;;  %v3731_v43 = vld [vmem:[%s6406_s0 + $0x48] ss:$16 sps:$4 sm:$0xff]  }
  0xc8   : > { %1492 = vmatmul.mubr.bf16.gmra.mrb[16].mxu0 %v3695_v45  ;;  %1678 = vmatmul.mubr.bf16.gmra.mrb[16].mxu1 %v3695_v45  ;;  %v3734_v45 = vld [vmem:[%s6406_s0 + $0x68] ss:$16 sps:$4 sm:$0xff]  }
  0xc9   : > { %1529 = vmatpush1.bf16.msra.mxu0 %v3666_v44  ;;  %1715 = vmatpush1.bf16.msra.mxu1 %v3669_v46  ;;  %v3732_v44 = vld [vmem:[%s6406_s0 + $0x6c] ss:$16 sps:$4 sm:$0xff]  }
  0xca   : > { %1530 = vmatprep.subr.bf16.mxu0 %v3674_v47  ;;  %1716 = vmatprep.subr.bf16.mxu1 %v3677_v49  ;;  %v3735_v46 = vld [vmem:[%s6406_s0 + $0x8c] ss:$16 sps:$4 sm:$0xff]   ;;  %v3737_v47 = vld [vmem:[%s6406_s0 + $0x88] ss:$16 sps:$4 sm:$0xff]  }
  0xcb   : > { %1501 = vmatprep.mubr.bf16.mxu0 %v3708_v50  ;;  %1687 = vmatprep.mubr.bf16.mxu1 %v3708_v50  ;;  %v3740_v49 = vld [vmem:[%s6406_s0 + $0xa8] ss:$16 sps:$4 sm:$0xff]  }
  0xcc   : > { %2624 = vperm.xlu1 %3512, %v2589_v35   ;;  %2621 = vperm.xlu0 %3511, %v2588_v36  }
  0xcd   : > { %1531 = vmatpush1.bf16.msra.mxu0 %v3672_v54  ;;  %1717 = vmatpush1.bf16.msra.mxu1 %v3675_v55 }
  0xce   : > { %1532 = vmatprep.subr.bf16.mxu0 %v3683_v57  ;;  %1718 = vmatprep.subr.bf16.mxu1 %v3686_v58  ;;  %v2559_v57 = vlaneseq }
  0xd0   : > { %1502 = vmatmul.mubr.bf16.gmra.mrb[20].mxu0 %v3710_v60  ;;  %1688 = vmatmul.mubr.bf16.gmra.mrb[20].mxu1 %v3710_v60 }
  0xd1   : > { %1533 = vmatpush1.bf16.msra.mxu0 %v3681_v59  ;;  %1719 = vmatpush1.bf16.msra.mxu1 %v3684_v61 }
  0xd2   : > { %1534 = vmatprep.subr.bf16.mxu0 %v3689_v0  ;;  %1720 = vmatprep.subr.bf16.mxu1 %v3692_v1 }
  0xd3   : > { %1544 = vmatprep.mubr.bf16.mxu0 %v3725_v2  ;;  %1730 = vmatprep.mubr.bf16.mxu1 %v3725_v2  ;;  %v4554_v2 = vand.u32 127, %v2559_v57 }
  0xd5   : > { %1535 = vmatpush1.bf16.msra.mxu0 %v3687_v3  ;;  %1721 = vmatpush1.bf16.msra.mxu1 %v3690_v6  ;;  %6527 = vst [vmem:[#allocation13_spill] sm:$0xff] %v4554_v2  ;;  %v4579_v16 = vadd.s32 384, %v4554_v2 }
  0xd6   : > { %1536 = vmatprep.subr.bf16.mxu0 %v3698_v9  ;;  %1722 = vmatprep.subr.bf16.mxu1 %v3701_v10  ;;  %v4567_v10 = vadd.s32 128, %v4554_v2 }
  0xd7   : > { %6534 = vst [vmem:[#allocation20_spill] sm:$0xff] %v4579_v16 }
  0xd8   : > { %6531 = vst [vmem:[#allocation17_spill] sm:$0xff] %v4567_v10 }
  0xd9   : > { %1537 = vmatpush1.bf16.msra.mxu0 %v3696_v11  ;;  %1723 = vmatpush1.bf16.msra.mxu1 %v3699_v14  ;;  %v4570_v11 = vadd.s32 256, %v4554_v2 }
  0xda   : > { %1538 = vmatprep.subr.bf16.mxu0 %v3704_v17  ;;  %1724 = vmatprep.subr.bf16.mxu1 %v3707_v18 }
  0xdb   : > { %6532 = vst [vmem:[#allocation18_spill] sm:$0xff] %v4570_v11 }
  0xdd   : > { %1539 = vmatpush1.bf16.msra.mxu0 %v3702_v19  ;;  %1725 = vmatpush1.bf16.msra.mxu1 %v3705_v22 }
  0xde   : > { %1540 = vmatprep.subr.bf16.mxu0 %v3713_v25  ;;  %1726 = vmatprep.subr.bf16.mxu1 %v3716_v26 }
  0xe1   : > { %1541 = vmatpush1.bf16.msra.mxu0 %v3711_v27  ;;  %1727 = vmatpush1.bf16.msra.mxu1 %v3714_v30 }
  0xe2   : > { %1542 = vmatprep.subr.bf16.mxu0 %v3719_v33  ;;  %1728 = vmatprep.subr.bf16.mxu1 %v3722_v34 }
  0xe5   : > { %1543 = vmatpush1.bf16.msra.mxu0 %v3717_v37  ;;  %1729 = vmatpush1.bf16.msra.mxu1 %v3720_v38 }
  0xe8   : > { %1545 = vmatmul.mubr.bf16.vlgmr.msra.gmra.mrb[0].mxu0 %v3723_v39  ;;  %1731 = vmatmul.mubr.bf16.vlgmr.msra.gmra.mrb[0].mxu1 %v3723_v39 }
  0xe9   : > { %1554 = vmatprep.mubr.bf16.mxu0 %v3726_v40  ;;  %1740 = vmatprep.mubr.bf16.mxu1 %v3726_v40 }
  0xf0   : > { %1555 = vmatmul.mubr.bf16.gmra.mrb[4].mxu0 %v3728_v41  ;;  %1741 = vmatmul.mubr.bf16.gmra.mrb[4].mxu1 %v3728_v41 }
  0xf1   : > { %1564 = vmatprep.mubr.bf16.mxu0 %v3729_v42  ;;  %1750 = vmatprep.mubr.bf16.mxu1 %v3729_v42 }
  0xf8   : > { %1565 = vmatmul.mubr.bf16.gmra.mrb[8].mxu0 %v3731_v43  ;;  %1751 = vmatmul.mubr.bf16.gmra.mrb[8].mxu1 %v3731_v43 }
  0xf9   : > { %1574 = vmatprep.mubr.bf16.mxu0 %v3732_v44  ;;  %1760 = vmatprep.mubr.bf16.mxu1 %v3732_v44 }
 0x100   : > { %1575 = vmatmul.mubr.bf16.gmra.mrb[12].mxu0 %v3734_v45  ;;  %1761 = vmatmul.mubr.bf16.gmra.mrb[12].mxu1 %v3734_v45 }
 0x101   : > { %1584 = vmatprep.mubr.bf16.mxu0 %v3735_v46  ;;  %1770 = vmatprep.mubr.bf16.mxu1 %v3735_v46 }
 0x108   : > { %1585 = vmatmul.mubr.bf16.gmra.mrb[16].mxu0 %v3737_v47  ;;  %1771 = vmatmul.mubr.bf16.gmra.mrb[16].mxu1 %v3737_v47 }
 0x109   : > { %1594 = vmatprep.mubr.bf16.mxu0 %v3738_v48  ;;  %1780 = vmatprep.mubr.bf16.mxu1 %v3738_v48 }
 0x110   : > { %1595 = vmatmul.mubr.bf16.gmra.mrb[20].mxu0 %v3740_v49  ;;  %1781 = vmatmul.mubr.bf16.gmra.mrb[20].mxu1 %v3740_v49 }
 0x11a   : > { %v2592_v5 = vpop.permute.xlu0 %2591 }
 0x11b   : > { %vm2626_vm0 = vcmp.eq.s32.totalorder %v4554_v2, %v2592_v5  ;;  %vm2627_vm1 = vcmp.eq.s32.totalorder %v4567_v10, %v2592_v5  ;;  %vm2628_vm2 = vcmp.eq.s32.totalorder %v4570_v11, %v2592_v5  ;;  %vm2629_vm3 = vcmp.eq.s32.totalorder %v4579_v16, %v2592_v5 }
 0x11c   : > { %v4616_v33 = vsel %vm2626_vm0, 1.0, %v6410_v32  ;;  %v4619_v34 = vsel %vm2628_vm2, 1.0, %v6410_v32  ;;  %v4626_v36 = vsel %vm2627_vm1, 1.0, %v6410_v32  ;;  %v4646_v42 = vsel %vm2629_vm3, 1.0, %v6410_v32 }
 0x11d   : > { %6538 = vst [vmem:[#allocation24_spill] sm:$0xff] %v4616_v33  ;;  %6539 = vst [vmem:[#allocation25_spill] sm:$0xff] %v4619_v34 }
 0x11e   : > { %6540 = vst [vmem:[#allocation26_spill] sm:$0xff] %v4626_v36  ;;  %6541 = vst [vmem:[#allocation27_spill] sm:$0xff] %v4646_v42 }
 0x12b   : > { %v4584_v18 = vpop.permute.xlu0 %2594 }
 0x12c   : > { %vm2630_vm4 = vcmp.eq.s32.totalorder %v4554_v2, %v4584_v18  ;;  %vm2631_vm5 = vcmp.eq.s32.totalorder %v4567_v10, %v4584_v18  ;;  %vm2632_vm6 = vcmp.eq.s32.totalorder %v4570_v11, %v4584_v18  ;;  %vm2633_vm7 = vcmp.eq.s32.totalorder %v4579_v16, %v4584_v18 }
 0x12d   : > { %v4649_v43 = vsel %vm2630_vm4, 1.0, %v6410_v32  ;;  %v4663_v48 = vsel %vm2632_vm6, 1.0, %v6410_v32 }
 0x12e   : > { %6542 = vst [vmem:[#allocation28_spill] sm:$0xff] %v4649_v43  ;;  %6545 = vst [vmem:[#allocation31_spill] sm:$0xff] %v4663_v48  ;;  %v6553_v48 = vmov 0.0  }
 0x1bb   : > { %v4526_v50 = vpop.f32.mrb[0].mxu0  ;;  %v4528_v51 = vpop.f32.mrb[0].mxu1 }
 0x1bc   : > { %v4530_v52 = vpop.f32.mrb[1].mxu0  ;;  %v4532_v53 = vpop.f32.mrb[1].mxu1  ;;  %v1791_v55 = vmul.f32 %v4526_v50, %v4526_v50  ;;  %v1793_v58 = vmul.f32 %v4528_v51, %v4528_v51  ;;  %v4638_v40 = vmul.f32 0.87758255, %v4526_v50  ;;  %v4641_v41 = vadd.f32 -0.23971277, %v4526_v50 }
 0x1bd   : > { %v4534_v54 = vpop.f32.mrb[2].mxu0  ;;  %v4538_v56 = vpop.f32.mrb[2].mxu1  ;;  %v1792_v4 = vmul.f32 %v4530_v52, %v4530_v52  ;;  %v1794_v14 = vmul.f32 %v4532_v53, %v4532_v53  ;;  %v4652_v44 = vmul.f32 0.87758255, %v4528_v51  ;;  %v4666_v49 = vadd.f32 -0.23971277, %v4528_v51 }
 0x1be   : > { %6520 = vst [vmem:[#allocation6_spill] sm:$0xff] %v4534_v54  ;;  %6521 = vst [vmem:[#allocation7_spill] sm:$0xff] %v4538_v56  ;;  %v4542_v59 = vpop.f32.mrb[3].mxu0  ;;  %v4544_v60 = vpop.f32.mrb[3].mxu1  ;;  %v1839_v63 = vsub.f32 1.0, %v1791_v55  ;;  %v1841_v3 = vsub.f32 1.0, %v1793_v58  ;;  %v1795_v17 = vmul.f32 %v4534_v54, %v4534_v54  ;;  %v1797_v19 = vmul.f32 %v4538_v56, %v4538_v56 }
 0x1bf   : > { %6522 = vst [vmem:[#allocation8_spill] sm:$0xff] %v4542_v59  ;;  %6523 = vst [vmem:[#allocation9_spill] sm:$0xff] %v4544_v60  ;;  %v1840_v13 = vsub.f32 1.0, %v1792_v4  ;;  %v1842_v23 = vsub.f32 1.0, %v1794_v14  ;;  %v1796_v24 = vmul.f32 %v4542_v59, %v4542_v59  ;;  %v1798_v39 = vmul.f32 %v4544_v60, %v4544_v60 }
 0x1c0   : > { %v4564_v9 = vmax.f32 %v1839_v63, 0.0  ;;  %v4572_v12 = vmax.f32 %v1841_v3, 0.0  ;;  %v1843_v29 = vsub.f32 1.0, %v1795_v17  ;;  %v1845_v35 = vsub.f32 1.0, %v1797_v19 }
 0x1c1   : > { %v4596_v22 = vmax.f32 %v1840_v13, 0.0  ;;  %v4633_v37 = vmax.f32 %v1842_v23, 0.0  ;;  %v1844_v38 = vsub.f32 1.0, %v1796_v24  ;;  %v4680_v3 = vsel %vm2631_vm5, 1.0, %v6410_v32 }
 0x1c2   : > { %3741 = vrsqrt.f32 %v4564_v9  ;;  %v4654_v45 = vmax.f32 %v1843_v29, 0.0  ;;  %v4668_v55 = vmax.f32 %v1845_v35, 0.0  ;;  %6548 = vst [vmem:[#allocation34_spill] sm:$0xff] %v4680_v3  ;;  %v1846_v5 = vsub.f32 1.0, %v1798_v39 }
 0x1c3   : > { %v4546_v61 = vpop.f32.mrb[4].mxu0  ;;  %v4548_v62 = vpop.f32.mrb[4].mxu1  ;;  %3743 = vrsqrt.f32 %v4572_v12  ;;  %v4683_v4 = vmax.f32 %v1844_v38, 0.0  ;;  %v4690_v19 = vmul.f32 0.87758255, %v4530_v52  ;;  %v4712_v3 = vsel %vm2633_vm7, 1.0, %v6553_v48 }
 0x1c4   : > { %6524 = vst [vmem:[#allocation10_spill] sm:$0xff] %v4546_v61  ;;  %6525 = vst [vmem:[#allocation11_spill] sm:$0xff] %v4548_v62  ;;  %v4550_v0 = vpop.f32.mrb[5].mxu0  ;;  %v4552_v1 = vpop.f32.mrb[5].mxu1  ;;  %3745 = vrsqrt.f32 %v4596_v22  ;;  %v1799_v57 = vmul.f32 %v4546_v61, %v4546_v61  ;;  %v1801_v13 = vmul.f32 %v4548_v62, %v4548_v62  ;;  %v4693_v23 = vadd.f32 -0.23971277, %v4530_v52 }
 0x1c5   : > { %6526 = vst [vmem:[#allocation12_spill] sm:$0xff] %v4552_v1  ;;  %v4558_v6 = vpop.f32.mrb[6].mxu0  ;;  %v4560_v7 = vpop.f32.mrb[6].mxu1  ;;  %3747 = vrsqrt.f32 %v4633_v37  ;;  %v4700_v38 = vmul.f32 0.87758255, %v4532_v53  ;;  %6554 = vst [vmem:[#allocation39_spill] sm:$0xff] %v4712_v3 }
 0x1c6   : > { %6528 = vst [vmem:[#allocation14_spill] sm:$0xff] %v4558_v6  ;;  %6529 = vst [vmem:[#allocation15_spill] sm:$0xff] %v4560_v7  ;;  %v4562_v8 = vpop.f32.mrb[7].mxu0  ;;  %v4576_v15 = vpop.f32.mrb[7].mxu1  ;;  %v4703_v39 = vadd.f32 -0.23971277, %v4532_v53  ;;  %3749 = vrsqrt.f32 %v4654_v45 }
 0x1c7   : > { %6530 = vst [vmem:[#allocation16_spill] sm:$0xff] %v4562_v8  ;;  %6533 = vst [vmem:[#allocation19_spill] sm:$0xff] %v4576_v15  ;;  %vm1937_vm8 = vcmp.eq.f32.partialorder %v4564_v9, inf  ;;  %vm1939_vm9 = vcmp.eq.f32.partialorder %v4564_v9, 0.0  ;;  %3751 = vrsqrt.f32 %v4668_v55  ;;  %v1847_v43 = vsub.f32 1.0, %v1799_v57 }
 0x1c8   : > { %v1940_v11 = vand.u32 2147483648, %v4564_v9  ;;  %3753 = vrsqrt.f32 %v4683_v4  ;;  %v4719_v10 = vmax.f32 %v1846_v5, 0.0  ;;  %v1849_v2 = vsub.f32 1.0, %v1801_v13 }
 0x1c9   : > { %vm1951_vm10 = vcmp.eq.f32.partialorder %v4572_v12, inf  ;;  %vm1953_vm11 = vcmp.eq.f32.partialorder %v4572_v12, 0.0  ;;  %v4726_v16 = vmul.f32 0.87758255, %v4534_v54  ;;  %v4729_v57 = vadd.f32 -0.23971277, %v4534_v54 }
 0x1ca   : > { %v1954_v13 = vand.u32 2147483648, %v4572_v12  ;;  %vm1944_vm12 = vcmp.eq.f32.partialorder %v4596_v22, inf  ;;  %vm1946_vm13 = vcmp.eq.f32.partialorder %v4596_v22, 0.0  ;;  %3755 = vrsqrt.f32 %v4719_v10 }
 0x1cb   : > { %v4589_v20 = vpop.f32.mrb[8].mxu0  ;;  %v4591_v21 = vpop.f32.mrb[8].mxu1  ;;  %6555 = vst [vmem:[#allocation40_spill] sm:$0xff] %v4729_v57  ;;  %vm1958_vm14 = vcmp.eq.f32.partialorder %v4633_v37, inf  ;;  %vm1960_vm15 = vcmp.eq.f32.partialorder %v4633_v37, 0.0  ;;  %vm1965_vm0 = vcmp.eq.f32.partialorder %v4654_v45, inf }
 0x1cc   : > { %6535 = vst [vmem:[#allocation21_spill] sm:$0xff] %v4591_v21  ;;  %v4600_v25 = vpop.f32.mrb[9].mxu0  ;;  %v4602_v26 = vpop.f32.mrb[9].mxu1  ;;  %vm1979_vm1 = vcmp.eq.f32.partialorder %v4668_v55, inf  ;;  %vm1967_vm2 = vcmp.eq.f32.partialorder %v4654_v45, 0.0  ;;  %vm1981_vm3 = vcmp.eq.f32.partialorder %v4668_v55, 0.0 }
 0x1cd   : > { %6536 = vst [vmem:[#allocation22_spill] sm:$0xff] %v4600_v25  ;;  %6537 = vst [vmem:[#allocation23_spill] sm:$0xff] %v4602_v26  ;;  %v4604_v27 = vpop.f32.mrb[10].mxu0  ;;  %v4606_v28 = vpop.f32.mrb[10].mxu1  ;;  %vm1972_vm4 = vcmp.eq.f32.partialorder %v4683_v4, inf  ;;  %vm1974_vm5 = vcmp.eq.f32.partialorder %v4683_v4, 0.0 }
 0x1ce   : > { %v4609_v30 = vpop.f32.mrb[11].mxu0  ;;  %v4611_v31 = vpop.f32.mrb[11].mxu1  ;;  %v1975_v36 = vand.u32 2147483648, %v4683_v4  ;;  %vm1986_vm6 = vcmp.eq.f32.partialorder %v4719_v10, inf  ;;  %vm1988_vm7 = vcmp.eq.f32.partialorder %v4719_v10, 0.0 }
 0x1cf   : > { %v3742_v17 = vpop.eup %3741 }
 0x1d0   : > { %v3744_v35 = vpop.eup %3743 }
 0x1d1   : > { %v1950_v18 = vmul.f32 %v3744_v35, %v4572_v12  ;;  %v3746_v48 = vpop.eup %3745  ;;  %v4740_v35 = vmax.f32 %v1847_v43, 0.0 }
 0x1d3   : > { %v4656_v46 = vpop.f32.mrb[12].mxu0  ;;  %v4658_v47 = vpop.f32.mrb[12].mxu1  ;;  %v1952_v43 = vsel %vm1951_vm10, %v4572_v12, %v1950_v18  ;;  %v1800_v18 = vmul.f32 %v4550_v0, %v4550_v0  ;;  %3757 = vrsqrt.f32 %v4740_v35 }
 0x1d4   : > { %6543 = vst [vmem:[#allocation29_spill] sm:$0xff] %v4656_v46  ;;  %6544 = vst [vmem:[#allocation30_spill] sm:$0xff] %v4658_v47  ;;  %v4672_v58 = vpop.f32.mrb[13].mxu0  ;;  %v4674_v63 = vpop.f32.mrb[13].mxu1 }
 0x1d5   : > { %6546 = vst [vmem:[#allocation32_spill] sm:$0xff] %v4672_v58  ;;  %6547 = vst [vmem:[#allocation33_spill] sm:$0xff] %v4674_v63  ;;  %v4687_v14 = vpop.f32.mrb[14].mxu0  ;;  %v4695_v24 = vpop.f32.mrb[14].mxu1  ;;  %v1848_v12 = vsub.f32 1.0, %v1800_v18 }
 0x1d6   : > { %6549 = vst [vmem:[#allocation35_spill] sm:$0xff] %v4687_v14  ;;  %6550 = vst [vmem:[#allocation36_spill] sm:$0xff] %v4695_v24  ;;  %v4697_v29 = vpop.f32.mrb[15].mxu0  ;;  %v4706_v32 = vpop.f32.mrb[15].mxu1  ;;  %v1947_v24 = vand.u32 2147483648, %v4596_v22 }
 0x1d7   : > { %6551 = vst [vmem:[#allocation37_spill] sm:$0xff] %v4697_v29  ;;  %6552 = vst [vmem:[#allocation38_spill] sm:$0xff] %v4706_v32  ;;  %v1936_v32 = vmul.f32 %v3742_v17, %v4564_v9  ;;  %v4738_v17 = vmul.f32 0.87758255, %v4538_v56  ;;  %v4761_v14 = vadd.f32 -0.23971277, %v4538_v56 }
 0x1d9   : > { %6558 = vst [vmem:[#allocation43_spill] sm:$0xff] %v4738_v17  ;;  %v1938_v54 = vsel %vm1937_vm8, %v4564_v9, %v1936_v32  ;;  %6562 = vst [vmem:[#allocation47_spill] sm:$0xff] %v4761_v14  ;;  %v4770_v32 = vmul.f32 0.87758255, %v4542_v59  ;;  %v1802_v9 = vmul.f32 %v4552_v1, %v4552_v1  ;;  %vm1993_vm8 = vcmp.eq.f32.partialorder %v4740_v35, inf }
 0x1da   : > { %v1941_v56 = vsel %vm1939_vm9, %v1940_v11, %v1938_v54  ;;  %v1982_v11 = vand.u32 2147483648, %v4668_v55  ;;  %vm1995_vm9 = vcmp.eq.f32.partialorder %v4740_v35, 0.0 }
 0x1db   : > { %v4731_v3 = vpop.f32.mrb[16].mxu0  ;;  %v4733_v5 = vpop.f32.mrb[16].mxu1  ;;  %v1850_v42 = vsub.f32 1.0, %v1802_v9 }
 0x1dc   : > { %6556 = vst [vmem:[#allocation41_spill] sm:$0xff] %v4731_v3  ;;  %6557 = vst [vmem:[#allocation42_spill] sm:$0xff] %v4733_v5  ;;  %v4742_v29 = vpop.f32.mrb[17].mxu0  ;;  %v4747_v3 = vmax.f32 %v1849_v2, 0.0  ;;  %v4749_v5 = vpop.f32.mrb[17].mxu1 }
 0x1dd   : > { %6559 = vst [vmem:[#allocation44_spill] sm:$0xff] %v4742_v29  ;;  %6560 = vst [vmem:[#allocation45_spill] sm:$0xff] %v4749_v5  ;;  %v4751_v57 = vpop.f32.mrb[18].mxu0  ;;  %v1943_v29 = vmul.f32 %v3746_v48, %v4596_v22  ;;  %v4763_v63 = vpop.f32.mrb[18].mxu1  ;;  %v4778_v48 = vadd.f32 -0.23971277, %v4542_v59 }
 0x1de   : > { %6561 = vst [vmem:[#allocation46_spill] sm:$0xff] %v4751_v57  ;;  %6563 = vst [vmem:[#allocation48_spill] sm:$0xff] %v4763_v63  ;;  %v4765_v2 = vpop.f32.mrb[19].mxu0  ;;  %v3748_v5 = vpop.eup %3747  ;;  %v1961_v57 = vand.u32 2147483648, %v4633_v37  ;;  %v4784_v63 = vadd.f32 -0.23971277, %v4544_v60  ;;  %3759 = vrsqrt.f32 %v4747_v3 }
 0x1df   : > { %6564 = vst [vmem:[#allocation49_spill] sm:$0xff] %v4765_v2  ;;  %v4774_v58 = vpop.f32.mrb[19].mxu1  ;;  %6566 = vst [vmem:[#allocation51_spill] sm:$0xff] %v4778_v48  ;;  %v4781_v2 = vmul.f32 0.87758255, %v4544_v60  ;;  %v3750_v14 = vpop.eup %3749  ;;  %v1945_v59 = vsel %vm1944_vm12, %v4596_v22, %v1943_v29  ;;  %v1968_v60 = vand.u32 2147483648, %v4654_v45 }
 0x1e0   : > { %6565 = vst [vmem:[#allocation50_spill] sm:$0xff] %v4774_v58  ;;  %6568 = vst [vmem:[#allocation53_spill] sm:$0xff] %v4784_v63  ;;  %v1955_v58 = vsel %vm1953_vm11, %v1954_v13, %v1952_v43  ;;  %v3752_v48 = vpop.eup %3751  ;;  %v1957_v63 = vmul.f32 %v3748_v5, %v4633_v37  ;;  %v1803_v13 = vmul.f32 %v4558_v6, %v4558_v6  ;;  %v4804_v43 = vmul.f32 0.47942555, %v1941_v56 }
 0x1e1   : > { %6567 = vst [vmem:[#allocation52_spill] sm:$0xff] %v4781_v2  ;;  %v3754_v54 = vpop.eup %3753  ;;  %v4806_v47 = vmul.f32 0.47942555, %v1955_v58  ;;  %v4811_v29 = vmul.f32 0.87758255, %v4546_v61  ;;  %v1948_v5 = vsel %vm1946_vm13, %v1947_v24, %v1945_v59  ;;  %v1964_v46 = vmul.f32 %v3750_v14, %v4654_v45 }
 0x1e2   : > { %v1959_v56 = vsel %vm1958_vm14, %v4633_v37, %v1957_v63  ;;  %v1978_v58 = vmul.f32 %v3752_v48, %v4668_v55  ;;  %v1971_v18 = vmul.f32 %v3754_v54, %v4683_v4  ;;  %v3756_v34 = vpop.eup %3755  ;;  %v4824_v22 = vmax.f32 %v1848_v12, 0.0 }
 0x1e3   : > { %6569 = vst [vmem:[#allocation54_spill] sm:$0xff] %v4811_v29  ;;  %v1851_v59 = vsub.f32 1.0, %v1803_v13  ;;  %v1805_v14 = vmul.f32 %v4560_v7, %v4560_v7  ;;  %v4832_v33 = vmul.f32 0.47942555, %v1948_v5  ;;  %v4835_v48 = vadd.f32 -0.23971277, %v4546_v61  ;;  %v3758_v12 = vpop.eup %3757 }
 0x1e4   : > { %v1962_v9 = vsel %vm1960_vm15, %v1961_v57, %v1959_v56  ;;  %v1966_v54 = vsel %vm1965_vm0, %v4654_v45, %v1964_v46  ;;  %v1980_v13 = vsel %vm1979_vm1, %v4668_v55, %v1978_v58  ;;  %v1973_v5 = vsel %vm1972_vm4, %v4683_v4, %v1971_v18 }
 0x1e5   : > { %6570 = vst [vmem:[#allocation55_spill] sm:$0xff] %v4835_v48  ;;  %v1985_v37 = vmul.f32 %v3756_v34, %v4719_v10  ;;  %v4851_v57 = vmax.f32 %v1850_v42, 0.0  ;;  %3761 = vrsqrt.f32 %v4824_v22  ;;  %v4854_v46 = vmax.f32 %v1851_v59, 0.0 }
 0x1e6   : > { %v1853_v63 = vsub.f32 1.0, %v1805_v14  ;;  %v1804_v24 = vmul.f32 %v4562_v8, %v4562_v8  ;;  %v4860_v48 = vmul.f32 0.47942555, %v1962_v9  ;;  %v1989_v18 = vand.u32 2147483648, %v4719_v10 }
 0x1e7   : > { %v4864_v34 = vmul.f32 0.87758255, %v4548_v62  ;;  %v1969_v42 = vsel %vm1967_vm2, %v1968_v60, %v1966_v54  ;;  %v1983_v59 = vsel %vm1981_vm3, %v1982_v11, %v1980_v13  ;;  %v1992_v14 = vmul.f32 %v3758_v12, %v4740_v35 }
 0x1e8   : > { %v3760_v56 = vpop.eup %3759  ;;  %v1976_v58 = vsel %vm1974_vm5, %v1975_v36, %v1973_v5  ;;  %v1987_v9 = vsel %vm1986_vm6, %v4719_v10, %v1985_v37  ;;  %3763 = vrsqrt.f32 %v4851_v57  ;;  %v4880_v60 = vmax.f32 %v1853_v63, 0.0  ;;  %v4897_v63 = vpop.f32.mrb[20].mxu0 }
 0x1e9   : > { %6571 = vst [vmem:[#allocation56_spill] sm:$0xff] %v4864_v34  ;;  %v2006_v61 = vmul.f32 %v3760_v56, %v4747_v3  ;;  %3765 = vrsqrt.f32 %v4854_v46  ;;  %v1852_v45 = vsub.f32 1.0, %v1804_v24  ;;  %v1806_v55 = vmul.f32 %v4576_v15, %v4576_v15  ;;  %6574 = vst [vmem:[#allocation59_spill] sm:$0xff] %v4897_v63 }
 0x1ea   : > { %v4886_v36 = vmul.f32 0.47942555, %v1969_v42  ;;  %v1996_v11 = vand.u32 2147483648, %v4740_v35  ;;  %v4890_v54 = vmul.f32 0.47942555, %v1983_v59  ;;  %v1994_v12 = vsel %vm1993_vm8, %v4740_v35, %v1992_v14 }
 0x1eb   : > { %vm2007_vm10 = vcmp.eq.f32.partialorder %v4747_v3, inf  ;;  %v4895_v24 = vadd.f32 -0.23971277, %v4548_v62  ;;  %v4899_v13 = vmul.f32 0.47942555, %v1976_v58  ;;  %v1990_v5 = vsel %vm1988_vm7, %v1989_v18, %v1987_v9  ;;  %v4918_v9 = vpop.f32.mrb[20].mxu1 }
 0x1ec   : > { %6572 = vst [vmem:[#allocation57_spill] sm:$0xff] %v4890_v54  ;;  %vm2009_vm11 = vcmp.eq.f32.partialorder %v4747_v3, 0.0  ;;  %v1807_v37 = vmul.f32 %v4589_v20, %v4589_v20  ;;  %v2008_v56 = vsel %vm2007_vm10, %v4747_v3, %v2006_v61  ;;  %3767 = vrsqrt.f32 %v4880_v60  ;;  %6575 = vst [vmem:[#allocation60_spill] sm:$0xff] %v4918_v9 }
 0x1ed   : > { %6573 = vst [vmem:[#allocation58_spill] sm:$0xff] %v4895_v24  ;;  %v4908_v42 = vmax.f32 %v1852_v45, 0.0  ;;  %v1854_v59 = vsub.f32 1.0, %v1806_v55  ;;  %v1997_v58 = vsel %vm1995_vm9, %v1996_v11, %v1994_v12  ;;  %v2010_v10 = vand.u32 2147483648, %v4747_v3 }
 0x1ee   : > { %v4916_v18 = vmul.f32 0.87758255, %v4550_v0  ;;  %v4922_v45 = vmul.f32 0.47942555, %v1990_v5  ;;  %v4925_v55 = vadd.f32 -0.23971277, %v4550_v0 }
 0x1ef   : > { %v3762_v4 = vpop.eup %3761  ;;  %v4928_v14 = vmul.f32 0.87758255, %v4552_v1  ;;  %v2011_v11 = vsel %vm2009_vm11, %v2010_v10, %v2008_v56  ;;  %v4935_v12 = vadd.f32 -0.23971277, %v4552_v1  ;;  %v1855_v9 = vsub.f32 1.0, %v1807_v37 }
 0x1f0   : > { %6576 = vst [vmem:[#allocation61_spill] sm:$0xff] %v4922_v45  ;;  %6577 = vst [vmem:[#allocation62_spill] sm:$0xff] %v4925_v55  ;;  %v4937_v63 = vmul.f32 0.47942555, %v1997_v58  ;;  %v4940_v5 = vmul.f32 0.87758255, %v4558_v6  ;;  %3769 = vrsqrt.f32 %v4908_v42  ;;  %v1999_v55 = vmul.f32 %v3762_v4, %v4824_v22 }
 0x1f1   : > { %6578 = vst [vmem:[#allocation63_spill] sm:$0xff] %v4935_v12  ;;  %v4943_v61 = vmax.f32 %v1854_v59, 0.0  ;;  %vm2000_vm12 = vcmp.eq.f32.partialorder %v4824_v22, inf  ;;  %vm2002_vm13 = vcmp.eq.f32.partialorder %v4824_v22, 0.0  ;;  %v2003_v3 = vand.u32 2147483648, %v4824_v22 }
 0x1f2   : > { %6579 = vst [vmem:[#allocation64_spill] sm:$0xff] %v4937_v63  ;;  %v3764_v24 = vpop.eup %3763  ;;  %v4951_v58 = vmul.f32 0.47942555, %v2011_v11  ;;  %vm2014_vm14 = vcmp.eq.f32.partialorder %v4851_v57, inf  ;;  %v4955_v59 = vadd.f32 -0.23971277, %v4558_v6  ;;  %v2001_v6 = vsel %vm2000_vm12, %v4824_v22, %v1999_v55 }
 0x1f3   : > { %v3766_v56 = vpop.eup %3765  ;;  %vm2016_vm15 = vcmp.eq.f32.partialorder %v4851_v57, 0.0  ;;  %v2017_v4 = vand.u32 2147483648, %v4851_v57  ;;  %vm2021_vm0 = vcmp.eq.f32.partialorder %v4854_v46, inf  ;;  %vm2023_vm1 = vcmp.eq.f32.partialorder %v4854_v46, 0.0 }
 0x1f4   : > { %6580 = vst [vmem:[#allocation65_spill] sm:$0xff] %v4951_v58  ;;  %6581 = vst [vmem:[#allocation66_spill] sm:$0xff] %v4955_v59  ;;  %v4961_v10 = vmax.f32 %v1855_v9, 0.0  ;;  %v2013_v11 = vmul.f32 %v3764_v24, %v4851_v57  ;;  %v2024_v35 = vand.u32 2147483648, %v4854_v46  ;;  %3771 = vrsqrt.f32 %v4943_v61  ;;  %v4968_v59 = vpop.f32.mrb[21].mxu0 }
 0x1f5   : > { %6582 = vst [vmem:[#allocation67_spill] sm:$0xff] %v4968_v59  ;;  %v2020_v12 = vmul.f32 %v3766_v56, %v4854_v46  ;;  %v4975_v9 = vmul.f32 0.87758255, %v4560_v7  ;;  %v1809_v37 = vmul.f32 %v4591_v21, %v4591_v21  ;;  %v4982_v29 = vadd.f32 -0.23971277, %v4560_v7 }
 0x1f6   : > { %v3768_v63 = vpop.eup %3767  ;;  %v4985_v59 = vmul.f32 0.87758255, %v4562_v8  ;;  %v1808_v55 = vmul.f32 %v4600_v25, %v4600_v25  ;;  %vm2035_vm2 = vcmp.eq.f32.partialorder %v4880_v60, inf  ;;  %v4991_v56 = vadd.f32 -0.23971277, %v4562_v8 }
 0x1f7   : > { %6583 = vst [vmem:[#allocation68_spill] sm:$0xff] %v4982_v29  ;;  %v4994_v45 = vmul.f32 0.87758255, %v4576_v15  ;;  %3773 = vrsqrt.f32 %v4961_v10  ;;  %v2004_v24 = vsel %vm2002_vm13, %v2003_v3, %v2001_v6  ;;  %v2015_v29 = vsel %vm2014_vm14, %v4851_v57, %v2013_v11 }
 0x1f8   : > { %6584 = vst [vmem:[#allocation69_spill] sm:$0xff] %v4991_v56  ;;  %vm2037_vm3 = vcmp.eq.f32.partialorder %v4880_v60, 0.0  ;;  %v1810_v7 = vmul.f32 %v4602_v26, %v4602_v26  ;;  %v2022_v56 = vsel %vm2021_vm0, %v4854_v46, %v2020_v12  ;;  %v2034_v8 = vmul.f32 %v3768_v63, %v4880_v60  ;;  %v5041_v46 = vpop.f32.mrb[21].mxu1 }
 0x1f9   : > { %v1857_v58 = vsub.f32 1.0, %v1809_v37  ;;  %v1811_v22 = vmul.f32 %v4604_v27, %v4604_v27  ;;  %v2038_v3 = vand.u32 2147483648, %v4880_v60  ;;  %v5013_v11 = vadd.f32 -0.23971277, %v4576_v15  ;;  %6588 = vst [vmem:[#allocation73_spill] sm:$0xff] %v5041_v46 }
 0x1fa   : > { %v3770_v6 = vpop.eup %3769  ;;  %v5016_v34 = vmul.f32 0.87758255, %v4589_v20  ;;  %v1856_v2 = vsub.f32 1.0, %v1808_v55  ;;  %v5018_v1 = vmul.f32 0.47942555, %v2004_v24  ;;  %vm2028_vm4 = vcmp.eq.f32.partialorder %v4908_v42, inf }
 0x1fb   : > { %6585 = vst [vmem:[#allocation70_spill] sm:$0xff] %v5013_v11  ;;  %vm2030_vm5 = vcmp.eq.f32.partialorder %v4908_v42, 0.0  ;;  %v2031_v63 = vand.u32 2147483648, %v4908_v42  ;;  %v2018_v12 = vsel %vm2016_vm15, %v2017_v4, %v2015_v29  ;;  %v2025_v37 = vsel %vm2023_vm1, %v2024_v35, %v2022_v56 }
 0x1fc   : > { %6586 = vst [vmem:[#allocation71_spill] sm:$0xff] %v5016_v34  ;;  %v1858_v15 = vsub.f32 1.0, %v1810_v7  ;;  %v1813_v11 = vmul.f32 %v4606_v28, %v4606_v28  ;;  %v2036_v24 = vsel %vm2035_vm2, %v4880_v60, %v2034_v8  ;;  %v2027_v55 = vmul.f32 %v3770_v6, %v4908_v42 }
 0x1fd   : > { %v5033_v62 = vmax.f32 %v1857_v58, 0.0  ;;  %v1859_v54 = vsub.f32 1.0, %v1811_v22  ;;  %vm2042_vm6 = vcmp.eq.f32.partialorder %v4943_v61, inf  ;;  %v5037_v29 = vadd.f32 -0.23971277, %v4589_v20 }
 0x1fe   : > { %v3772_v17 = vpop.eup %3771  ;;  %v5039_v57 = vmax.f32 %v1856_v2, 0.0  ;;  %v1861_v7 = vsub.f32 1.0, %v1813_v11  ;;  %v5043_v35 = vmul.f32 0.47942555, %v2018_v12  ;;  %v5045_v4 = vmul.f32 0.47942555, %v2025_v37 }
 0x1ff   : > { %6587 = vst [vmem:[#allocation72_spill] sm:$0xff] %v5037_v29  ;;  %vm2044_vm7 = vcmp.eq.f32.partialorder %v4943_v61, 0.0  ;;  %v1812_v8 = vmul.f32 %v4609_v30, %v4609_v30  ;;  %vm2415_vm8 = vcmp.gt.f32.partialorder %v4526_v50, -0.87758255  ;;  %vm2417_vm9 = vcmp.gt.f32.partialorder %v4528_v51, -0.87758255 }
 0x200   : > { %vm2416_vm10 = vcmp.gt.f32.partialorder %v4530_v52, -0.87758255  ;;  %v2039_v58 = vsel %vm2037_vm3, %v2038_v3, %v2036_v24  ;;  %v2045_v56 = vand.u32 2147483648, %v4943_v61  ;;  %v5058_v22 = vmax.f32 %v1858_v15, 0.0  ;;  %v5068_v2 = vpop.f32.mrb[22].mxu0 }
 0x201   : > { %v3774_v6 = vpop.eup %3773  ;;  %vm2418_vm11 = vcmp.gt.f32.partialorder %v4532_v53, -0.87758255  ;;  %v2029_v11 = vsel %vm2028_vm4, %v4908_v42, %v2027_v55  ;;  %v2041_v12 = vmul.f32 %v3772_v17, %v4943_v61  ;;  %3775 = vrsqrt.f32 %v5033_v62  ;;  %6589 = vst [vmem:[#allocation74_spill] sm:$0xff] %v5068_v2  ;;  %v5115_v46 = vpop.f32.mrb[23].mxu0 }
 0x202   : > { %v5066_v37 = vmax.f32 %v1859_v54, 0.0  ;;  %v5071_v60 = vmul.f32 0.87758255, %v4591_v21  ;;  %3777 = vrsqrt.f32 %v5039_v57  ;;  %v5074_v15 = vmax.f32 %v1861_v7, 0.0  ;;  %6595 = vst [vmem:[#allocation80_spill] sm:$0xff] %v5115_v46  ;;  %v6608_v46 = vld [vmem:[#allocation29_spill] sm:$0xff] }
 0x203   : > { %v1860_v3 = vsub.f32 1.0, %v1812_v8  ;;  %v5080_v55 = vmul.f32 0.47942555, %v2039_v58  ;;  %vm2049_vm12 = vcmp.eq.f32.partialorder %v4961_v10, inf  ;;  %v2032_v54 = vsel %vm2030_vm5, %v2031_v63, %v2029_v11  ;;  %v5089_v8 = vpop.f32.mrb[22].mxu1 }
 0x204   : > { %6590 = vst [vmem:[#allocation75_spill] sm:$0xff] %v5071_v60  ;;  %v2048_v2 = vmul.f32 %v3774_v6, %v4961_v10  ;;  %vm2051_vm13 = vcmp.eq.f32.partialorder %v4961_v10, 0.0  ;;  %v2052_v7 = vand.u32 2147483648, %v4961_v10  ;;  %3779 = vrsqrt.f32 %v5058_v22  ;;  %6591 = vst [vmem:[#allocation76_spill] sm:$0xff] %v5089_v8  ;;  %v6634_v60 = vld [vmem:[#allocation36_spill] sm:$0xff] }
 0x205   : > { %v2043_v58 = vsel %vm2042_vm6, %v4943_v61, %v2041_v12  ;;  %3781 = vrsqrt.f32 %v5066_v37  ;;  %v5095_v17 = vmax.f32 %v1860_v3, 0.0  ;;  %v1814_v42 = vmul.f32 %v4611_v31, %v4611_v31  ;;  %v6607_v3 = vld [vmem:[#allocation27_spill] sm:$0xff] }
 0x206   : > { %v5100_v63 = vadd.f32 -0.23971277, %v4591_v21  ;;  %v5103_v6 = vmul.f32 0.87758255, %v4600_v25  ;;  %v5106_v11 = vadd.f32 -0.23971277, %v4600_v25  ;;  %3783 = vrsqrt.f32 %v5074_v15 }
 0x207   : > { %v5111_v24 = vmul.f32 0.47942555, %v2032_v54  ;;  %v2046_v29 = vsel %vm2044_vm7, %v2045_v56, %v2043_v58  ;;  %v5125_v12 = vmul.f32 0.87758255, %v4602_v26  ;;  %v1862_v54 = vsub.f32 1.0, %v1814_v42 }
 0x208   : > { %6592 = vst [vmem:[#allocation77_spill] sm:$0xff] %v5100_v63  ;;  %6593 = vst [vmem:[#allocation78_spill] sm:$0xff] %v5103_v6  ;;  %v5117_v63 = vpop.f32.mrb[23].mxu1  ;;  %vm2063_vm14 = vcmp.eq.f32.partialorder %v5033_v62, inf  ;;  %3785 = vrsqrt.f32 %v5095_v17  ;;  %v6598_v8 = vsub.f32 %v4638_v40, %v4804_v43  ;;  %v6600_v58 = vsub.f32 %v4652_v44, %v4806_v47  ;;  %v6635_v6 = vld [vmem:[#allocation7_spill] sm:$0xff] }
 0x209   : > { %6594 = vst [vmem:[#allocation79_spill] sm:$0xff] %v5106_v11  ;;  %6596 = vst [vmem:[#allocation81_spill] sm:$0xff] %v5117_v63  ;;  %v2050_v11 = vsel %vm2049_vm12, %v4961_v10, %v2048_v2  ;;  %v6599_v2 = vsub.f32 %v4690_v19, %v4832_v33  ;;  %vm2056_vm15 = vcmp.eq.f32.partialorder %v5039_v57, inf  ;;  %v5148_v40 = vmax.f32 %v1862_v54, 0.0 }
 0x20a   : > { %6597 = vst [vmem:[#allocation82_spill] sm:$0xff] %v5125_v12  ;;  %v2511_v61 = vsel %vm2415_vm8, %v6598_v8, %v4641_v41  ;;  %v2513_v42 = vsel %vm2417_vm9, %v6600_v58, %v4666_v49  ;;  %v6601_v41 = vsub.f32 %v4700_v38, %v4860_v48  ;;  %v5161_v47 = vadd.f32 -0.23971277, %v4602_v26  ;;  %v6605_v58 = vld [vmem:[#allocation26_spill] sm:$0xff] }
 0x20b   : > { %v2512_v56 = vsel %vm2416_vm10, %v6599_v2, %v4693_v23  ;;  %v2770_v19 = vsub.f32 %v2511_v61, %v4526_v50  ;;  %v3776_v43 = vpop.eup %3775  ;;  %v2772_v49 = vsub.f32 %v2513_v42, %v4528_v51  ;;  %v5166_v48 = vmul.f32 0.47942555, %v2046_v29  ;;  %v6604_v2 = vld [vmem:[#allocation24_spill] sm:$0xff]  ;;  %v6606_v29 = vld [vmem:[#allocation25_spill] sm:$0xff]  ;;  %v6641_v26 = vld [vmem:[#allocation38_spill] sm:$0xff] }
 0x20c   : > { %v2514_v33 = vsel %vm2418_vm11, %v6601_v41, %v4703_v39  ;;  %v2771_v23 = vsub.f32 %v2512_v56, %v4530_v52  ;;  %6602 = vst [vmem:[#allocation83_spill] sm:$0xff] %v5161_v47  ;;  %v3778_v38 = vpop.eup %3777  ;;  %vm2065_vm0 = vcmp.eq.f32.partialorder %v5033_v62, 0.0  ;;  %vm2070_vm1 = vcmp.eq.f32.partialorder %v5058_v22, inf }
 0x20d   : > { %v2773_v8 = vsub.f32 %v2514_v33, %v4532_v53  ;;  %v2073_v39 = vand.u32 2147483648, %v5058_v22  ;;  %v5172_v54 = vmul.f32 0.87758255, %v4604_v27  ;;  %v2053_v61 = vsel %vm2051_vm13, %v2052_v7, %v2050_v11 }
 0x20e   : > { %vm2058_vm2 = vcmp.eq.f32.partialorder %v5039_v57, 0.0  ;;  %v2818_v56 = vmul.f32 %v6604_v2, %v2770_v19  ;;  %v2819_v42 = vmul.f32 %v6605_v58, %v2771_v23  ;;  %v2820_v41 = vmul.f32 %v6606_v29, %v2772_v49  ;;  %v3780_v33 = vpop.eup %3779 }
 0x20f   : > { %6603 = vst [vmem:[#allocation84_spill] sm:$0xff] %v5172_v54  ;;  %v2062_v44 = vmul.f32 %v3776_v43, %v5033_v62  ;;  %3787 = vrsqrt.f32 %v5148_v40  ;;  %v2821_v63 = vmul.f32 %v6607_v3, %v2773_v8  ;;  %v1815_v47 = vmul.f32 %v6608_v46, %v6608_v46  ;;  %v3782_v10 = vpop.eup %3781 }
 0x210   : > { %v2055_v7 = vmul.f32 %v3778_v38, %v5039_v57  ;;  %vm2072_vm3 = vcmp.eq.f32.partialorder %v5058_v22, 0.0  ;;  %v2866_v11 = vadd.f32 %v2818_v56, %v4526_v50  ;;  %v2867_v19 = vadd.f32 %v2819_v42, %v4530_v52  ;;  %v3784_v49 = vpop.eup %3783 }
 0x211   : > { %v2868_v23 = vadd.f32 %v2820_v41, %v4528_v51  ;;  %v5191_v43 = vadd.f32 -0.23971277, %v4604_v27  ;;  %v5194_v3 = vmul.f32 0.87758255, %v4606_v28  ;;  %v2869_v8 = vadd.f32 %v2821_v63, %v4532_v53 }
 0x212   : > { %v1863_v2 = vsub.f32 1.0, %v1815_v47  ;;  %v5197_v38 = vmul.f32 0.47942555, %v2053_v61  ;;  %v2069_v58 = vmul.f32 %v3780_v33, %v5058_v22  ;;  %v2914_v50 = vmul.f32 30.0, %v2866_v11  ;;  %v3786_v41 = vpop.eup %3785  ;;  %v6612_v47 = vld [vmem:[#allocation30_spill] sm:$0xff]  ;;  %v6622_v11 = vld [vmem:[#allocation33_spill] sm:$0xff] }
 0x213   : > { %6609 = vst [vmem:[#allocation24_spill] sm:$0xff] %v5191_v43  ;;  %6610 = vst [vmem:[#allocation26_spill] sm:$0xff] %v5194_v3  ;;  %v2915_v56 = vmul.f32 30.0, %v2867_v19  ;;  %v2064_v51 = vsel %vm2063_vm14, %v5033_v62, %v2062_v44  ;;  %v2076_v52 = vmul.f32 %v3782_v10, %v5066_v37  ;;  %v2916_v42 = vmul.f32 30.0, %v2868_v23 }
 0x214   : > { %6611 = vst [vmem:[#allocation25_spill] sm:$0xff] %v5197_v38  ;;  %v2917_v29 = vmul.f32 30.0, %v2869_v8  ;;  %v2057_v53 = vsel %vm2056_vm15, %v5039_v57, %v2055_v7  ;;  %v2090_v63 = vmul.f32 %v3784_v49, %v5074_v15  ;;  %2962 = vst [vmem:[%s5210_s8] sm:$0xff] %v2914_v50  ;;  %v5214_v44 = vmax.f32 %v1863_v2, 0.0 }
 0x215   : > { %2963 = vst [vmem:[%s5210_s8 + $0x8] sm:$0xff] %v2915_v56  ;;  %v1817_v61 = vmul.f32 %v6612_v47, %v6612_v47  ;;  %vm2077_vm4 = vcmp.eq.f32.partialorder %v5066_v37, inf  ;;  %v5222_v10 = vadd.f32 -0.23971277, %v4606_v28  ;;  %v5225_v7 = vmul.f32 0.87758255, %v4609_v30 }
 0x216   : > { %2964 = vst [vmem:[%s5210_s8 + $0x10] sm:$0xff] %v2916_v42  ;;  %2965 = vst [vmem:[%s5210_s8 + $0x18] sm:$0xff] %v2917_v29  ;;  %v6615_v19 = vand.u32 2147483648, %v5033_v62  ;;  %v2071_v49 = vsel %vm2070_vm1, %v5058_v22, %v2069_v58  ;;  %vm2079_vm5 = vcmp.eq.f32.partialorder %v5066_v37, 0.0  ;;  %v6616_v8 = vand.u32 2147483648, %v5039_v57 }
 0x217   : > { %6613 = vst [vmem:[#allocation27_spill] sm:$0xff] %v5222_v10  ;;  %6614 = vst [vmem:[#allocation85_spill] sm:$0xff] %v5225_v7  ;;  %v2078_v50 = vsel %vm2077_vm4, %v5066_v37, %v2076_v52  ;;  %vm2091_vm6 = vcmp.eq.f32.partialorder %v5074_v15, inf  ;;  %v1865_v56 = vsub.f32 1.0, %v1817_v61  ;;  %v2083_v62 = vmul.f32 %v3786_v41, %v5095_v17  ;;  %v6662_v7 = vld [vmem:[#allocation18_spill] sm:$0xff] }
 0x218   : > { %v2067_v23 = vsel %vm2065_vm0, %v6615_v19, %v2064_v51  ;;  %v2060_v2 = vsel %vm2058_vm2, %v6616_v8, %v2057_v53  ;;  %v2092_v42 = vsel %vm2091_vm6, %v5074_v15, %v2090_v63  ;;  %3789 = vrsqrt.f32 %v5214_v44  ;;  %v6617_v51 = vld [vmem:[#allocation32_spill] sm:$0xff] }
 0x219   : > { %v1816_v58 = vmul.f32 %v6617_v51, %v6617_v51  ;;  %v3788_v29 = vpop.eup %3787  ;;  %v2074_v19 = vsel %vm2072_vm3, %v2073_v39, %v2071_v49  ;;  %v2080_v57 = vand.u32 2147483648, %v5066_v37  ;;  %v2094_v52 = vand.u32 2147483648, %v5074_v15 }
 0x21a   : > { %v5254_v53 = vmax.f32 %v1865_v56, 0.0  ;;  %v5256_v61 = vmul.f32 0.47942555, %v2067_v23  ;;  %vm2093_vm7 = vcmp.eq.f32.partialorder %v5074_v15, 0.0  ;;  %v5260_v41 = vadd.f32 -0.23971277, %v4609_v30 }
 0x21b   : > { %v1864_v63 = vsub.f32 1.0, %v1816_v58  ;;  %v5262_v8 = vmul.f32 0.47942555, %v2060_v2  ;;  %v2081_v22 = vsel %vm2079_vm5, %v2080_v57, %v2078_v50  ;;  %v2095_v39 = vsel %vm2093_vm7, %v2094_v52, %v2092_v42  ;;  %v6629_v50 = vld [vmem:[#allocation6_spill] sm:$0xff] }
 0x21c   : > { %6618 = vst [vmem:[#allocation86_spill] sm:$0xff] %v5256_v61  ;;  %6619 = vst [vmem:[#allocation87_spill] sm:$0xff] %v5260_v41  ;;  %vm2084_vm8 = vcmp.eq.f32.partialorder %v5095_v17, inf  ;;  %v5267_v49 = vmul.f32 0.47942555, %v2074_v19  ;;  %v2097_v23 = vmul.f32 %v3788_v29, %v5148_v40  ;;  %v1818_v15 = vmul.f32 %v6622_v11, %v6622_v11  ;;  %v6627_v19 = vld [vmem:[#allocation35_spill] sm:$0xff] }
 0x21d   : > { %6620 = vst [vmem:[#allocation88_spill] sm:$0xff] %v5262_v8  ;;  %v2085_v56 = vsel %vm2084_vm8, %v5095_v17, %v2083_v62  ;;  %v2087_v33 = vand.u32 2147483648, %v5095_v17  ;;  %v5275_v2 = vmul.f32 0.87758255, %v4611_v31  ;;  %3791 = vrsqrt.f32 %v5254_v53 }
 0x21e   : > { %6621 = vst [vmem:[#allocation89_spill] sm:$0xff] %v5267_v49  ;;  %v5278_v37 = vmax.f32 %v1864_v63, 0.0  ;;  %v5282_v42 = vmul.f32 0.47942555, %v2081_v22  ;;  %v5284_v62 = vmul.f32 0.47942555, %v2095_v39  ;;  %v1819_v57 = vmul.f32 %v6627_v19, %v6627_v19 }
 0x21f   : > { %6623 = vst [vmem:[#allocation90_spill] sm:$0xff] %v5275_v2  ;;  %vm2086_vm9 = vcmp.eq.f32.partialorder %v5095_v17, 0.0  ;;  %vm2098_vm10 = vcmp.eq.f32.partialorder %v5148_v40, inf  ;;  %v5289_v29 = vadd.f32 -0.23971277, %v4611_v31  ;;  %v1866_v39 = vsub.f32 1.0, %v1818_v15 }
 0x220   : > { %6624 = vst [vmem:[#allocation91_spill] sm:$0xff] %v5282_v42  ;;  %6625 = vst [vmem:[#allocation92_spill] sm:$0xff] %v5284_v62  ;;  %v2088_v58 = vsel %vm2086_vm9, %v2087_v33, %v2085_v56  ;;  %v2099_v22 = vsel %vm2098_vm10, %v5148_v40, %v2097_v23  ;;  %vm2100_vm11 = vcmp.eq.f32.partialorder %v5148_v40, 0.0  ;;  %v2101_v17 = vand.u32 2147483648, %v5148_v40  ;;  %v6632_v40 = vld [vmem:[#allocation8_spill] sm:$0xff]  ;;  %v6636_v63 = vld [vmem:[#allocation37_spill] sm:$0xff] }
 0x221   : > { %6626 = vst [vmem:[#allocation93_spill] sm:$0xff] %v5289_v29  ;;  %v5301_v33 = vmul.f32 0.87758255, %v6608_v46  ;;  %3793 = vrsqrt.f32 %v5278_v37  ;;  %vm2419_vm12 = vcmp.gt.f32.partialorder %v6629_v50, -0.87758255  ;;  %v1867_v61 = vsub.f32 1.0, %v1819_v57 }
 0x222   : > { %v3790_v56 = vpop.eup %3789  ;;  %v5309_v23 = vmul.f32 0.47942555, %v2088_v58  ;;  %v5312_v15 = vadd.f32 -0.23971277, %v6608_v46  ;;  %vm2420_vm13 = vcmp.gt.f32.partialorder %v6632_v40, -0.87758255  ;;  %v2102_v49 = vsel %vm2100_vm11, %v2101_v17, %v2099_v22 }
 0x223   : > { %6628 = vst [vmem:[#allocation94_spill] sm:$0xff] %v5301_v33  ;;  %v5316_v12 = vmul.f32 0.87758255, %v6612_v47  ;;  %v1821_v8 = vmul.f32 %v6634_v60, %v6634_v60  ;;  %vm2421_vm14 = vcmp.gt.f32.partialorder %v6635_v6, -0.87758255  ;;  %vm2105_vm15 = vcmp.eq.f32.partialorder %v5214_v44, inf }
 0x224   : > { %6630 = vst [vmem:[#allocation6_spill] sm:$0xff] %v5309_v23  ;;  %6631 = vst [vmem:[#allocation95_spill] sm:$0xff] %v5312_v15  ;;  %vm2107_vm0 = vcmp.eq.f32.partialorder %v5214_v44, 0.0  ;;  %v5323_v58 = vmax.f32 %v1866_v39, 0.0  ;;  %v1820_v52 = vmul.f32 %v6636_v63, %v6636_v63  ;;  %v6637_v15 = vld [vmem:[#allocation9_spill] sm:$0xff]  ;;  %v2104_v22 = vmul.f32 %v3790_v56, %v5214_v44  ;;  %v6666_v42 = vld [vmem:[#allocation34_spill] sm:$0xff] }
 0x225   : > { %6633 = vst [vmem:[#allocation8_spill] sm:$0xff] %v5316_v12  ;;  %vm2422_vm1 = vcmp.gt.f32.partialorder %v6637_v15, -0.87758255  ;;  %v2108_v57 = vand.u32 2147483648, %v5214_v44  ;;  %v5331_v17 = vadd.f32 -0.23971277, %v6612_v47  ;;  %v1822_v25 = vmul.f32 %v6641_v26, %v6641_v26 }
 0x226   : > { %v5334_v46 = vmul.f32 0.87758255, %v6617_v51  ;;  %v5338_v39 = vmul.f32 0.47942555, %v2102_v49  ;;  %v5341_v34 = vadd.f32 -0.23971277, %v6617_v51  ;;  %3795 = vrsqrt.f32 %v5323_v58 }
 0x227   : > { %6638 = vst [vmem:[#allocation7_spill] sm:$0xff] %v5331_v17  ;;  %v3792_v56 = vpop.eup %3791  ;;  %vm2119_vm2 = vcmp.eq.f32.partialorder %v5254_v53, inf  ;;  %v5347_v47 = vmul.f32 0.87758255, %v6622_v11  ;;  %v5349_v17 = vmax.f32 %v1867_v61, 0.0  ;;  %v1869_v21 = vsub.f32 1.0, %v1821_v8 }
 0x228   : > { %6639 = vst [vmem:[#allocation37_spill] sm:$0xff] %v5338_v39  ;;  %6640 = vst [vmem:[#allocation9_spill] sm:$0xff] %v5341_v34  ;;  %vm2121_vm3 = vcmp.eq.f32.partialorder %v5254_v53, 0.0  ;;  %v2122_v49 = vand.u32 2147483648, %v5254_v53  ;;  %v1868_v38 = vsub.f32 1.0, %v1820_v52  ;;  %v2106_v34 = vsel %vm2105_vm15, %v5214_v44, %v2104_v22  ;;  %v6659_v23 = vld [vmem:[#allocation61_spill] sm:$0xff] }
 0x229   : > { %v5358_v51 = vadd.f32 -0.23971277, %v6622_v11  ;;  %v5361_v29 = vmul.f32 0.87758255, %v6627_v19  ;;  %v1870_v61 = vsub.f32 1.0, %v1822_v25  ;;  %v2118_v62 = vmul.f32 %v3792_v56, %v5254_v53  ;;  %v6644_v11 = vld [vmem:[#allocation40_spill] sm:$0xff] }
 0x22a   : > { %vm2112_vm4 = vcmp.eq.f32.partialorder %v5278_v37, inf  ;;  %v2115_v52 = vand.u32 2147483648, %v5278_v37  ;;  %3797 = vrsqrt.f32 %v5349_v17  ;;  %v5370_v22 = vadd.f32 -0.23971277, %v6627_v19  ;;  %v6646_v56 = vld [vmem:[#allocation10_spill] sm:$0xff] }
 0x22b   : > { %6642 = vst [vmem:[#allocation96_spill] sm:$0xff] %v5358_v51  ;;  %v3794_v3 = vpop.eup %3793  ;;  %v5372_v51 = vmax.f32 %v1869_v21, 0.0  ;;  %v6645_v25 = vsub.f32 %v4726_v16, %v4886_v36  ;;  %vm2423_vm5 = vcmp.gt.f32.partialorder %v6646_v56, -0.87758255  ;;  %v2109_v39 = vsel %vm2107_vm0, %v2108_v57, %v2106_v34  ;;  %v6647_v21 = vld [vmem:[#allocation51_spill] sm:$0xff]  ;;  %v5395_v36 = vpop.permute.xlu1 %2597 }
 0x22c   : > { %6643 = vst [vmem:[#allocation97_spill] sm:$0xff] %v5370_v22  ;;  %vm2114_vm6 = vcmp.eq.f32.partialorder %v5278_v37, 0.0  ;;  %v5385_v2 = vmul.f32 0.87758255, %v6634_v60  ;;  %v5387_v22 = vmax.f32 %v1868_v38, 0.0  ;;  %v6648_v19 = vsub.f32 %v4770_v32, %v4899_v13  ;;  %v6650_v38 = vld [vmem:[#allocation47_spill] sm:$0xff] }
 0x22d   : > { %v2515_v8 = vsel %vm2419_vm12, %v6645_v25, %v6644_v11  ;;  %vm2424_vm7 = vcmp.gt.f32.partialorder %v4550_v0, -0.87758255  ;;  %v5400_v44 = vadd.f32 -0.23971277, %v6634_v60  ;;  %v5402_v11 = vmax.f32 %v1870_v61, 0.0  ;;  %v6651_v57 = vld [vmem:[#allocation43_spill] sm:$0xff] }
 0x22e   : > { %v2516_v16 = vsel %vm2420_vm13, %v6648_v19, %v6647_v21  ;;  %v6652_v25 = vld [vmem:[#allocation57_spill] sm:$0xff]  ;;  %v6655_v19 = vld [vmem:[#allocation11_spill] sm:$0xff]  ;;  %v6656_v21 = vld [vmem:[#allocation12_spill] sm:$0xff]  ;;  %v2120_v34 = vsel %vm2119_vm2, %v5254_v53, %v2118_v62  ;;  %v2111_v61 = vmul.f32 %v3794_v3, %v5278_v37  ;;  %vm2636_vm12 = vcmp.eq.s32.totalorder %v6662_v7, %v5395_v36 }
 0x22f   : > { %6649 = vst [vmem:[#allocation40_spill] sm:$0xff] %v5400_v44  ;;  %v6653_v10 = vsub.f32 %v6651_v57, %v6652_v25  ;;  %v6654_v13 = vld [vmem:[#allocation13_spill] sm:$0xff]  ;;  %vm2425_vm9 = vcmp.gt.f32.partialorder %v6655_v19, -0.87758255  ;;  %vm2426_vm10 = vcmp.gt.f32.partialorder %v6656_v21, -0.87758255  ;;  %3799 = vrsqrt.f32 %v5372_v51 }
 0x230   : > { %vm2634_vm8 = vcmp.eq.s32.totalorder %v6654_v13, %v5395_v36  ;;  %v6657_v44 = vld [vmem:[#allocation53_spill] sm:$0xff]  ;;  %v6658_v60 = vld [vmem:[#allocation52_spill] sm:$0xff]  ;;  %v5429_v41 = vmul.f32 0.47942555, %v2109_v39  ;;  %v5433_v3 = vmul.f32 0.87758255, %v6636_v63  ;;  %3801 = vrsqrt.f32 %v5387_v22  ;;  %v3796_v43 = vpop.eup %3795 }
 0x231   : > { %v2517_v32 = vsel %vm2421_vm14, %v6653_v10, %v6650_v38  ;;  %v6660_v57 = vsub.f32 %v6658_v60, %v6659_v23  ;;  %v2774_v38 = vsub.f32 %v2515_v8, %v6629_v50  ;;  %v6661_v25 = vld [vmem:[#allocation17_spill] sm:$0xff]  ;;  %v2775_v60 = vsub.f32 %v2516_v16, %v6632_v40  ;;  %v6664_v8 = vld [vmem:[#allocation28_spill] sm:$0xff]  ;;  %v6667_v53 = vld [vmem:[#allocation31_spill] sm:$0xff] }
 0x232   : > { %vm2635_vm11 = vcmp.eq.s32.totalorder %v6661_v25, %v5395_v36  ;;  %6663 = vst [vmem:[#allocation10_spill] sm:$0xff] %v5429_v41  ;;  %v2776_v62 = vsub.f32 %v2517_v32, %v6635_v6  ;;  %v5443_v39 = vadd.f32 -0.23971277, %v6636_v63  ;;  %3803 = vrsqrt.f32 %v5402_v11  ;;  %v6675_v32 = vld [vmem:[#allocation62_spill] sm:$0xff] }
 0x233   : > { %v2518_v10 = vsel %vm2422_vm1, %v6660_v57, %v6657_v44  ;;  %v2822_v44 = vmul.f32 %v6664_v8, %v2774_v38  ;;  %v2123_v57 = vsel %vm2121_vm3, %v2122_v49, %v2120_v34  ;;  %v2823_v54 = vmul.f32 %v6666_v42, %v2775_v60  ;;  %v6668_v42 = vld [vmem:[#allocation39_spill] sm:$0xff] }
 0x234   : > { %v2777_v23 = vsub.f32 %v2518_v10, %v6637_v15  ;;  %6665 = vst [vmem:[#allocation51_spill] sm:$0xff] %v5443_v39  ;;  %v2113_v16 = vsel %vm2112_vm4, %v5278_v37, %v2111_v61  ;;  %vm2126_vm13 = vcmp.eq.f32.partialorder %v5323_v58, inf  ;;  %v5453_v10 = vmul.f32 0.87758255, %v6641_v26 }
 0x235   : > { %v2824_v49 = vmul.f32 %v6667_v53, %v2776_v62  ;;  %vm2133_vm14 = vcmp.eq.f32.partialorder %v5349_v17, inf  ;;  %v2870_v60 = vadd.f32 %v2822_v44, %v6629_v50  ;;  %v2871_v61 = vadd.f32 %v2823_v54, %v6632_v40  ;;  %v3798_v53 = vpop.eup %3797  ;;  %v6671_v50 = vld [vmem:[#allocation55_spill] sm:$0xff]  ;;  %v6672_v44 = vld [vmem:[#allocation54_spill] sm:$0xff]  ;;  %v6673_v54 = vld [vmem:[#allocation64_spill] sm:$0xff] }
 0x236   : > { %v2825_v38 = vmul.f32 %v6668_v42, %v2777_v23  ;;  %v5462_v8 = vmul.f32 0.47942555, %v2123_v57  ;;  %v5466_v39 = vadd.f32 -0.23971277, %v6641_v26  ;;  %v2116_v34 = vsel %vm2114_vm6, %v2115_v52, %v2113_v16  ;;  %v6677_v52 = vld [vmem:[#allocation58_spill] sm:$0xff]  ;;  %v6678_v16 = vld [vmem:[#allocation56_spill] sm:$0xff] }
 0x237   : > { %v2872_v62 = vadd.f32 %v2824_v49, %v6635_v6  ;;  %v2125_v41 = vmul.f32 %v3796_v43, %v5323_v58  ;;  %v6674_v40 = vsub.f32 %v6672_v44, %v6673_v54  ;;  %v2918_v42 = vmul.f32 30.0, %v2870_v60  ;;  %v6681_v54 = vld [vmem:[#allocation63_spill] sm:$0xff] }
 0x238   : > { %6669 = vst [vmem:[#allocation47_spill] sm:$0xff] %v5462_v8  ;;  %6670 = vst [vmem:[#allocation43_spill] sm:$0xff] %v5466_v39  ;;  %v2873_v23 = vadd.f32 %v2825_v38, %v6637_v15  ;;  %v2919_v6 = vmul.f32 30.0, %v2871_v61  ;;  %v6676_v37 = vsub.f32 %v4916_v18, %v5018_v1  ;;  %v6679_v38 = vld [vmem:[#allocation65_spill] sm:$0xff]  ;;  %v6682_v60 = vsub.f32 %v4928_v14, %v5043_v35  ;;  %v6683_v1 = vld [vmem:[#allocation20_spill] sm:$0xff] }
 0x239   : > { %v2519_v57 = vsel %vm2423_vm5, %v6674_v40, %v6671_v50  ;;  %v2920_v49 = vmul.f32 30.0, %v2872_v62  ;;  %v6680_v44 = vsub.f32 %v6678_v16, %v6679_v38  ;;  %vm2637_vm15 = vcmp.eq.s32.totalorder %v6683_v1, %v5395_v36  ;;  %2966 = vst [vmem:[%s5210_s8 + $0x20] sm:$0xff] %v2918_v42  ;;  %v6685_v40 = vld [vmem:[#allocation14_spill] sm:$0xff]  ;;  %v6688_v16 = vld [vmem:[#allocation19_spill] sm:$0xff]  ;;  %v6689_v14 = vld [vmem:[#allocation41_spill] sm:$0xff] }
 0x23a   : > { %v2520_v43 = vsel %vm2424_vm7, %v6676_v37, %v6675_v32  ;;  %v2921_v15 = vmul.f32 30.0, %v2873_v23  ;;  %v2522_v61 = vsel %vm2426_vm10, %v6682_v60, %v6681_v54  ;;  %vm2128_vm0 = vcmp.eq.f32.partialorder %v5323_v58, 0.0  ;;  %2967 = vst [vmem:[%s5210_s8 + $0x28] sm:$0xff] %v2919_v6  ;;  %v3800_v23 = vpop.eup %3799 }
 0x23b   : > { %v2521_v50 = vsel %vm2425_vm9, %v6680_v44, %v6677_v52  ;;  %v2132_v32 = vmul.f32 %v3798_v53, %v5349_v17  ;;  %vm2135_vm1 = vcmp.eq.f32.partialorder %v5349_v17, 0.0  ;;  %vm2147_vm2 = vcmp.eq.f32.partialorder %v5372_v51, inf  ;;  %2968 = vst [vmem:[%s5210_s8 + $0x30] sm:$0xff] %v2920_v49  ;;  %v3802_v37 = vpop.eup %3801  ;;  %v6686_v52 = vld [vmem:[#allocation15_spill] sm:$0xff] }
 0x23c   : > { %v6684_v35 = vmov 0.0   ;;  %vm2427_vm3 = vcmp.gt.f32.partialorder %v6685_v40, -0.87758255  ;;  %vm2140_vm4 = vcmp.eq.f32.partialorder %v5387_v22, inf  ;;  %2969 = vst [vmem:[%s5210_s8 + $0x38] sm:$0xff] %v2921_v15  ;;  %v2778_v49 = vsub.f32 %v2519_v57, %v6646_v56  ;;  %v6687_v15 = vld [vmem:[#allocation16_spill] sm:$0xff]  ;;  %v3804_v18 = vpop.eup %3803 }
 0x23d   : > { %v3356_v62 = vsel %vm2634_vm8, 1.0, %v6684_v35  ;;  %v3357_v53 = vsel %vm2635_vm11, 1.0, %v6684_v35  ;;  %v3358_v42 = vsel %vm2636_vm12, 1.0, %v6684_v35  ;;  %v3359_v6 = vsel %vm2637_vm15, 1.0, %v6684_v35 }
 0x23e   : > { %vm2429_vm5 = vcmp.gt.f32.partialorder %v6686_v52, -0.87758255  ;;  %vm2428_vm6 = vcmp.gt.f32.partialorder %v6687_v15, -0.87758255  ;;  %vm2430_vm7 = vcmp.gt.f32.partialorder %v6688_v16, -0.87758255  ;;  %v2779_v44 = vsub.f32 %v2520_v43, %v4550_v0 }
 0x23f   : > { %v5532_v38 = vmul.f32 0.47942555, %v2116_v34  ;;  %v2780_v54 = vsub.f32 %v2521_v50, %v6655_v19  ;;  %v2781_v60 = vsub.f32 %v2522_v61, %v6656_v21  ;;  %v2127_v36 = vsel %vm2126_vm13, %v5323_v58, %v2125_v41 }
 0x240   : > { %vm2154_vm8 = vcmp.eq.f32.partialorder %v5402_v11, inf  ;;  %v2826_v57 = vmul.f32 %v3356_v62, %v2778_v49  ;;  %v1823_v8 = vmul.f32 %v6689_v14, %v6689_v14  ;;  %v2134_v34 = vsel %vm2133_vm14, %v5349_v17, %v2132_v32 }
 0x241   : > { %vm2149_vm9 = vcmp.eq.f32.partialorder %v5372_v51, 0.0  ;;  %vm2142_vm10 = vcmp.eq.f32.partialorder %v5387_v22, 0.0  ;;  %vm2156_vm11 = vcmp.eq.f32.partialorder %v5402_v11, 0.0  ;;  %v2827_v43 = vmul.f32 %v3357_v53, %v2779_v44 }
 0x242   : > { %v2828_v50 = vmul.f32 %v3358_v42, %v2780_v54  ;;  %v2829_v61 = vmul.f32 %v3359_v6, %v2781_v60  ;;  %v2146_v41 = vmul.f32 %v3800_v23, %v5372_v51  ;;  %v2139_v62 = vmul.f32 %v3802_v37, %v5387_v22  ;;  %v6690_v6 = vld [vmem:[#allocation42_spill] sm:$0xff] }
 0x243   : > { %v2874_v49 = vadd.f32 %v2826_v57, %v6646_v56  ;;  %v1871_v12 = vsub.f32 1.0, %v1823_v8  ;;  %v2153_v33 = vmul.f32 %v3804_v18, %v5402_v11  ;;  %v2875_v32 = vadd.f32 %v2827_v43, %v4550_v0  ;;  %v6693_v60 = vld [vmem:[#allocation66_spill] sm:$0xff] }
 0x244   : > { %v2876_v39 = vadd.f32 %v2828_v50, %v6655_v19  ;;  %v2877_v26 = vadd.f32 %v2829_v61, %v6656_v21  ;;  %v2157_v53 = vand.u32 2147483648, %v5402_v11  ;;  %v1825_v56 = vmul.f32 %v6690_v6, %v6690_v6 }
 0x245   : > { %v2922_v42 = vmul.f32 30.0, %v2874_v49  ;;  %v5557_v23 = vmax.f32 %v1871_v12, 0.0  ;;  %v2923_v18 = vmul.f32 30.0, %v2875_v32  ;;  %v6691_v19 = vand.u32 2147483648, %v5323_v58 }
 0x246   : > { %v2924_v0 = vmul.f32 30.0, %v2876_v39  ;;  %v2925_v37 = vmul.f32 30.0, %v2877_v26  ;;  %v6692_v44 = vand.u32 2147483648, %v5349_v17  ;;  %v2148_v54 = vsel %vm2147_vm2, %v5372_v51, %v2146_v41  ;;  %v2601_v39 = vpop.permute.xlu1 %2600 }
 0x247   : > { %v2130_v21 = vsel %vm2128_vm0, %v6691_v19, %v2127_v36  ;;  %2970 = vst [vmem:[%s5210_s8 + $0x40] sm:$0xff] %v2922_v42  ;;  %3805 = vrsqrt.f32 %v5557_v23  ;;  %v2141_v26 = vsel %vm2140_vm4, %v5387_v22, %v2139_v62  ;;  %v2155_v58 = vsel %vm2154_vm8, %v5402_v11, %v2153_v33  ;;  %2971 = vst [vmem:[%s5210_s8 + $0x48] sm:$0xff] %v2923_v18  ;;  %v6697_v33 = vld [vmem:[#allocation68_spill] sm:$0xff]  ;;  %v6699_v62 = vld [vmem:[#allocation70_spill] sm:$0xff] }
 0x248   : > { %v2137_v12 = vsel %vm2135_vm1, %v6692_v44, %v2134_v34  ;;  %2972 = vst [vmem:[%s5210_s8 + $0x50] sm:$0xff] %v2924_v0  ;;  %2973 = vst [vmem:[%s5210_s8 + $0x58] sm:$0xff] %v2925_v37  ;;  %v1873_v17 = vsub.f32 1.0, %v1825_v56  ;;  %v6694_v36 = vsub.f32 %v4940_v5, %v5045_v4  ;;  %v6695_v34 = vld [vmem:[#allocation69_spill] sm:$0xff]  ;;  %v6696_v43 = vsub.f32 %v4985_v59, %v5111_v24  ;;  %v6703_v19 = vld [vmem:[#allocation44_spill] sm:$0xff] }
 0x249   : > { %v6698_v61 = vsub.f32 %v4975_v9, %v5080_v55  ;;  %v6700_v5 = vsub.f32 %v4994_v45, %v5166_v48  ;;  %vm2638_vm12 = vcmp.eq.s32.totalorder %v6654_v13, %v2601_v39  ;;  %vm2639_vm13 = vcmp.eq.s32.totalorder %v6661_v25, %v2601_v39 }
 0x24a   : > { %v2523_v57 = vsel %vm2427_vm3, %v6694_v36, %v6693_v60  ;;  %v2524_v50 = vsel %vm2428_vm6, %v6696_v43, %v6695_v34  ;;  %v5610_v59 = vmax.f32 %v1873_v17, 0.0  ;;  %vm2640_vm14 = vcmp.eq.s32.totalorder %v6662_v7, %v2601_v39 }
 0x24b   : > { %v2525_v41 = vsel %vm2429_vm5, %v6698_v61, %v6697_v33  ;;  %v2526_v4 = vsel %vm2430_vm7, %v6700_v5, %v6699_v62  ;;  %vm2641_vm15 = vcmp.eq.s32.totalorder %v6683_v1, %v2601_v39  ;;  %v6701_v9 = vand.u32 2147483648, %v5372_v51 }
 0x24c   : > { %v6702_v45 = vand.u32 2147483648, %v5387_v22  ;;  %v2158_v48 = vsel %vm2156_vm11, %v2157_v53, %v2155_v58  ;;  %v3360_v49 = vsel %vm2638_vm12, 1.0, %v6684_v35  ;;  %3807 = vrsqrt.f32 %v5610_v59 }
 0x24d   : > { %v2151_v24 = vsel %vm2149_vm9, %v6701_v9, %v2148_v54  ;;  %v3361_v32 = vsel %vm2639_vm13, 1.0, %v6684_v35  ;;  %v3362_v42 = vsel %vm2640_vm14, 1.0, %v6684_v35  ;;  %v3363_v56 = vsel %vm2641_vm15, 1.0, %v6684_v35 }
 0x24e   : > { %v2144_v55 = vsel %vm2142_vm10, %v6702_v45, %v2141_v26  ;;  %v2782_v51 = vsub.f32 %v2523_v57, %v6685_v40  ;;  %v2783_v18 = vsub.f32 %v2524_v50, %v6687_v15  ;;  %v2784_v22 = vsub.f32 %v2525_v41, %v6686_v52  ;;  %v6704_v57 = vld [vmem:[#allocation45_spill] sm:$0xff] }
 0x24f   : > { %v2785_v0 = vsub.f32 %v2526_v4, %v6688_v16  ;;  %v5634_v11 = vmul.f32 0.47942555, %v2130_v21  ;;  %v5636_v53 = vmul.f32 0.47942555, %v2137_v12  ;;  %v5638_v37 = vmul.f32 0.47942555, %v2151_v24 }
 0x250   : > { %v1824_v44 = vmul.f32 %v6703_v19, %v6703_v19  ;;  %v2830_v54 = vmul.f32 %v3360_v49, %v2782_v51  ;;  %v2831_v26 = vmul.f32 %v3361_v32, %v2783_v18  ;;  %v2832_v58 = vmul.f32 %v3362_v42, %v2784_v22  ;;  %v6707_v51 = vld [vmem:[#allocation48_spill] sm:$0xff] }
 0x251   : > { %v2833_v17 = vmul.f32 %v3363_v56, %v2785_v0  ;;  %v5642_v39 = vmul.f32 0.47942555, %v2144_v55  ;;  %v5644_v60 = vmul.f32 0.47942555, %v2158_v48  ;;  %v1826_v21 = vmul.f32 %v6704_v57, %v6704_v57  ;;  %v3806_v34 = vpop.eup %3805  ;;  %v6705_v48 = vld [vmem:[#allocation46_spill] sm:$0xff] }
 0x252   : > { %v1872_v36 = vsub.f32 1.0, %v1824_v44  ;;  %v2878_v12 = vadd.f32 %v2830_v54, %v6685_v40  ;;  %v2879_v43 = vadd.f32 %v2831_v26, %v6687_v15  ;;  %v2880_v50 = vadd.f32 %v2832_v58, %v6686_v52 }
 0x253   : > { %v2881_v33 = vadd.f32 %v2833_v17, %v6688_v16  ;;  %v2160_v61 = vmul.f32 %v3806_v34, %v5557_v23  ;;  %vm2161_vm0 = vcmp.eq.f32.partialorder %v5557_v23, inf  ;;  %v1874_v62 = vsub.f32 1.0, %v1826_v21 }
 0x254   : > { %v5654_v41 = vmax.f32 %v1872_v36, 0.0  ;;  %v2926_v5 = vmul.f32 30.0, %v2878_v12  ;;  %v2927_v4 = vmul.f32 30.0, %v2879_v43  ;;  %v2928_v40 = vmul.f32 30.0, %v2880_v50  ;;  %v6712_v43 = vld [vmem:[#allocation49_spill] sm:$0xff] }
 0x255   : > { %v2929_v9 = vmul.f32 30.0, %v2881_v33  ;;  %v2162_v16 = vsel %vm2161_vm0, %v5557_v23, %v2160_v61  ;;  %v2164_v45 = vand.u32 2147483648, %v5557_v23  ;;  %v5669_v55 = vmax.f32 %v1874_v62, 0.0 }
 0x256   : > { %3809 = vrsqrt.f32 %v5654_v41  ;;  %2974 = vst [vmem:[%s5210_s8 + $0x60] sm:$0xff] %v2926_v5  ;;  %2975 = vst [vmem:[%s5210_s8 + $0x68] sm:$0xff] %v2927_v4  ;;  %v1827_v49 = vmul.f32 %v6705_v48, %v6705_v48  ;;  %v3808_v32 = vpop.eup %3807  ;;  %vm2163_vm1 = vcmp.eq.f32.partialorder %v5557_v23, 0.0  ;;  %v5677_v56 = vmul.f32 0.87758255, %v6689_v14 }
 0x257   : > { %2976 = vst [vmem:[%s5210_s8 + $0x70] sm:$0xff] %v2928_v40  ;;  %2977 = vst [vmem:[%s5210_s8 + $0x78] sm:$0xff] %v2929_v9  ;;  %v1829_v18 = vmul.f32 %v6707_v51, %v6707_v51  ;;  %v2165_v0 = vsel %vm2163_vm1, %v2164_v45, %v2162_v16  ;;  %v2174_v44 = vmul.f32 %v3808_v32, %v5610_v59  ;;  %3811 = vrsqrt.f32 %v5669_v55 }
 0x258   : > { %6706 = vst [vmem:[#allocation57_spill] sm:$0xff] %v5677_v56  ;;  %v5686_v54 = vadd.f32 -0.23971277, %v6689_v14  ;;  %vm2175_vm2 = vcmp.eq.f32.partialorder %v5610_v59, inf  ;;  %v5690_v23 = vmul.f32 0.87758255, %v6690_v6  ;;  %v1828_v50 = vmul.f32 %v6712_v43, %v6712_v43 }
 0x259   : > { %v1875_v26 = vsub.f32 1.0, %v1827_v49  ;;  %v2176_v58 = vsel %vm2175_vm2, %v5610_v59, %v2174_v44  ;;  %vm2177_vm3 = vcmp.eq.f32.partialorder %v5610_v59, 0.0  ;;  %v5695_v17 = vadd.f32 -0.23971277, %v6690_v6  ;;  %v6730_v56 = vld [vmem:[#allocation92_spill] sm:$0xff] }
 0x25a   : > { %6708 = vst [vmem:[#allocation13_spill] sm:$0xff] %v5686_v54  ;;  %6709 = vst [vmem:[#allocation11_spill] sm:$0xff] %v5690_v23  ;;  %v1877_v36 = vsub.f32 1.0, %v1829_v18  ;;  %v5697_v21 = vmul.f32 0.47942555, %v2165_v0  ;;  %v2178_v34 = vand.u32 2147483648, %v5610_v59 }
 0x25b   : > { %6710 = vst [vmem:[#allocation12_spill] sm:$0xff] %v5695_v17  ;;  %v5700_v12 = vmax.f32 %v1875_v26, 0.0  ;;  %vm2435_vm4 = vcmp.gt.f32.partialorder %v4604_v27, -0.87758255  ;;  %vm2437_vm5 = vcmp.gt.f32.partialorder %v4606_v28, -0.87758255 }
 0x25c   : > { %6711 = vst [vmem:[#allocation53_spill] sm:$0xff] %v5697_v21  ;;  %vm2436_vm6 = vcmp.gt.f32.partialorder %v4609_v30, -0.87758255  ;;  %v5708_v33 = vmul.f32 0.87758255, %v6703_v19  ;;  %v5713_v62 = vmax.f32 %v1877_v36, 0.0  ;;  %v2179_v4 = vsel %vm2177_vm3, %v2178_v34, %v2176_v58 }
 0x25d   : > { %v5711_v61 = vadd.f32 -0.23971277, %v6703_v19  ;;  %v6714_v59 = vld [vmem:[#allocation50_spill] sm:$0xff]  ;;  %vm2438_vm7 = vcmp.gt.f32.partialorder %v4611_v31, -0.87758255  ;;  %3813 = vrsqrt.f32 %v5700_v12  ;;  %vm2168_vm8 = vcmp.eq.f32.partialorder %v5654_v41, inf }
 0x25e   : > { %v1830_v5 = vmul.f32 %v6714_v59, %v6714_v59  ;;  %v5719_v40 = vmul.f32 0.87758255, %v6704_v57  ;;  %v5722_v9 = vadd.f32 -0.23971277, %v6704_v57  ;;  %vm2170_vm9 = vcmp.eq.f32.partialorder %v5654_v41, 0.0  ;;  %v6729_v21 = vld [vmem:[#allocation26_spill] sm:$0xff] }
 0x25f   : > { %6713 = vst [vmem:[#allocation52_spill] sm:$0xff] %v5711_v61  ;;  %v2171_v16 = vand.u32 2147483648, %v5654_v41  ;;  %3815 = vrsqrt.f32 %v5713_v62  ;;  %vm2182_vm10 = vcmp.eq.f32.partialorder %v5669_v55, inf  ;;  %v5733_v32 = vmul.f32 0.87758255, %v6705_v48  ;;  %v6728_v61 = vld [vmem:[#allocation27_spill] sm:$0xff] }
 0x260   : > { %6715 = vst [vmem:[#allocation61_spill] sm:$0xff] %v5722_v9  ;;  %v3810_v45 = vpop.eup %3809  ;;  %v1876_v18 = vsub.f32 1.0, %v1828_v50  ;;  %v5735_v0 = vmul.f32 0.47942555, %v2179_v4  ;;  %v5739_v26 = vadd.f32 -0.23971277, %v6705_v48  ;;  %v6731_v54 = vsub.f32 %v6729_v21, %v6730_v56 }
 0x261   : > { %v2167_v44 = vmul.f32 %v3810_v45, %v5654_v41  ;;  %v1878_v58 = vsub.f32 1.0, %v1830_v5  ;;  %vm2184_vm11 = vcmp.eq.f32.partialorder %v5669_v55, 0.0  ;;  %v2185_v36 = vand.u32 2147483648, %v5669_v55  ;;  %v3812_v50 = vpop.eup %3811  ;;  %v6725_v9 = vld [vmem:[#allocation85_spill] sm:$0xff] }
 0x262   : > { %6716 = vst [vmem:[#allocation17_spill] sm:$0xff] %v5735_v0  ;;  %6717 = vst [vmem:[#allocation18_spill] sm:$0xff] %v5739_v26  ;;  %v5744_v34 = vmul.f32 0.87758255, %v6707_v51  ;;  %v5747_v49 = vadd.f32 -0.23971277, %v6707_v51  ;;  %v2181_v22 = vmul.f32 %v3812_v50, %v5669_v55 }
 0x263   : > { %v5749_v52 = vmax.f32 %v1876_v18, 0.0  ;;  %v2169_v4 = vsel %vm2168_vm8, %v5654_v41, %v2167_v44  ;;  %vm2189_vm12 = vcmp.eq.f32.partialorder %v5700_v12, inf  ;;  %v5756_v5 = vmul.f32 0.87758255, %v6712_v43  ;;  %v6721_v50 = vld [vmem:[#allocation84_spill] sm:$0xff]  ;;  %v6724_v44 = vld [vmem:[#allocation87_spill] sm:$0xff] }
 0x264   : > { %6718 = vst [vmem:[#allocation28_spill] sm:$0xff] %v5747_v49  ;;  %v5758_v45 = vmax.f32 %v1878_v58, 0.0  ;;  %v2172_v8 = vsel %vm2170_vm9, %v2171_v16, %v2169_v4  ;;  %vm2191_vm13 = vcmp.eq.f32.partialorder %v5700_v12, 0.0  ;;  %v2192_v18 = vand.u32 2147483648, %v5700_v12  ;;  %v2607_v16 = vpop.permute.xlu1 %2606  ;;  %v6720_v58 = vld [vmem:[#allocation24_spill] sm:$0xff]  ;;  %v6722_v4 = vld [vmem:[#allocation91_spill] sm:$0xff] }
 0x265   : > { %3817 = vrsqrt.f32 %v5749_v52  ;;  %vm2203_vm14 = vcmp.eq.f32.partialorder %v5713_v62, inf  ;;  %v2206_v24 = vand.u32 2147483648, %v5713_v62  ;;  %vm2431_vm15 = vcmp.gt.f32.partialorder %v4589_v20, -0.87758255  ;;  %v6726_v0 = vld [vmem:[#allocation6_spill] sm:$0xff]  ;;  %v6734_v26 = vld [vmem:[#allocation37_spill] sm:$0xff] }
 0x266   : > { %3819 = vrsqrt.f32 %v5758_v45  ;;  %v5773_v41 = vadd.f32 -0.23971277, %v6712_v43  ;;  %v6723_v42 = vsub.f32 %v6721_v50, %v6722_v4  ;;  %v6727_v23 = vsub.f32 %v6725_v9, %v6726_v0  ;;  %v6732_v50 = vld [vmem:[#allocation93_spill] sm:$0xff]  ;;  %v6733_v4 = vld [vmem:[#allocation90_spill] sm:$0xff] }
 0x267   : > { %v2533_v49 = vsel %vm2437_vm5, %v6731_v54, %v6728_v61  ;;  %vm2646_vm0 = vcmp.eq.s32.totalorder %v6654_v13, %v2607_v16  ;;  %vm2647_vm1 = vcmp.eq.s32.totalorder %v6661_v25, %v2607_v16  ;;  %v2183_v56 = vsel %vm2182_vm10, %v5669_v55, %v2181_v22  ;;  %v6736_v21 = vld [vmem:[#allocation21_spill] sm:$0xff]  ;;  %v6737_v61 = vld [vmem:[#allocation22_spill] sm:$0xff] }
 0x268   : > { %6719 = vst [vmem:[#allocation34_spill] sm:$0xff] %v5773_v41  ;;  %v2531_v15 = vsel %vm2435_vm4, %v6723_v42, %v6720_v58  ;;  %v2532_v17 = vsel %vm2436_vm6, %v6727_v23, %v6724_v44  ;;  %v5793_v41 = vmul.f32 0.47942555, %v2172_v8  ;;  %v6735_v42 = vsub.f32 %v6733_v4, %v6734_v26  ;;  %v3814_v23 = vpop.eup %3813  ;;  %v6738_v44 = vld [vmem:[#allocation23_spill] sm:$0xff] }
 0x269   : > { %vm2205_vm2 = vcmp.eq.f32.partialorder %v5713_v62, 0.0  ;;  %vm2196_vm3 = vcmp.eq.f32.partialorder %v5749_v52, inf  ;;  %v2199_v8 = vand.u32 2147483648, %v5749_v52  ;;  %vm2648_vm4 = vcmp.eq.s32.totalorder %v6662_v7, %v2607_v16  ;;  %v3816_v54 = vpop.eup %3815 }
 0x26a   : > { %v2534_v58 = vsel %vm2438_vm7, %v6735_v42, %v6732_v50  ;;  %vm2649_vm5 = vcmp.eq.s32.totalorder %v6683_v1, %v2607_v16  ;;  %vm2433_vm6 = vcmp.gt.f32.partialorder %v6736_v21, -0.87758255  ;;  %vm2432_vm7 = vcmp.gt.f32.partialorder %v6737_v61, -0.87758255 }
 0x26b   : > { %v2188_v9 = vmul.f32 %v3814_v23, %v5700_v12  ;;  %v3368_v0 = vsel %vm2646_vm0, 1.0, %v6684_v35  ;;  %v3369_v22 = vsel %vm2647_vm1, 1.0, %v6684_v35  ;;  %v3370_v26 = vsel %vm2648_vm4, 1.0, %v6684_v35 }
 0x26c   : > { %vm2434_vm8 = vcmp.gt.f32.partialorder %v6738_v44, -0.87758255  ;;  %v2202_v50 = vmul.f32 %v3816_v54, %v5713_v62  ;;  %vm2198_vm9 = vcmp.eq.f32.partialorder %v5749_v52, 0.0  ;;  %v3371_v16 = vsel %vm2649_vm5, 1.0, %v6684_v35 }
 0x26d   : > { %v2790_v4 = vsub.f32 %v2531_v15, %v4604_v27  ;;  %v2791_v42 = vsub.f32 %v2532_v17, %v4609_v30  ;;  %v2186_v23 = vsel %vm2184_vm11, %v2185_v36, %v2183_v56  ;;  %v2190_v57 = vsel %vm2189_vm12, %v5700_v12, %v2188_v9 }
 0x26e   : > { %v2792_v19 = vsub.f32 %v2533_v49, %v4606_v28  ;;  %v2793_v6 = vsub.f32 %v2534_v58, %v4611_v31  ;;  %vm2210_vm10 = vcmp.eq.f32.partialorder %v5758_v45, inf  ;;  %vm2212_vm0 = vcmp.eq.f32.partialorder %v5758_v45, 0.0 }
 0x26f   : > { %v2838_v54 = vmul.f32 %v3368_v0, %v2790_v4  ;;  %v2839_v14 = vmul.f32 %v3369_v22, %v2791_v42  ;;  %v2193_v15 = vsel %vm2191_vm13, %v2192_v18, %v2190_v57  ;;  %v2213_v55 = vand.u32 2147483648, %v5758_v45  ;;  %v3818_v56 = vpop.eup %3817  ;;  %v6740_v18 = vld [vmem:[#allocation71_spill] sm:$0xff]  ;;  %v6741_v22 = vld [vmem:[#allocation25_spill] sm:$0xff] }
 0x270   : > { %v2840_v17 = vmul.f32 %v3370_v26, %v2792_v19  ;;  %v2841_v36 = vmul.f32 %v3371_v16, %v2793_v6  ;;  %v5835_v43 = vmul.f32 0.47942555, %v2186_v23  ;;  %v2204_v49 = vsel %vm2203_vm14, %v5713_v62, %v2202_v50  ;;  %v3820_v0 = vpop.eup %3819  ;;  %v6739_v19 = vld [vmem:[#allocation72_spill] sm:$0xff]  ;;  %v2604_v23 = vpop.permute.xlu0 %2603  ;;  %v6747_v62 = vld [vmem:[#allocation77_spill] sm:$0xff] }
 0x271   : > { %v2886_v58 = vadd.f32 %v2838_v54, %v4604_v27  ;;  %v2887_v9 = vadd.f32 %v2839_v14, %v4609_v30  ;;  %v2195_v57 = vmul.f32 %v3818_v56, %v5749_v52  ;;  %v6742_v26 = vsub.f32 %v6740_v18, %v6741_v22  ;;  %v6754_v18 = vld [vmem:[#allocation89_spill] sm:$0xff] }
 0x272   : > { %v2888_v12 = vadd.f32 %v2840_v17, %v4606_v28  ;;  %v2889_v6 = vadd.f32 %v2841_v36, %v4611_v31  ;;  %v5851_v16 = vmul.f32 0.47942555, %v2193_v15  ;;  %v2209_v27 = vmul.f32 %v3820_v0, %v5758_v45  ;;  %v6743_v15 = vld [vmem:[#allocation79_spill] sm:$0xff]  ;;  %v6744_v17 = vld [vmem:[#allocation78_spill] sm:$0xff]  ;;  %v6745_v36 = vld [vmem:[#allocation88_spill] sm:$0xff] }
 0x273   : > { %v2527_v50 = vsel %vm2431_vm15, %v6742_v26, %v6739_v19  ;;  %v2934_v30 = vmul.f32 30.0, %v2886_v58  ;;  %v2935_v14 = vmul.f32 30.0, %v2887_v9  ;;  %v2207_v28 = vsel %vm2205_vm2, %v2206_v24, %v2204_v49  ;;  %v6748_v49 = vld [vmem:[#allocation75_spill] sm:$0xff]  ;;  %v6749_v58 = vld [vmem:[#allocation86_spill] sm:$0xff] }
 0x274   : > { %v2197_v31 = vsel %vm2196_vm3, %v5749_v52, %v2195_v57  ;;  %v2936_v4 = vmul.f32 30.0, %v2888_v12  ;;  %v2937_v42 = vmul.f32 30.0, %v2889_v6  ;;  %v2211_v54 = vsel %vm2210_vm10, %v5758_v45, %v2209_v27  ;;  %v6751_v57 = vld [vmem:[#allocation35_spill] sm:$0xff]  ;;  %v6753_v19 = vld [vmem:[#allocation82_spill] sm:$0xff]  ;;  %v6756_v27 = vld [vmem:[#allocation36_spill] sm:$0xff] }
 0x275   : > { %2982 = vst [vmem:[%s5210_s8 + $0xa0] sm:$0xff] %v2934_v30  ;;  %2983 = vst [vmem:[%s5210_s8 + $0xa8] sm:$0xff] %v2935_v14  ;;  %v6746_v56 = vsub.f32 %v6744_v17, %v6745_v36  ;;  %v6750_v9 = vsub.f32 %v6748_v49, %v6749_v58  ;;  %vm2642_vm11 = vcmp.eq.s32.totalorder %v6654_v13, %v2604_v23  ;;  %vm2443_vm12 = vcmp.gt.f32.partialorder %v6751_v57, -0.87758255  ;;  %v6752_v6 = vld [vmem:[#allocation83_spill] sm:$0xff]  ;;  %v6757_v30 = vld [vmem:[#allocation38_spill] sm:$0xff] }
 0x276   : > { %v2200_v12 = vsel %vm2198_vm9, %v2199_v8, %v2197_v31  ;;  %2984 = vst [vmem:[%s5210_s8 + $0xb0] sm:$0xff] %v2936_v4  ;;  %2985 = vst [vmem:[%s5210_s8 + $0xb8] sm:$0xff] %v2937_v42  ;;  %v6755_v22 = vsub.f32 %v6753_v19, %v6754_v18  ;;  %vm2643_vm13 = vcmp.eq.s32.totalorder %v6661_v25, %v2604_v23  ;;  %vm2445_vm15 = vcmp.gt.f32.partialorder %v6756_v27, -0.87758255  ;;  %v6760_v18 = vld [vmem:[#allocation30_spill] sm:$0xff] }
 0x277   : > { %v2528_v24 = vsel %vm2432_vm7, %v6746_v56, %v6743_v15  ;;  %v2529_v0 = vsel %vm2433_vm6, %v6750_v9, %v6747_v62  ;;  %vm2644_vm14 = vcmp.eq.s32.totalorder %v6662_v7, %v2604_v23  ;;  %vm2444_vm1 = vcmp.gt.f32.partialorder %v6636_v63, -0.87758255  ;;  %v6758_v62 = vld [vmem:[#allocation29_spill] sm:$0xff] }
 0x278   : > { %v2530_v26 = vsel %vm2434_vm8, %v6755_v22, %v6752_v6  ;;  %vm2446_vm2 = vcmp.gt.f32.partialorder %v6757_v30, -0.87758255  ;;  %v5893_v52 = vmul.f32 0.47942555, %v2207_v28  ;;  %v2214_v8 = vsel %vm2212_vm0, %v2213_v55, %v2211_v54  ;;  %v6761_v22 = vld [vmem:[#allocation33_spill] sm:$0xff]  ;;  %v6781_v6 = vld [vmem:[#allocation47_spill] sm:$0xff] }
 0x279   : > { %vm2645_vm3 = vcmp.eq.s32.totalorder %v6683_v1, %v2604_v23  ;;  %v3364_v14 = vsel %vm2642_vm11, 1.0, %v6684_v35  ;;  %v3365_v31 = vsel %vm2643_vm13, 1.0, %v6684_v35  ;;  %v3366_v4 = vsel %vm2644_vm14, 1.0, %v6684_v35 }
 0x27a   : > { %v3367_v42 = vsel %vm2645_vm3, 1.0, %v6684_v35  ;;  %v2786_v15 = vsub.f32 %v2527_v50, %v4589_v20  ;;  %v5903_v17 = vmul.f32 0.47942555, %v2200_v12  ;;  %v2787_v28 = vsub.f32 %v2528_v24, %v6737_v61  ;;  %v6759_v50 = vld [vmem:[#allocation32_spill] sm:$0xff] }
 0x27b   : > { %v2788_v36 = vsub.f32 %v2529_v0, %v6736_v21  ;;  %v2789_v45 = vsub.f32 %v2530_v26, %v6738_v44  ;;  %v5909_v55 = vmul.f32 0.87758255, %v6714_v59  ;;  %v5911_v23 = vmul.f32 0.47942555, %v2214_v8  ;;  %v6768_v24 = vld [vmem:[#allocation40_spill] sm:$0xff] }
 0x27c   : > { %v5914_v54 = vadd.f32 -0.23971277, %v6714_v59  ;;  %v2834_v56 = vmul.f32 %v3364_v14, %v2786_v15  ;;  %vm2439_vm4 = vcmp.gt.f32.partialorder %v6758_v62, -0.87758255  ;;  %vm2440_vm5 = vcmp.gt.f32.partialorder %v6759_v50, -0.87758255 }
 0x27d   : > { %v2835_v49 = vmul.f32 %v3365_v31, %v2787_v28  ;;  %v2836_v58 = vmul.f32 %v3366_v4, %v2788_v36  ;;  %v2837_v9 = vmul.f32 %v3367_v42, %v2789_v45  ;;  %v2403_v12 = vsub.f32 %v5733_v32, %v5851_v16  ;;  %v6762_v42 = vld [vmem:[#allocation59_spill] sm:$0xff]  ;;  %v6763_v28 = vld [vmem:[#allocation60_spill] sm:$0xff] }
 0x27e   : > { %v2882_v19 = vadd.f32 %v2834_v56, %v4589_v20  ;;  %vm2441_vm6 = vcmp.gt.f32.partialorder %v6760_v18, -0.87758255  ;;  %vm2442_vm7 = vcmp.gt.f32.partialorder %v6761_v22, -0.87758255  ;;  %v5938_v15 = vmul.f32 %v6762_v42, %v6762_v42  ;;  %v2613_v56 = vpop.permute.xlu1 %2612  ;;  %v6780_v4 = vld [vmem:[#allocation8_spill] sm:$0xff] }
 0x27f   : > { %v2883_v8 = vadd.f32 %v2835_v49, %v6737_v61  ;;  %v2884_v14 = vadd.f32 %v2836_v58, %v6736_v21  ;;  %v2885_v31 = vadd.f32 %v2837_v9, %v6738_v44  ;;  %v5942_v36 = vmul.f32 %v6763_v28, %v6763_v28  ;;  %v6764_v49 = vld [vmem:[#allocation97_spill] sm:$0xff]  ;;  %v6766_v9 = vld [vmem:[#allocation51_spill] sm:$0xff] }
 0x280   : > { %v2930_v20 = vmul.f32 30.0, %v2882_v19  ;;  %v6765_v44 = vsub.f32 %v5361_v29, %v5636_v53  ;;  %v6767_v19 = vsub.f32 %v5433_v3, %v5642_v39  ;;  %v6771_v29 = vsub.f32 %v5453_v10, %v5644_v60 }
 0x281   : > { %v2931_v61 = vmul.f32 30.0, %v2883_v8  ;;  %v2932_v45 = vmul.f32 30.0, %v2884_v14  ;;  %v2933_v21 = vmul.f32 30.0, %v2885_v31  ;;  %v6769_v8 = vsub.f32 %v5385_v2, %v5638_v37  ;;  %v6770_v31 = vld [vmem:[#allocation43_spill] sm:$0xff] }
 0x282   : > { %v2539_v58 = vsel %vm2443_vm12, %v6765_v44, %v6764_v49  ;;  %2978 = vst [vmem:[%s5210_s8 + $0x80] sm:$0xff] %v2930_v20  ;;  %v2540_v0 = vsel %vm2444_vm1, %v6767_v19, %v6766_v9  ;;  %v2542_v53 = vsel %vm2446_vm2, %v6771_v29, %v6770_v31  ;;  %vm2654_vm8 = vcmp.eq.s32.totalorder %v6654_v13, %v2613_v56  ;;  %v6775_v49 = vld [vmem:[#allocation10_spill] sm:$0xff]  ;;  %v6777_v9 = vld [vmem:[#allocation9_spill] sm:$0xff]  ;;  %v2610_v29 = vpop.permute.xlu0 %2609 }
 0x283   : > { %v2541_v14 = vsel %vm2445_vm15, %v6769_v8, %v6768_v24  ;;  %2979 = vst [vmem:[%s5210_s8 + $0x88] sm:$0xff] %v2931_v61  ;;  %2980 = vst [vmem:[%s5210_s8 + $0x90] sm:$0xff] %v2932_v45  ;;  %v5974_v3 = vmul.f32 0.87758255, %v6762_v42  ;;  %vm2655_vm9 = vcmp.eq.s32.totalorder %v6661_v25, %v2613_v56  ;;  %vm2656_vm10 = vcmp.eq.s32.totalorder %v6662_v7, %v2613_v56 }
 0x284   : > { %2981 = vst [vmem:[%s5210_s8 + $0x98] sm:$0xff] %v2933_v21  ;;  %vm2657_vm0 = vcmp.eq.s32.totalorder %v6683_v1, %v2613_v56  ;;  %v1879_v2 = vsub.f32 1.0, %v5938_v15  ;;  %v1881_v10 = vsub.f32 1.0, %v5942_v36  ;;  %v3376_v37 = vsel %vm2654_vm8, 1.0, %v6684_v35  ;;  %v6773_v56 = vld [vmem:[#allocation95_spill] sm:$0xff]  ;;  %v6774_v15 = vld [vmem:[#allocation94_spill] sm:$0xff] }
 0x285   : > { %6772 = vst [vmem:[#allocation31_spill] sm:$0xff] %v5974_v3  ;;  %v3377_v39 = vsel %vm2655_vm9, 1.0, %v6684_v35  ;;  %v2798_v60 = vsub.f32 %v2539_v58, %v6751_v57  ;;  %v2799_v24 = vsub.f32 %v2540_v0, %v6636_v63  ;;  %v2800_v20 = vsub.f32 %v2541_v14, %v6756_v27  ;;  %v6816_v3 = vld [vmem:[#allocation61_spill] sm:$0xff] }
 0x286   : > { %v2801_v61 = vsub.f32 %v2542_v53, %v6757_v30  ;;  %v3378_v45 = vsel %vm2656_vm10, 1.0, %v6684_v35  ;;  %v3379_v21 = vsel %vm2657_vm0, 1.0, %v6684_v35  ;;  %v6776_v36 = vsub.f32 %v6774_v15, %v6775_v49  ;;  %v6779_v53 = vld [vmem:[#allocation7_spill] sm:$0xff] }
 0x287   : > { %v6778_v58 = vsub.f32 %v5334_v46, %v5532_v38  ;;  %v2846_v19 = vmul.f32 %v3376_v37, %v2798_v60  ;;  %v2847_v8 = vmul.f32 %v3377_v39, %v2799_v24  ;;  %v2848_v14 = vmul.f32 %v3378_v45, %v2800_v20  ;;  %v6785_v45 = vld [vmem:[#allocation67_spill] sm:$0xff] }
 0x288   : > { %v2535_v44 = vsel %vm2439_vm4, %v6776_v36, %v6773_v56  ;;  %v2849_v31 = vmul.f32 %v3379_v21, %v2801_v61  ;;  %v6782_v26 = vsub.f32 %v6780_v4, %v6781_v6  ;;  %v6783_v56 = vld [vmem:[#allocation96_spill] sm:$0xff]  ;;  %v6784_v49 = vsub.f32 %v5347_v47, %v5634_v11  ;;  %v6786_v36 = vld [vmem:[#allocation73_spill] sm:$0xff] }
 0x289   : > { %v2536_v0 = vsel %vm2440_vm5, %v6778_v58, %v6777_v9  ;;  %vm2650_vm11 = vcmp.eq.s32.totalorder %v6654_v13, %v2610_v29  ;;  %vm2652_vm12 = vcmp.eq.s32.totalorder %v6662_v7, %v2610_v29  ;;  %v2894_v38 = vadd.f32 %v2846_v19, %v6751_v57 }
 0x28a   : > { %v2537_v15 = vsel %vm2441_vm6, %v6782_v26, %v6779_v53  ;;  %v2538_v46 = vsel %vm2442_vm7, %v6784_v49, %v6783_v56  ;;  %v2895_v37 = vadd.f32 %v2847_v8, %v6636_v63  ;;  %v2896_v6 = vadd.f32 %v2848_v14, %v6756_v27 }
 0x28b   : > { %v2897_v26 = vadd.f32 %v2849_v31, %v6757_v30  ;;  %vm2651_vm13 = vcmp.eq.s32.totalorder %v6661_v25, %v2610_v29  ;;  %vm2653_vm14 = vcmp.eq.s32.totalorder %v6683_v1, %v2610_v29  ;;  %v3372_v47 = vsel %vm2650_vm11, 1.0, %v6684_v35 }
 0x28c   : > { %v3374_v11 = vsel %vm2652_vm12, 1.0, %v6684_v35  ;;  %v2942_v4 = vmul.f32 30.0, %v2894_v38  ;;  %v2943_v57 = vmul.f32 30.0, %v2895_v37  ;;  %v2944_v39 = vmul.f32 30.0, %v2896_v6 }
 0x28d   : > { %v2945_v60 = vmul.f32 30.0, %v2897_v26  ;;  %v2794_v63 = vsub.f32 %v2535_v44, %v6758_v62  ;;  %v2795_v27 = vsub.f32 %v2536_v0, %v6759_v50  ;;  %v2796_v24 = vsub.f32 %v2537_v15, %v6760_v18 }
 0x28e   : > { %v2797_v30 = vsub.f32 %v2538_v46, %v6761_v22  ;;  %2990 = vst [vmem:[%s5210_s8 + $0xe0] sm:$0xff] %v2942_v4  ;;  %2991 = vst [vmem:[%s5210_s8 + $0xe8] sm:$0xff] %v2943_v57  ;;  %v3373_v20 = vsel %vm2651_vm13, 1.0, %v6684_v35  ;;  %v3375_v61 = vsel %vm2653_vm14, 1.0, %v6684_v35  ;;  %v1832_v21 = vmul.f32 %v6785_v45, %v6785_v45  ;;  %v6787_v46 = vld [vmem:[#allocation49_spill] sm:$0xff] }
 0x28f   : > { %2992 = vst [vmem:[%s5210_s8 + $0xf0] sm:$0xff] %v2944_v39  ;;  %2993 = vst [vmem:[%s5210_s8 + $0xf8] sm:$0xff] %v2945_v60  ;;  %v1834_v44 = vmul.f32 %v6786_v36, %v6786_v36  ;;  %v2842_v9 = vmul.f32 %v3372_v47, %v2794_v63  ;;  %v2843_v58 = vmul.f32 %v3373_v20, %v2795_v27  ;;  %v6041_v8 = vmax.f32 %v1879_v2, 0.0  ;;  %v6794_v60 = vld [vmem:[#allocation80_spill] sm:$0xff]  ;;  %v6795_v20 = vld [vmem:[#allocation41_spill] sm:$0xff]  ;;  %v2616_v36 = vpop.permute.xlu0 %2615 }
 0x290   : > { %v2844_v0 = vmul.f32 %v3374_v11, %v2796_v24  ;;  %v2845_v19 = vmul.f32 %v3375_v61, %v2797_v30  ;;  %v6043_v14 = vmax.f32 %v1881_v10, 0.0  ;;  %v1880_v31 = vsub.f32 1.0, %v1832_v21  ;;  %v6791_v11 = vld [vmem:[#allocation76_spill] sm:$0xff]  ;;  %v6796_v61 = vld [vmem:[#allocation42_spill] sm:$0xff] }
 0x291   : > { %v1882_v53 = vsub.f32 1.0, %v1834_v44  ;;  %vm2451_vm15 = vcmp.gt.f32.partialorder %v6705_v48, -0.87758255  ;;  %v2890_v29 = vadd.f32 %v2842_v9, %v6758_v62  ;;  %v2891_v15 = vadd.f32 %v2843_v58, %v6759_v50  ;;  %v6797_v21 = vld [vmem:[#allocation44_spill] sm:$0xff]  ;;  %v6798_v44 = vld [vmem:[#allocation45_spill] sm:$0xff] }
 0x292   : > { %v2892_v56 = vadd.f32 %v2844_v0, %v6760_v18  ;;  %v2893_v49 = vadd.f32 %v2845_v19, %v6761_v22  ;;  %vm2453_vm1 = vcmp.gt.f32.partialorder %v6707_v51, -0.87758255  ;;  %vm2452_vm2 = vcmp.gt.f32.partialorder %v6787_v46, -0.87758255  ;;  %v6790_v18 = vld [vmem:[#allocation74_spill] sm:$0xff]  ;;  %v6799_v19 = vld [vmem:[#allocation81_spill] sm:$0xff] }
 0x293   : > { %vm2454_vm3 = vcmp.gt.f32.partialorder %v6714_v59, -0.87758255  ;;  %v6054_v2 = vadd.f32 -0.23971277, %v6762_v42  ;;  %v6057_v62 = vmul.f32 0.87758255, %v6763_v28  ;;  %v1835_v22 = vmul.f32 %v6790_v18, %v6790_v18 }
 0x294   : > { %v6059_v50 = vmax.f32 %v1880_v31, 0.0  ;;  %v2938_v10 = vmul.f32 30.0, %v2890_v29  ;;  %v2939_v38 = vmul.f32 30.0, %v2891_v15  ;;  %v2940_v37 = vmul.f32 30.0, %v2892_v56  ;;  %v6814_v42 = vld [vmem:[#allocation17_spill] sm:$0xff] }
 0x295   : > { %6788 = vst [vmem:[#allocation39_spill] sm:$0xff] %v6054_v2  ;;  %6789 = vst [vmem:[#allocation55_spill] sm:$0xff] %v6057_v62  ;;  %v2941_v6 = vmul.f32 30.0, %v2893_v49  ;;  %3821 = vrsqrt.f32 %v6041_v8  ;;  %v6064_v26 = vmax.f32 %v1882_v53, 0.0  ;;  %v1883_v47 = vsub.f32 1.0, %v1835_v22 }
 0x296   : > { %v1837_v4 = vmul.f32 %v6791_v11, %v6791_v11  ;;  %3823 = vrsqrt.f32 %v6043_v14  ;;  %v6070_v57 = vadd.f32 -0.23971277, %v6763_v28  ;;  %2986 = vst [vmem:[%s5210_s8 + $0xc0] sm:$0xff] %v2938_v10  ;;  %2987 = vst [vmem:[%s5210_s8 + $0xc8] sm:$0xff] %v2939_v38  ;;  %v6077_v39 = vmul.f32 0.87758255, %v6785_v45  ;;  %v2619_v38 = vpop.permute.xlu1 %2618 }
 0x297   : > { %2988 = vst [vmem:[%s5210_s8 + $0xd0] sm:$0xff] %v2940_v37  ;;  %2989 = vst [vmem:[%s5210_s8 + $0xd8] sm:$0xff] %v2941_v6  ;;  %v1836_v63 = vmul.f32 %v6794_v60, %v6794_v60  ;;  %3825 = vrsqrt.f32 %v6059_v50  ;;  %v6082_v27 = vmax.f32 %v1883_v47, 0.0  ;;  %v6085_v24 = vmul.f32 0.87758255, %v6790_v18  ;;  %v6800_v6 = vld [vmem:[#allocation18_spill] sm:$0xff] }
 0x298   : > { %6792 = vst [vmem:[#allocation54_spill] sm:$0xff] %v6070_v57  ;;  %6793 = vst [vmem:[#allocation64_spill] sm:$0xff] %v6077_v39  ;;  %v1885_v30 = vsub.f32 1.0, %v1837_v4  ;;  %vm2447_vm4 = vcmp.gt.f32.partialorder %v6795_v20, -0.87758255  ;;  %v1838_v31 = vmul.f32 %v6799_v19, %v6799_v19  ;;  %3827 = vrsqrt.f32 %v6064_v26  ;;  %v6801_v4 = vld [vmem:[#allocation34_spill] sm:$0xff] }
 0x299   : > { %vm2449_vm5 = vcmp.gt.f32.partialorder %v6796_v61, -0.87758255  ;;  %vm2448_vm6 = vcmp.gt.f32.partialorder %v6797_v21, -0.87758255  ;;  %vm2450_vm7 = vcmp.gt.f32.partialorder %v6798_v44, -0.87758255  ;;  %3829 = vrsqrt.f32 %v6082_v27 }
 0x29a   : > { %v6092_v9 = vadd.f32 -0.23971277, %v6790_v18  ;;  %v6095_v58 = vmul.f32 0.87758255, %v6791_v11  ;;  %v1884_v0 = vsub.f32 1.0, %v1836_v63  ;;  %v6109_v56 = vmax.f32 %v1885_v30, 0.0 }
 0x29b   : > { %v6101_v53 = vadd.f32 -0.23971277, %v6791_v11  ;;  %v6104_v29 = vmul.f32 0.87758255, %v6794_v60  ;;  %v6107_v15 = vadd.f32 -0.23971277, %v6794_v60  ;;  %v2547_v47 = vsel %vm2451_vm15, %v2403_v12, %v6800_v6 }
 0x29c   : > { %v6111_v49 = vmax.f32 %v1884_v0, 0.0  ;;  %v1886_v22 = vsub.f32 1.0, %v1838_v31  ;;  %v6114_v10 = vmul.f32 0.87758255, %v6799_v19  ;;  %v6118_v37 = vadd.f32 -0.23971277, %v6799_v19 }
 0x29d   : > { %vm2662_vm8 = vcmp.eq.s32.totalorder %v6654_v13, %v2619_v38  ;;  %v6802_v63 = vsub.f32 %v5756_v5, %v5903_v17  ;;  %v6803_v0 = vld [vmem:[#allocation28_spill] sm:$0xff]  ;;  %v6804_v31 = vsub.f32 %v5744_v34, %v5893_v52  ;;  %v6805_v16 = vsub.f32 %v5909_v55, %v5911_v23  ;;  %v6807_v55 = vld [vmem:[#allocation57_spill] sm:$0xff] }
 0x29e   : > { %3831 = vrsqrt.f32 %v6111_v49  ;;  %v6146_v6 = vmax.f32 %v1886_v22, 0.0  ;;  %vm2663_vm9 = vcmp.eq.s32.totalorder %v6661_v25, %v2619_v38  ;;  %vm2664_vm10 = vcmp.eq.s32.totalorder %v6662_v7, %v2619_v38  ;;  %v6808_v34 = vld [vmem:[#allocation53_spill] sm:$0xff]  ;;  %v6810_v28 = vld [vmem:[#allocation52_spill] sm:$0xff] }
 0x29f   : > { %v2548_v30 = vsel %vm2452_vm2, %v6802_v63, %v6801_v4  ;;  %v2549_v32 = vsel %vm2453_vm1, %v6804_v31, %v6803_v0  ;;  %v2550_v12 = vsel %vm2454_vm3, %v6805_v16, %v5914_v54  ;;  %vm2665_vm0 = vcmp.eq.s32.totalorder %v6683_v1, %v2619_v38  ;;  %v6155_v17 = vpop.eup %3821  ;;  %v6806_v16 = vld [vmem:[#allocation13_spill] sm:$0xff] }
 0x2a0   : > { %3833 = vrsqrt.f32 %v6109_v56  ;;  %v3384_v5 = vsel %vm2662_vm8, 1.0, %v6684_v35  ;;  %v3385_v52 = vsel %vm2663_vm9, 1.0, %v6684_v35  ;;  %v3386_v23 = vsel %vm2664_vm10, 1.0, %v6684_v35  ;;  %v6161_v22 = vpop.eup %3823 }
 0x2a1   : > { %3835 = vrsqrt.f32 %v6146_v6  ;;  %v3387_v54 = vsel %vm2665_vm0, 1.0, %v6684_v35  ;;  %vm2252_vm11 = vcmp.eq.f32.partialorder %v6111_v49, inf  ;;  %v2806_v38 = vsub.f32 %v2547_v47, %v6705_v48  ;;  %v6168_v31 = vpop.eup %3825 }
 0x2a2   : > { %v2807_v4 = vsub.f32 %v2548_v30, %v6787_v46  ;;  %v2808_v63 = vsub.f32 %v2549_v32, %v6707_v51  ;;  %v2809_v0 = vsub.f32 %v2550_v12, %v6714_v59  ;;  %vm2254_vm12 = vcmp.eq.f32.partialorder %v6111_v49, 0.0  ;;  %v6812_v32 = vld [vmem:[#allocation12_spill] sm:$0xff]  ;;  %v6813_v12 = vld [vmem:[#allocation11_spill] sm:$0xff] }
 0x2a3   : > { %v6809_v57 = vsub.f32 %v6807_v55, %v6808_v34  ;;  %v6811_v47 = vsub.f32 %v5708_v33, %v5793_v41  ;;  %v6815_v62 = vsub.f32 %v6813_v12, %v6814_v42  ;;  %v6817_v34 = vsub.f32 %v5719_v40, %v5835_v43 }
 0x2a4   : > { %v2854_v55 = vmul.f32 %v3384_v5, %v2806_v38  ;;  %v2856_v33 = vmul.f32 %v3386_v23, %v2808_v63  ;;  %v2857_v41 = vmul.f32 %v3387_v54, %v2809_v0  ;;  %vm2266_vm13 = vcmp.eq.f32.partialorder %v6146_v6, inf }
 0x2a5   : > { %v2543_v2 = vsel %vm2447_vm4, %v6809_v57, %v6806_v16  ;;  %v2544_v30 = vsel %vm2448_vm6, %v6811_v47, %v6810_v28  ;;  %v2545_v39 = vsel %vm2449_vm5, %v6815_v62, %v6812_v32  ;;  %v2546_v57 = vsel %vm2450_vm7, %v6817_v34, %v6816_v3  ;;  %v6195_v28 = vpop.eup %3827 }
 0x2a6   : > { %v2855_v16 = vmul.f32 %v3385_v52, %v2807_v4  ;;  %vm2658_vm14 = vcmp.eq.s32.totalorder %v6654_v13, %v2616_v36  ;;  %vm2659_vm15 = vcmp.eq.s32.totalorder %v6661_v25, %v2616_v36  ;;  %vm2660_vm1 = vcmp.eq.s32.totalorder %v6662_v7, %v2616_v36  ;;  %v3830_v62 = vpop.eup %3829 }
 0x2a7   : > { %vm2661_vm2 = vcmp.eq.s32.totalorder %v6683_v1, %v2616_v36  ;;  %vm2268_vm3 = vcmp.eq.f32.partialorder %v6146_v6, 0.0  ;;  %v2902_v43 = vadd.f32 %v2854_v55, %v6705_v48  ;;  %v2904_v42 = vadd.f32 %v2856_v33, %v6707_v51 }
 0x2a8   : > { %v2903_v40 = vadd.f32 %v2855_v16, %v6787_v46  ;;  %v2905_v3 = vadd.f32 %v2857_v41, %v6714_v59  ;;  %v3380_v5 = vsel %vm2658_vm14, 1.0, %v6684_v35  ;;  %v3381_v52 = vsel %vm2659_vm15, 1.0, %v6684_v35  ;;  %v3832_v48 = vpop.eup %3831 }
 0x2a9   : > { %v3382_v36 = vsel %vm2660_vm1, 1.0, %v6684_v35  ;;  %v3383_v23 = vsel %vm2661_vm2, 1.0, %v6684_v35  ;;  %v2950_v54 = vmul.f32 30.0, %v2902_v43  ;;  %v2952_v38 = vmul.f32 30.0, %v2904_v42 }
 0x2aa   : > { %v2951_v46 = vmul.f32 30.0, %v2903_v40  ;;  %v2953_v51 = vmul.f32 30.0, %v2905_v3  ;;  %v2251_v59 = vmul.f32 %v3832_v48, %v6111_v49  ;;  %v2802_v4 = vsub.f32 %v2543_v2, %v6795_v20  ;;  %v3834_v47 = vpop.eup %3833 }
 0x2ab   : > { %v2803_v63 = vsub.f32 %v2544_v30, %v6797_v21  ;;  %v2804_v0 = vsub.f32 %v2545_v39, %v6796_v61  ;;  %vm2460_vm4 = vcmp.gt.f32.partialorder %v6794_v60, -0.87758255  ;;  %2998 = vst [vmem:[%s5210_s8 + $0x120] sm:$0xff] %v2950_v54  ;;  %3000 = vst [vmem:[%s5210_s8 + $0x130] sm:$0xff] %v2952_v38  ;;  %v2805_v32 = vsub.f32 %v2546_v57, %v6798_v44  ;;  %v3836_v2 = vpop.eup %3835 }
 0x2ac   : > { %2999 = vst [vmem:[%s5210_s8 + $0x128] sm:$0xff] %v2951_v46  ;;  %3001 = vst [vmem:[%s5210_s8 + $0x138] sm:$0xff] %v2953_v51  ;;  %v2244_v12 = vmul.f32 %v3830_v62, %v6082_v27  ;;  %vm2245_vm5 = vcmp.eq.f32.partialorder %v6082_v27, inf  ;;  %vm2247_vm6 = vcmp.eq.f32.partialorder %v6082_v27, 0.0  ;;  %v2253_v39 = vsel %vm2252_vm11, %v6111_v49, %v2251_v59  ;;  %v2625_v51 = vpop.permute.xlu1 %2624 }
 0x2ad   : > { %vm2462_vm7 = vcmp.gt.f32.partialorder %v6799_v19, -0.87758255  ;;  %v2850_v30 = vmul.f32 %v3380_v5, %v2802_v4  ;;  %v2851_v34 = vmul.f32 %v3381_v52, %v2803_v63  ;;  %v2852_v55 = vmul.f32 %v3382_v36, %v2804_v0 }
 0x2ae   : > { %v6818_v16 = vand.u32 2147483648, %v6111_v49  ;;  %v2265_v33 = vmul.f32 %v3836_v2, %v6146_v6  ;;  %v2853_v41 = vmul.f32 %v3383_v23, %v2805_v32  ;;  %v2246_v43 = vsel %vm2245_vm5, %v6082_v27, %v2244_v12 }
 0x2af   : > { %v2898_v42 = vadd.f32 %v2850_v30, %v6795_v20  ;;  %v2899_v3 = vadd.f32 %v2851_v34, %v6797_v21  ;;  %v2900_v62 = vadd.f32 %v2852_v55, %v6796_v61  ;;  %v2248_v52 = vand.u32 2147483648, %v6082_v27 }
 0x2b0   : > { %v2256_v57 = vsel %vm2254_vm12, %v6818_v16, %v2253_v39  ;;  %v2267_v5 = vsel %vm2266_vm13, %v6146_v6, %v2265_v33  ;;  %v2901_v49 = vadd.f32 %v2853_v41, %v6798_v44  ;;  %v2258_v36 = vmul.f32 %v3834_v47, %v6109_v56 }
 0x2b1   : > { %v2364_v40 = vmul.f32 0.47942555, %v2256_v57  ;;  %v6819_v20 = vand.u32 2147483648, %v6146_v6  ;;  %v2946_v61 = vmul.f32 30.0, %v2898_v42  ;;  %v2947_v48 = vmul.f32 30.0, %v2899_v3 }
 0x2b2   : > { %v2948_v46 = vmul.f32 30.0, %v2900_v62  ;;  %v2949_v38 = vmul.f32 30.0, %v2901_v49  ;;  %v2249_v44 = vsel %vm2247_vm6, %v2248_v52, %v2246_v43  ;;  %vm2259_vm8 = vcmp.eq.f32.partialorder %v6109_v56, inf }
 0x2b3   : > { %v2412_v23 = vsub.f32 %v6104_v29, %v2364_v40  ;;  %v2270_v21 = vsel %vm2268_vm3, %v6819_v20, %v2267_v5  ;;  %2994 = vst [vmem:[%s5210_s8 + $0x100] sm:$0xff] %v2946_v61  ;;  %2995 = vst [vmem:[%s5210_s8 + $0x108] sm:$0xff] %v2947_v48  ;;  %vm2261_vm9 = vcmp.eq.f32.partialorder %v6109_v56, 0.0  ;;  %v2262_v29 = vand.u32 2147483648, %v6109_v56  ;;  %v6820_v48 = vld [vmem:[#allocation73_spill] sm:$0xff] }
 0x2b4   : > { %v2366_v54 = vmul.f32 0.47942555, %v2270_v21  ;;  %v2363_v6 = vmul.f32 0.47942555, %v2249_v44  ;;  %2996 = vst [vmem:[%s5210_s8 + $0x110] sm:$0xff] %v2948_v46  ;;  %2997 = vst [vmem:[%s5210_s8 + $0x118] sm:$0xff] %v2949_v38  ;;  %v2260_v4 = vsel %vm2259_vm8, %v6109_v56, %v2258_v36  ;;  %vm2670_vm11 = vcmp.eq.s32.totalorder %v6654_v13, %v2625_v51  ;;  %v2622_v46 = vpop.permute.xlu0 %2621 }
 0x2b5   : > { %vm2459_vm10 = vcmp.gt.f32.partialorder %v6790_v18, -0.87758255  ;;  %vm2461_vm0 = vcmp.gt.f32.partialorder %v6791_v11, -0.87758255  ;;  %v2263_v27 = vsel %vm2261_vm9, %v2262_v29, %v2260_v4  ;;  %v2556_v0 = vsel %vm2460_vm4, %v2412_v23, %v6107_v15 }
 0x2b6   : > { %v2414_v59 = vsub.f32 %v6114_v10, %v2366_v54  ;;  %v2411_v63 = vsub.f32 %v6085_v24, %v2363_v6  ;;  %v2365_v47 = vmul.f32 0.47942555, %v2263_v27  ;;  %vm2671_vm12 = vcmp.eq.s32.totalorder %v6661_v25, %v2625_v51  ;;  %v6822_v6 = vld [vmem:[#allocation64_spill] sm:$0xff]  ;;  %v6823_v27 = vld [vmem:[#allocation55_spill] sm:$0xff] }
 0x2b7   : > { %vm2672_vm13 = vcmp.eq.s32.totalorder %v6662_v7, %v2625_v51  ;;  %vm2673_vm14 = vcmp.eq.s32.totalorder %v6683_v1, %v2625_v51  ;;  %v3392_v24 = vsel %vm2670_vm11, 1.0, %v6684_v35  ;;  %v3393_v32 = vsel %vm2671_vm12, 1.0, %v6684_v35 }
 0x2b8   : > { %v2558_v10 = vsel %vm2462_vm7, %v2414_v59, %v6118_v37  ;;  %v2555_v56 = vsel %vm2459_vm10, %v2411_v63, %v6092_v9  ;;  %v2413_v15 = vsub.f32 %v6095_v58, %v2365_v47  ;;  %v3394_v12 = vsel %vm2672_vm13, 1.0, %v6684_v35  ;;  %v6825_v47 = vld [vmem:[#allocation60_spill] sm:$0xff] }
 0x2b9   : > { %v3395_v2 = vsel %vm2673_vm14, 1.0, %v6684_v35  ;;  %v2814_v37 = vsub.f32 %v2555_v56, %v6790_v18  ;;  %v2815_v39 = vsub.f32 %v2556_v0, %v6794_v60  ;;  %v2817_v30 = vsub.f32 %v2558_v10, %v6799_v19  ;;  %v6824_v0 = vld [vmem:[#allocation59_spill] sm:$0xff] }
 0x2ba   : > { %v2216_v9 = vmul.f32 %v6155_v17, %v6041_v8  ;;  %vm2217_vm15 = vcmp.eq.f32.partialorder %v6041_v8, inf  ;;  %v2557_v34 = vsel %vm2461_vm0, %v2413_v15, %v6101_v53  ;;  %vm2219_vm1 = vcmp.eq.f32.partialorder %v6041_v8, 0.0  ;;  %v6826_v10 = vld [vmem:[#allocation39_spill] sm:$0xff] }
 0x2bb   : > { %v2862_v58 = vmul.f32 %v3392_v24, %v2814_v37  ;;  %v2220_v55 = vand.u32 2147483648, %v6041_v8  ;;  %v2816_v16 = vsub.f32 %v2557_v34, %v6791_v11  ;;  %v2863_v57 = vmul.f32 %v3393_v32, %v2815_v39  ;;  %v6827_v32 = vld [vmem:[#allocation54_spill] sm:$0xff] }
 0x2bc   : > { %v2865_v33 = vmul.f32 %v3395_v2, %v2817_v30  ;;  %v2218_v41 = vsel %vm2217_vm15, %v6041_v8, %v2216_v9  ;;  %v2223_v40 = vmul.f32 %v6168_v31, %v6059_v50  ;;  %vm2224_vm2 = vcmp.eq.f32.partialorder %v6059_v50, inf }
 0x2bd   : > { %v2910_v43 = vadd.f32 %v2862_v58, %v6790_v18  ;;  %v2221_v17 = vsel %vm2219_vm1, %v2220_v55, %v2218_v41  ;;  %v2864_v53 = vmul.f32 %v3394_v12, %v2816_v16  ;;  %v2911_v42 = vadd.f32 %v2863_v57, %v6794_v60 }
 0x2be   : > { %v2913_v3 = vadd.f32 %v2865_v33, %v6799_v19  ;;  %vm2226_vm3 = vcmp.eq.f32.partialorder %v6059_v50, 0.0  ;;  %v2225_v8 = vsel %vm2224_vm2, %v6059_v50, %v2223_v40  ;;  %v2227_v18 = vand.u32 2147483648, %v6059_v50 }
 0x2bf   : > { %v2958_v62 = vmul.f32 30.0, %v2910_v43  ;;  %v2230_v5 = vmul.f32 %v6161_v22, %v6043_v14  ;;  %v2912_v31 = vadd.f32 %v2864_v53, %v6791_v11  ;;  %v2959_v49 = vmul.f32 30.0, %v2911_v42 }
 0x2c0   : > { %v2961_v52 = vmul.f32 30.0, %v2913_v3  ;;  %vm2231_vm4 = vcmp.eq.f32.partialorder %v6043_v14, inf  ;;  %v3340_v60 = vadd.f32 -0.23971277, %v6785_v45  ;;  %v2228_v19 = vsel %vm2226_vm3, %v2227_v18, %v2225_v8 }
 0x2c1   : > { %3006 = vst [vmem:[%s5210_s8 + $0x160] sm:$0xff] %v2958_v62  ;;  %v2232_v36 = vsel %vm2231_vm4, %v6043_v14, %v2230_v5  ;;  %v2234_v23 = vand.u32 2147483648, %v6043_v14  ;;  %v2960_v20 = vmul.f32 30.0, %v2912_v31  ;;  %3007 = vst [vmem:[%s5210_s8 + $0x168] sm:$0xff] %v2959_v49  ;;  %vm2233_vm5 = vcmp.eq.f32.partialorder %v6043_v14, 0.0 }
 0x2c2   : > { %3009 = vst [vmem:[%s5210_s8 + $0x178] sm:$0xff] %v2961_v52  ;;  %v2237_v50 = vmul.f32 %v6195_v28, %v6064_v26  ;;  %vm2238_vm6 = vcmp.eq.f32.partialorder %v6064_v26, inf  ;;  %v2241_v22 = vand.u32 2147483648, %v6064_v26  ;;  %v2359_v21 = vmul.f32 0.47942555, %v2221_v17  ;;  %v6821_v28 = vld [vmem:[#allocation31_spill] sm:$0xff] }
 0x2c3   : > { %v2235_v11 = vsel %vm2233_vm5, %v2234_v23, %v2232_v36  ;;  %v2360_v61 = vmul.f32 0.47942555, %v2228_v19  ;;  %v2314_v54 = vmul.f32 0.87758255, %v6820_v48  ;;  %3008 = vst [vmem:[%s5210_s8 + $0x170] sm:$0xff] %v2960_v20  ;;  %vm2240_vm7 = vcmp.eq.f32.partialorder %v6064_v26, 0.0 }
 0x2c4   : > { %v2239_v38 = vsel %vm2238_vm6, %v6064_v26, %v2237_v50  ;;  %v2361_v51 = vmul.f32 0.47942555, %v2235_v11  ;;  %v3342_v14 = vadd.f32 -0.23971277, %v6820_v48  ;;  %v2407_v29 = vsub.f32 %v6821_v28, %v2359_v21 }
 0x2c5   : > { %v2242_v44 = vsel %vm2240_vm7, %v2241_v22, %v2239_v38  ;;  %v2408_v59 = vsub.f32 %v6822_v6, %v2360_v61  ;;  %vm2455_vm8 = vcmp.gt.f32.partialorder %v6824_v0, -0.87758255  ;;  %vm2456_vm9 = vcmp.gt.f32.partialorder %v6785_v45, -0.87758255 }
 0x2c6   : > { %v2362_v4 = vmul.f32 0.47942555, %v2242_v44  ;;  %v2409_v63 = vsub.f32 %v6823_v27, %v2361_v51  ;;  %vm2457_vm10 = vcmp.gt.f32.partialorder %v6825_v47, -0.87758255  ;;  %v2551_v56 = vsel %vm2455_vm8, %v2407_v29, %v6826_v10 }
 0x2c7   : > { %v2552_v26 = vsel %vm2456_vm9, %v2408_v59, %v3340_v60  ;;  %vm2666_vm0 = vcmp.eq.s32.totalorder %v6654_v13, %v2622_v46  ;;  %vm2667_vm11 = vcmp.eq.s32.totalorder %v6661_v25, %v2622_v46  ;;  %vm2668_vm12 = vcmp.eq.s32.totalorder %v6662_v7, %v2622_v46 }
 0x2c8   : > { %v2410_v24 = vsub.f32 %v2314_v54, %v2362_v4  ;;  %v2553_v15 = vsel %vm2457_vm10, %v2409_v63, %v6827_v32  ;;  %vm2458_vm13 = vcmp.gt.f32.partialorder %v6820_v48, -0.87758255  ;;  %vm2669_vm14 = vcmp.eq.s32.totalorder %v6683_v1, %v2622_v46 }
 0x2c9   : > { %v2810_v12 = vsub.f32 %v2551_v56, %v6824_v0  ;;  %v3388_v37 = vsel %vm2666_vm0, 1.0, %v6684_v35  ;;  %v2811_v13 = vsub.f32 %v2552_v26, %v6785_v45  ;;  %v2812_v39 = vsub.f32 %v2553_v15, %v6825_v47 }
 0x2ca   : > { %v2554_v2 = vsel %vm2458_vm13, %v2410_v24, %v3342_v14  ;;  %v3389_v30 = vsel %vm2667_vm11, 1.0, %v6684_v35  ;;  %v3390_v25 = vsel %vm2668_vm12, 1.0, %v6684_v35  ;;  %v3391_v1 = vsel %vm2669_vm14, 1.0, %v6684_v35 }
 0x2cb   : > { %v2813_v7 = vsub.f32 %v2554_v2, %v6820_v48  ;;  %v2858_v9 = vmul.f32 %v3388_v37, %v2810_v12  ;;  %v2859_v34 = vmul.f32 %v3389_v30, %v2811_v13  ;;  %v2860_v58 = vmul.f32 %v3390_v25, %v2812_v39 }
 0x2cd   : > { %v2861_v55 = vmul.f32 %v3391_v1, %v2813_v7  ;;  %v2906_v16 = vadd.f32 %v2858_v9, %v6824_v0  ;;  %v2907_v57 = vadd.f32 %v2859_v34, %v6785_v45  ;;  %v2908_v33 = vadd.f32 %v2860_v58, %v6825_v47 }
 0x2cf   : > { %v2909_v35 = vadd.f32 %v2861_v55, %v6820_v48  ;;  %v2954_v41 = vmul.f32 30.0, %v2906_v16  ;;  %v2955_v43 = vmul.f32 30.0, %v2907_v57  ;;  %v2956_v17 = vmul.f32 30.0, %v2908_v33 }
 0x2d1   : > { %v2957_v45 = vmul.f32 30.0, %v2909_v35  ;;  %3002 = vst [vmem:[%s5210_s8 + $0x140] sm:$0xff] %v2954_v41  ;;  %3003 = vst [vmem:[%s5210_s8 + $0x148] sm:$0xff] %v2955_v43 }
 0x2d2   : > { %3004 = vst [vmem:[%s5210_s8 + $0x150] sm:$0xff] %v2956_v17 }
 0x2d3   : > { %3005 = vst [vmem:[%s5210_s8 + $0x158] sm:$0xff] %v2957_v45 }
 0x2d4   : > { %3850 = shalt.err (!%p3847_p7)
}
 0x2d5   : > { %s3851_s28 = scalar_lea.hbm %s6350_s21, 6144  ;;  %s3855_s4 = scalar_lea.hbm %s6409_s3, 12288 }
 0x2d6   : > { %p3852_p8 = scmp.ne.s32.totalorder %s6350_s21, %s3851_s28  ;;  %p3856_p13 = scmp.lt.u32.totalorder %s6350_s21, %s6409_s3 }
 0x2d7   : > { %p3857_p0 = scmp.lt.u32.totalorder %s3855_s4, %s3851_s28  ;;  %p3859_p2 = scmp.lt.u32.totalorder %s3851_s28, %s6350_s21 }
 0x2d8   : > { %p3853_p11 = pnand %p3852_p8, %p3982_p5 }
 0x2d9   : > { %p3858_p1 = por %p3857_p0, %p3856_p13 }
 0x2da   : > { %p3854_p12 = pneg %p3853_p11 }
 0x2db   : > { %p3860_p3 = por %p3859_p2, %p3858_p1 }
 0x2dd   : > { %p3861_p4 = pnand %p3860_p3, %p3854_p12 }
 0x2df   : > { %3864 = shalt.err (!%p3861_p4)
}
 0x2e0   : > { %s3920_s7 = smov 512   ;;  %s3921_s8 = smov 1024  }
 0x2e1   : > { %s3922_s11 = smov 32  }
 0x2e2   : > { %3451 = dma.vmem_to_hbm [thread:$0]  (%p3982_p5), %s6353_s9, 6144, %s6350_s21, %s3011_s15, %s3920_s7, %s3921_s8, %s3922_s11  }
 0x2e3 PF: > { %s3042_s19 = sand.u32 1, %s3895_s12   ;;  %p3454_p6 = pnand %p3141_p10, %p3993_p9 }
 0x2e4   : > { %s3043_s23 = scalar_lea.sflag [#allocation4], %s3042_s19 }
 0x2e5   : > { %3890 = dma.done.wait (!%p3454_p6), %s3043_s23, 6144  }
 0x2e6   : > { %3892 = vsyncadd (!%p3454_p6), %s3043_s23, 4294961152  ;;  %s16_s17 = sadd.s32 1, %s3915_s17   ;;  %s6828_s12 = smov %s3899_s13 }
 0x2e7   : > { %p13_p7 = scmp.ge.s32.totalorder %s16_s17, 4   ;;  %s6829_s13 = smov %s3903_s14 }
 0x2e8   : > { %s6830_s14 = smov %s3991_s24  ;;  %s6831_s15 = smov %s3911_s16 }
 0x2e9   : > { %s6832_s16 = smov %s6834_s20  ;;  %15 = sbr.rel (!%p13_p7) target bundleno = 4 (0x4), region = 101 }
 0x2f0   :  { %3048 = vsyncpa [#allocation4], 1 }
 0x2f1   :  { %3050 = vsyncpa [#allocation4 + $0x1], 1 }

</bundles_post_ra>
